<compile_context>
chip_gen: v5e
topology: v5e:2x2
jax: 0.10.0
libtpu: 0.0.40
codegen_flags: <defaults>
</compile_context>

<pallas_src>
from functools import partial

import jax
import jax.numpy as jnp
from jax import lax
from jax.experimental import pallas as pl
from jax.experimental.pallas import tpu as pltpu
import numpy as np


def lstm_classifier_kernel(nchunks_ref,                       # SMEM (nb,) prefetch
                           x_ref, len_ref, wih_ref, whh_ref, b_ref,
                           w1_ref, b1_ref, w2_ref, b2_ref,
                           out_ref, gx_ref, h_sc, c_sc, *, time_unroll):
    """One batch tile per grid step.

    x_ref  : (1, T*Bt, Ep) bf16  embedded inputs; row = t*Bt + i (time-major)
    len_ref: (Bt, 1)       i32   valid lengths per sequence
    wih_ref: (Ep, 4*Hp) whh_ref: (Hp, 4*Hp) b_ref: (1, 4*Hp)  LSTM params,
             gate order i,f,g,o; each gate owns its own lane-aligned Hp block
    w1_ref : (Hp, L1) b1_ref: (1, L1)   w2_ref: (L1, Cp) b2_ref: (1, Cp)
    out_ref: (Bt, Cp) f32   padded logits
    gx_ref : (T*Bt, 4*Hp) bf16 VMEM scratch, hoisted input projection (+bias)
    h_sc/c_sc: (Bt, Hp) f32 VMEM scratch, recurrent state
    """
    Bt = len_ref.shape[0]
    T = x_ref.shape[1] // Bt
    Hp = whh_ref.shape[0]

    # (1) Hoisted input projection: ONE (T*Bt, Ep) @ (Ep, 4Hp) MXU matmul with
    #     the bias folded in; stored bf16 (add back onto the f32 h@W_hh later).
    gx_ref[...] = (jnp.dot(x_ref[0], wih_ref[...],
                           preferred_element_type=jnp.float32)
                   + b_ref[...]).astype(gx_ref.dtype)

    lens = len_ref[...]                                   # (Bt, 1) int32
    h_sc[...] = jnp.zeros_like(h_sc)
    c_sc[...] = jnp.zeros_like(c_sc)
    n_chunks = nchunks_ref[pl.program_id(0)]              # ceil(max_len / U)

    def lstm_cell(t, h, c):
        # Clamp the gx row so overshoot steps in the last chunk stay in bounds;
        # their result is discarded by the `lens > t` mask below.
        row = pl.multiple_of(jnp.minimum(t, T - 1) * Bt, Bt)
        # Only the h-dependent matmul stays on the serial, latency-bound chain.
        gates = gx_ref[pl.ds(row, Bt), :].astype(jnp.float32) + jnp.dot(
            h.astype(whh_ref.dtype), whh_ref[...],
            preferred_element_type=jnp.float32)           # (Bt, 4*Hp) f32
        # Hp = 128-lane block per gate -> whole-vreg, lane-aligned slices.
        i = jax.nn.sigmoid(gates[:, 0 * Hp:1 * Hp])
        f = jax.nn.sigmoid(gates[:, 1 * Hp:2 * Hp])
        g = jnp.tanh(gates[:, 2 * Hp:3 * Hp])
        o = jax.nn.sigmoid(gates[:, 3 * Hp:4 * Hp])
        c_new = f * c + i * g
        h_new = o * jnp.tanh(c_new)
        keep = lens > t               # pack_padded_sequence: freeze at t >= len
        return jnp.where(keep, h_new, h), jnp.where(keep, c_new, c)

    # Dynamic-bound loop over chunks; each chunk is statically unrolled so the
    # LLO scheduler sees `time_unroll` steps at once without full-T unroll.
    @pl.loop(0, n_chunks)
    def _(ci):
        h, c = h_sc[...], c_sc[...]
        base = ci * time_unroll
        for j in range(time_unroll):                      # static chunked unroll
            h, c = lstm_cell(base + j, h, c)
        h_sc[...] = h
        c_sc[...] = c

    # Linear(H -> 256) + exact (erf) GELU + Linear(256 -> C), lane-dense output.
    h = h_sc[...]
    z = jnp.dot(h.astype(w1_ref.dtype), w1_ref[...],
                preferred_element_type=jnp.float32) + b1_ref[...]
    z = 0.5 * z * (1.0 + lax.erf(z * jnp.float32(0.7071067811865476)))
    logits = jnp.dot(z.astype(w2_ref.dtype), w2_ref[...],
                     preferred_element_type=jnp.float32) + b2_ref[...]
    out_ref[...] = logits.astype(out_ref.dtype)


def _round_up(x, m):
    return ((x + m - 1) // m) * m


def _pad_gate_matrix(w, rows_to, hp):
    """(R, 4H) -> (rows_to, 4*hp): each gate gets its own lane-aligned hp block.

    Zero padding keeps padded hidden units exactly zero through the recurrence
    (gates=0 => i=f=o=0.5, g=0 => c,h stay 0), so results are unchanged.
    """
    r, four_h = w.shape
    h = four_h // 4
    out = jnp.zeros((rows_to, 4 * hp), w.dtype)
    for g in range(4):
        out = out.at[:r, g * hp: g * hp + h].set(w[:, g * h:(g + 1) * h])
    return out


def _tile_vmem_bytes(bt, T, Ep, Hp, L1, Cp):
    """Rough per-tile VMEM footprint (pipelined operands double-buffered)."""
    x_tile = 2 * T * bt * Ep * 2                               # bf16, 2 buffers
    gx = T * bt * 4 * Hp * 2                                   # bf16 scratch
    weights = 2 * 2 * (Ep * 4 * Hp + Hp * 4 * Hp + Hp * L1 + L1 * Cp)  # bf16 x2
    biases = 2 * 4 * (4 * Hp + L1 + Cp)                        # f32 x2
    out = 2 * bt * Cp * 4
    state = 4 * bt * Hp * 4                                    # h, c + temporaries
    return x_tile + gx + weights + biases + out + state


def _pick_b_tile(B, T, Ep, Hp, L1, Cp, *, cap, min_tiles, vmem_budget):
    """Fill the MXU M dim (<=cap rows) without blowing the VMEM budget."""
    bp8 = _round_up(B, 8)
    bt = min(_round_up(cap, 8), bp8)
    if min_tiles > 1:   # e.g. v7x: keep >=2 tiles so both TensorCores get work
        bt = min(bt, max(8, _round_up(-(-bp8 // min_tiles), 8)))
    while bt > 8 and _tile_vmem_bytes(bt, T, Ep, Hp, L1, Cp) > vmem_budget:
        bt = max(8, _round_up(bt // 2, 8))
    return bt


def lstm_classifier_forward(tokens, lengths, params, *, b_tile=None,
                            b_tile_cap=256, min_tiles=1, time_unroll=8):
    """Plain-JAX glue (embedding lookup, padding, layout) + one pallas_call.

    b_tile_cap: 256 fills the v6e/v7x MXU M dimension; pass 128 on v5e.
    min_tiles : pass 2 on v7x so the parallel batch grid feeds both TCs.
    """
    emb_table, w_ih, w_hh, b_all, w1, b1, w2, b2 = params
    B, T = tokens.shape
    E = emb_table.shape[1]
    H = w_hh.shape[0]
    L1 = w1.shape[1]
    C = w2.shape[1]

    Ep = _round_up(E, 128)      # lane-dense embedding dim
    Hp = _round_up(H, 128)      # one 128-lane block per gate
    Cp = _round_up(C, 128)      # lane-dense logits store

    U = max(1, min(time_unroll, T))
    vmem_budget = 40 * 2 ** 20  # leave headroom under v7x's 64 MiB VMEM
    if b_tile is None:
        b_tile = _pick_b_tile(B, T, Ep, Hp, L1, Cp, cap=b_tile_cap,
                              min_tiles=min_tiles, vmem_budget=vmem_budget)
    Bp = _round_up(B, b_tile)
    nb = Bp // b_tile           # batch grid (parallel)

    # ---- parameter padding / re-layout (pure XLA glue, done once) ----
    wih_p = _pad_gate_matrix(w_ih, Ep, Hp).astype(jnp.bfloat16)
    whh_p = _pad_gate_matrix(w_hh, Hp, Hp).astype(jnp.bfloat16)
    b_p = _pad_gate_matrix(b_all.reshape(1, 4 * H), 1, Hp).astype(jnp.float32)
    w1_p = jnp.zeros((Hp, L1), jnp.float32).at[:H, :].set(w1).astype(jnp.bfloat16)
    b1_p = b1.reshape(1, L1).astype(jnp.float32)
    w2_p = jnp.zeros((L1, Cp), jnp.float32).at[:, :C].set(w2).astype(jnp.bfloat16)
    b2_p = jnp.zeros((1, Cp), jnp.float32).at[:, :C].set(b2.reshape(1, C))

    # ---- inputs: embedding lookup + batch/lane padding + per-tile time-major ----
    x = emb_table[tokens].astype(jnp.float32)                 # (B, T, E) lookup
    x = jnp.pad(x, ((0, Bp - B), (0, 0), (0, Ep - E)))        # (Bp, T, Ep)
    # inside a tile, row index = t*b_tile + i: one contiguous sublane slice
    # yields the whole timestep t.
    x = x.reshape(nb, b_tile, T, Ep).transpose(0, 2, 1, 3)
    x = x.reshape(nb, T * b_tile, Ep).astype(jnp.bfloat16)

    lens_pad = jnp.pad(lengths.astype(jnp.int32), (0, Bp - B))
    lens = lens_pad.reshape(Bp, 1)
    # Per-tile chunk count (scalar-prefetched -> SMEM): bounds the recurrence
    # by the longest sequence in the tile instead of T.
    n_chunks = ((lens_pad.reshape(nb, b_tile).max(axis=1) + U - 1) // U
                ).astype(jnp.int32)

    grid_spec = pltpu.PrefetchScalarGridSpec(
        num_scalar_prefetch=1,
        grid=(nb,),
        in_specs=[
            pl.BlockSpec((1, T * b_tile, Ep), lambda b, nc: (b, 0, 0)),  # x tile
            pl.BlockSpec((b_tile, 1), lambda b, nc: (b, 0)),             # lengths
            pl.BlockSpec((Ep, 4 * Hp), lambda b, nc: (0, 0)),            # W_ih
            pl.BlockSpec((Hp, 4 * Hp), lambda b, nc: (0, 0)),            # W_hh
            pl.BlockSpec((1, 4 * Hp), lambda b, nc: (0, 0)),             # b_ih+b_hh
            pl.BlockSpec((Hp, L1), lambda b, nc: (0, 0)),                # W1
            pl.BlockSpec((1, L1), lambda b, nc: (0, 0)),                 # b1
            pl.BlockSpec((L1, Cp), lambda b, nc: (0, 0)),                # W2
            pl.BlockSpec((1, Cp), lambda b, nc: (0, 0)),                 # b2
        ],
        out_specs=pl.BlockSpec((b_tile, Cp), lambda b, nc: (b, 0)),
        scratch_shapes=[
            pltpu.VMEM((T * b_tile, 4 * Hp), jnp.bfloat16),   # gx (bf16)
            pltpu.VMEM((b_tile, Hp), jnp.float32),            # h state
            pltpu.VMEM((b_tile, Hp), jnp.float32),            # c state
        ],
    )

    est = _tile_vmem_bytes(b_tile, T, Ep, Hp, L1, Cp)
    vmem_limit = int(min(100 * 2 ** 20, max(32 * 2 ** 20, 2 * est)))

    out = pl.pallas_call(
        partial(lstm_classifier_kernel, time_unroll=U),
        out_shape=jax.ShapeDtypeStruct((Bp, Cp), jnp.float32),
        grid_spec=grid_spec,
        compiler_params=pltpu.CompilerParams(
            dimension_semantics=("parallel",),
            vmem_limit_bytes=vmem_limit),
    )(n_chunks, x, lens, wih_p, whh_p, b_p, w1_p, b1_p, w2_p, b2_p)

    return out[:B, :C]


def reference_forward(tokens, lengths, params):
    """Pure-JAX f32 reference mirroring the PyTorch forward pass."""
    emb_table, w_ih, w_hh, b_all, w1, b1, w2, b2 = params
    B, T = tokens.shape
    H = w_hh.shape[0]
    x = emb_table[tokens].astype(jnp.float32)       # (B, T, E)
    h = jnp.zeros((B, H), jnp.float32)
    c = jnp.zeros((B, H), jnp.float32)
    for t in range(T):
        gates = x[:, t, :] @ w_ih + h @ w_hh + b_all
        i = jax.nn.sigmoid(gates[:, 0 * H:1 * H])
        f = jax.nn.sigmoid(gates[:, 1 * H:2 * H])
        g = jnp.tanh(gates[:, 2 * H:3 * H])
        o = jax.nn.sigmoid(gates[:, 3 * H:4 * H])
        c_new = f * c + i * g
        h_new = o * jnp.tanh(c_new)
        mask = (lengths > t)[:, None]
        h = jnp.where(mask, h_new, h)
        c = jnp.where(mask, c_new, c)
    z = h @ w1 + b1
    z = 0.5 * z * (1.0 + lax.erf(z / jnp.sqrt(2.0)))
    return z @ w2 + b2


if __name__ == "__main__":
    # Small, self-consistent shapes
    VOCAB, B, T = 50, 2, 8
    E = 32            # embedding_size (stand-in for embedder hidden_size)
    H = 32            # rnn_size
    L1 = 256          # linear1_out_size
    C = 4             # num_classes

    key = jax.random.PRNGKey(0)
    ks = jax.random.split(key, 10)
    s = 0.1
    emb_table = (jax.random.normal(ks[0], (VOCAB, E)) * s).astype(jnp.float32)
    w_ih = (jax.random.normal(ks[1], (E, 4 * H)) * s).astype(jnp.float32)
    w_hh = (jax.random.normal(ks[2], (H, 4 * H)) * s).astype(jnp.float32)
    b_ih = (jax.random.normal(ks[3], (4 * H,)) * s).astype(jnp.float32)
    b_hh = (jax.random.normal(ks[4], (4 * H,)) * s).astype(jnp.float32)
    b_all = (b_ih + b_hh).reshape(1, 4 * H)
    w1 = (jax.random.normal(ks[5], (H, L1)) * s).astype(jnp.float32)
    b1 = (jax.random.normal(ks[6], (L1,)) * s).astype(jnp.float32).reshape(1, L1)
    w2 = (jax.random.normal(ks[7], (L1, C)) * s).astype(jnp.float32)
    b2 = (jax.random.normal(ks[8], (C,)) * s).astype(jnp.float32).reshape(1, C)
    params = (emb_table, w_ih, w_hh, b_all, w1, b1, w2, b2)

    tokens = jax.random.randint(ks[9], (B, T), 0, VOCAB, dtype=jnp.int32)
    lengths = jnp.array([T, 5], dtype=jnp.int32)    # ragged, like pack_padded_sequence

    logits = lstm_classifier_forward(tokens, lengths, params)
    logits = jax.block_until_ready(logits)

    ref = reference_forward(tokens, lengths, params)
    # bf16 MXU operands + bf16 gx scratch (f32 accumulate) vs f32 reference.
    np.testing.assert_allclose(np.asarray(logits), np.asarray(ref),
                               rtol=2e-2, atol=2e-2)

    print("KERNEL_OK")
</pallas_src>

<mosaic_0001>
module attributes {stable_mosaic.version = 11 : i64} {
  func.func @lstm_classifier_kernel(%arg0: i32, %arg1: memref<1xi32, #tpu.memory_space<smem>>, %arg2: memref<1x64x128xbf16, #tpu.memory_space<vmem>>, %arg3: memref<8x1xi32, #tpu.memory_space<vmem>>, %arg4: memref<128x512xbf16, #tpu.memory_space<vmem>>, %arg5: memref<128x512xbf16, #tpu.memory_space<vmem>>, %arg6: memref<1x512xf32, #tpu.memory_space<vmem>>, %arg7: memref<128x256xbf16, #tpu.memory_space<vmem>>, %arg8: memref<1x256xf32, #tpu.memory_space<vmem>>, %arg9: memref<256x128xbf16, #tpu.memory_space<vmem>>, %arg10: memref<1x128xf32, #tpu.memory_space<vmem>>, %arg11: memref<8x128xf32, #tpu.memory_space<vmem>>, %arg12: memref<64x512xbf16, #tpu.memory_space<vmem>>, %arg13: memref<8x128xf32, #tpu.memory_space<vmem>>, %arg14: memref<8x128xf32, #tpu.memory_space<vmem>>) attributes {dimension_semantics = [#tpu.dimension_semantics<parallel>], iteration_bounds = array<i64: 1>, scalar_prefetch = 1 : i64, scratch_operands = 3 : i64, tpu.core_type = #tpu.core_type<tc>, window_params = [{transform_indices = @transform_0, window_bounds = array<i64: 1, 64, 128>}, {transform_indices = @transform_1, window_bounds = array<i64: 8, 1>}, {pipeline_mode = #tpu.pipeline_mode<synchronous>, transform_indices = @transform_2, window_bounds = array<i64: 128, 512>}, {pipeline_mode = #tpu.pipeline_mode<synchronous>, transform_indices = @transform_3, window_bounds = array<i64: 128, 512>}, {pipeline_mode = #tpu.pipeline_mode<synchronous>, transform_indices = @transform_4, window_bounds = array<i64: 1, 512>}, {pipeline_mode = #tpu.pipeline_mode<synchronous>, transform_indices = @transform_5, window_bounds = array<i64: 128, 256>}, {pipeline_mode = #tpu.pipeline_mode<synchronous>, transform_indices = @transform_6, window_bounds = array<i64: 1, 256>}, {pipeline_mode = #tpu.pipeline_mode<synchronous>, transform_indices = @transform_7, window_bounds = array<i64: 256, 128>}, {pipeline_mode = #tpu.pipeline_mode<synchronous>, transform_indices = @transform_8, window_bounds = array<i64: 1, 128>}, {transform_indices = @transform_9, window_bounds = array<i64: 8, 128>}]} {
    %c0 = arith.constant 0 : index
    %c0_0 = arith.constant 0 : index
    %c0_1 = arith.constant 0 : index
    %0 = vector.load %arg2[%c0, %c0_0, %c0_1] : memref<1x64x128xbf16, #tpu.memory_space<vmem>>, vector<1x64x128xbf16>
    %1 = vector.shape_cast %0 : vector<1x64x128xbf16> to vector<64x128xbf16>
    %c0_2 = arith.constant 0 : index
    %c0_3 = arith.constant 0 : index
    %2 = vector.load %arg4[%c0_2, %c0_3] : memref<128x512xbf16, #tpu.memory_space<vmem>>, vector<128x512xbf16>
    %cst = arith.constant dense<0.000000e+00> : vector<64x512xf32>
    %3 = tpu.matmul %1, %2, %cst {dimension_numbers = #tpu.dot_dimension_numbers<[1], [0], [0], [1], [0, 0, 1, 1], [], []>} : vector<64x128xbf16>, vector<128x512xbf16>, vector<64x512xf32> -> vector<64x512xf32>
    %c0_4 = arith.constant 0 : index
    %c0_5 = arith.constant 0 : index
    %4 = vector.load %arg6[%c0_4, %c0_5] : memref<1x512xf32, #tpu.memory_space<vmem>>, vector<1x512xf32>
    %5 = vector.broadcast %4 : vector<1x512xf32> to vector<64x512xf32>
    %6 = arith.addf %3, %5 : vector<64x512xf32>
    %7 = arith.truncf %6 : vector<64x512xf32> to vector<64x512xbf16>
    %c0_6 = arith.constant 0 : index
    %c0_7 = arith.constant 0 : index
    %8 = vector.load %arg12[%c0_6, %c0_7] : memref<64x512xbf16, #tpu.memory_space<vmem>>, vector<64x512xbf16>
    tpu.vector_store %arg12[%c0_6, %c0_7], %7 {strides = array<i32>} : memref<64x512xbf16, #tpu.memory_space<vmem>>, vector<64x512xbf16>,
    %c0_8 = arith.constant 0 : index
    %c0_9 = arith.constant 0 : index
    %9 = vector.load %arg3[%c0_8, %c0_9] : memref<8x1xi32, #tpu.memory_space<vmem>>, vector<8x1xi32>
    %cst_10 = arith.constant 0.000000e+00 : f32
    %10 = vector.broadcast %cst_10 : f32 to vector<8x128xf32>
    %c0_11 = arith.constant 0 : index
    %c0_12 = arith.constant 0 : index
    %11 = vector.load %arg13[%c0_11, %c0_12] : memref<8x128xf32, #tpu.memory_space<vmem>>, vector<8x128xf32>
    tpu.vector_store %arg13[%c0_11, %c0_12], %10 {strides = array<i32>} : memref<8x128xf32, #tpu.memory_space<vmem>>, vector<8x128xf32>,
    %cst_13 = arith.constant 0.000000e+00 : f32
    %12 = vector.broadcast %cst_13 : f32 to vector<8x128xf32>
    %c0_14 = arith.constant 0 : index
    %c0_15 = arith.constant 0 : index
    %13 = vector.load %arg14[%c0_14, %c0_15] : memref<8x128xf32, #tpu.memory_space<vmem>>, vector<8x128xf32>
    tpu.vector_store %arg14[%c0_14, %c0_15], %12 {strides = array<i32>} : memref<8x128xf32, #tpu.memory_space<vmem>>, vector<8x128xf32>,
    %14 = arith.index_cast %arg0 : i32 to index
    %15 = memref.load %arg1[%14] : memref<1xi32, #tpu.memory_space<smem>>
    %c0_i32 = arith.constant 0 : i32
    %16 = arith.subi %15, %c0_i32 : i32
    %c1_i32 = arith.constant 1 : i32
    %c1_i32_16 = arith.constant 1 : i32
    %17 = arith.subi %c1_i32, %c1_i32_16 : i32
    %18 = arith.addi %16, %17 : i32
    %c1_i32_17 = arith.constant 1 : i32
    %19 = arith.divsi %18, %c1_i32_17 : i32
    %c1_i32_18 = arith.constant 1 : i32
    %c0_i32_19 = arith.constant 0 : i32
    %c0_i32_20 = arith.constant 0 : i32
    %20 = arith.subi %19, %c0_i32_20 : i32
    %21 = arith.addi %c0_i32_20, %20 : i32
    %c1_i32_21 = arith.constant 1 : i32
    scf.for %arg15 = %c0_i32_20 to %21 step %c1_i32_21  : i32 {
      %44 = arith.muli %arg15, %c1_i32_18 : i32
      %45 = arith.addi %c0_i32_19, %44 : i32
      %c0_39 = arith.constant 0 : index
      %c0_40 = arith.constant 0 : index
      %46 = vector.load %arg13[%c0_39, %c0_40] : memref<8x128xf32, #tpu.memory_space<vmem>>, vector<8x128xf32>
      %c0_41 = arith.constant 0 : index
      %c0_42 = arith.constant 0 : index
      %47 = vector.load %arg14[%c0_41, %c0_42] : memref<8x128xf32, #tpu.memory_space<vmem>>, vector<8x128xf32>
      %c8_i32 = arith.constant 8 : i32
      %48 = arith.muli %45, %c8_i32 : i32
      %c0_i32_43 = arith.constant 0 : i32
      %49 = arith.addi %48, %c0_i32_43 : i32
      %c7_i32 = arith.constant 7 : i32
      %50 = arith.minsi %49, %c7_i32 : i32
      %c8_i32_44 = arith.constant 8 : i32
      %51 = arith.muli %50, %c8_i32_44 : i32
      %52 = tpu.assume_multiple %51, 8 : i32
      %53 = arith.index_cast %52 : i32 to index
      %c0_45 = arith.constant 0 : index
      %54 = vector.load %arg12[%53, %c0_45] : memref<64x512xbf16, #tpu.memory_space<vmem>>, vector<8x512xbf16>
      %55 = arith.extf %54 : vector<8x512xbf16> to vector<8x512xf32>
      %56 = arith.truncf %46 : vector<8x128xf32> to vector<8x128xbf16>
      %c0_46 = arith.constant 0 : index
      %c0_47 = arith.constant 0 : index
      %57 = vector.load %arg5[%c0_46, %c0_47] : memref<128x512xbf16, #tpu.memory_space<vmem>>, vector<128x512xbf16>
      %cst_48 = arith.constant dense<0.000000e+00> : vector<8x512xf32>
      %58 = tpu.matmul %56, %57, %cst_48 {dimension_numbers = #tpu.dot_dimension_numbers<[1], [0], [0], [1], [0, 0, 1, 1], [], []>} : vector<8x128xbf16>, vector<128x512xbf16>, vector<8x512xf32> -> vector<8x512xf32>
      %59 = arith.addf %55, %58 : vector<8x512xf32>
      %60 = vector.extract_strided_slice %59 {offsets = [0, 0], sizes = [8, 128], strides = [1, 1]} : vector<8x512xf32> to vector<8x128xf32>
      %61 = arith.negf %60 : vector<8x128xf32>
      %62 = math.exp %61 : vector<8x128xf32>
      %cst_49 = arith.constant 1.000000e+00 : f32
      %63 = vector.broadcast %cst_49 : f32 to vector<8x128xf32>
      %64 = arith.addf %63, %62 : vector<8x128xf32>
      %65 = arith.divf %63, %64 : vector<8x128xf32>
      %66 = vector.extract_strided_slice %59 {offsets = [0, 128], sizes = [8, 128], strides = [1, 1]} : vector<8x512xf32> to vector<8x128xf32>
      %67 = arith.negf %66 : vector<8x128xf32>
      %68 = math.exp %67 : vector<8x128xf32>
      %cst_50 = arith.constant 1.000000e+00 : f32
      %69 = vector.broadcast %cst_50 : f32 to vector<8x128xf32>
      %70 = arith.addf %69, %68 : vector<8x128xf32>
      %71 = arith.divf %69, %70 : vector<8x128xf32>
      %72 = vector.extract_strided_slice %59 {offsets = [0, 256], sizes = [8, 128], strides = [1, 1]} : vector<8x512xf32> to vector<8x128xf32>
      %73 = math.tanh %72 : vector<8x128xf32>
      %74 = vector.extract_strided_slice %59 {offsets = [0, 384], sizes = [8, 128], strides = [1, 1]} : vector<8x512xf32> to vector<8x128xf32>
      %75 = arith.negf %74 : vector<8x128xf32>
      %76 = math.exp %75 : vector<8x128xf32>
      %cst_51 = arith.constant 1.000000e+00 : f32
      %77 = vector.broadcast %cst_51 : f32 to vector<8x128xf32>
      %78 = arith.addf %77, %76 : vector<8x128xf32>
      %79 = arith.divf %77, %78 : vector<8x128xf32>
      %80 = arith.mulf %71, %47 : vector<8x128xf32>
      %81 = arith.mulf %65, %73 : vector<8x128xf32>
      %82 = arith.addf %80, %81 : vector<8x128xf32>
      %83 = math.tanh %82 : vector<8x128xf32>
      %84 = arith.mulf %79, %83 : vector<8x128xf32>
      %85 = vector.broadcast %49 : i32 to vector<8x1xi32>
      %86 = arith.cmpi sgt, %9, %85 : vector<8x1xi32>
      %87 = vector.shape_cast %86 : vector<8x1xi1> to vector<8x1xi1>
      %88 = vector.broadcast %87 : vector<8x1xi1> to vector<8x128xi1>
      %89 = arith.select %88, %84, %46 : vector<8x128xi1>, vector<8x128xf32>
      %90 = vector.shape_cast %86 : vector<8x1xi1> to vector<8x1xi1>
      %91 = vector.broadcast %90 : vector<8x1xi1> to vector<8x128xi1>
      %92 = arith.select %91, %82, %47 : vector<8x128xi1>, vector<8x128xf32>
      %c1_i32_52 = arith.constant 1 : i32
      %93 = arith.addi %48, %c1_i32_52 : i32
      %c7_i32_53 = arith.constant 7 : i32
      %94 = arith.minsi %93, %c7_i32_53 : i32
      %c8_i32_54 = arith.constant 8 : i32
      %95 = arith.muli %94, %c8_i32_54 : i32
      %96 = tpu.assume_multiple %95, 8 : i32
      %97 = arith.index_cast %96 : i32 to index
      %c0_55 = arith.constant 0 : index
      %98 = vector.load %arg12[%97, %c0_55] : memref<64x512xbf16, #tpu.memory_space<vmem>>, vector<8x512xbf16>
      %99 = arith.extf %98 : vector<8x512xbf16> to vector<8x512xf32>
      %100 = arith.truncf %89 : vector<8x128xf32> to vector<8x128xbf16>
      %c0_56 = arith.constant 0 : index
      %c0_57 = arith.constant 0 : index
      %101 = vector.load %arg5[%c0_56, %c0_57] : memref<128x512xbf16, #tpu.memory_space<vmem>>, vector<128x512xbf16>
      %cst_58 = arith.constant dense<0.000000e+00> : vector<8x512xf32>
      %102 = tpu.matmul %100, %101, %cst_58 {dimension_numbers = #tpu.dot_dimension_numbers<[1], [0], [0], [1], [0, 0, 1, 1], [], []>} : vector<8x128xbf16>, vector<128x512xbf16>, vector<8x512xf32> -> vector<8x512xf32>
      %103 = arith.addf %99, %102 : vector<8x512xf32>
      %104 = vector.extract_strided_slice %103 {offsets = [0, 0], sizes = [8, 128], strides = [1, 1]} : vector<8x512xf32> to vector<8x128xf32>
      %105 = arith.negf %104 : vector<8x128xf32>
      %106 = math.exp %105 : vector<8x128xf32>
      %cst_59 = arith.constant 1.000000e+00 : f32
      %107 = vector.broadcast %cst_59 : f32 to vector<8x128xf32>
      %108 = arith.addf %107, %106 : vector<8x128xf32>
      %109 = arith.divf %107, %108 : vector<8x128xf32>
      %110 = vector.extract_strided_slice %103 {offsets = [0, 128], sizes = [8, 128], strides = [1, 1]} : vector<8x512xf32> to vector<8x128xf32>
      %111 = arith.negf %110 : vector<8x128xf32>
      %112 = math.exp %111 : vector<8x128xf32>
      %cst_60 = arith.constant 1.000000e+00 : f32
      %113 = vector.broadcast %cst_60 : f32 to vector<8x128xf32>
      %114 = arith.addf %113, %112 : vector<8x128xf32>
      %115 = arith.divf %113, %114 : vector<8x128xf32>
      %116 = vector.extract_strided_slice %103 {offsets = [0, 256], sizes = [8, 128], strides = [1, 1]} : vector<8x512xf32> to vector<8x128xf32>
      %117 = math.tanh %116 : vector<8x128xf32>
      %118 = vector.extract_strided_slice %103 {offsets = [0, 384], sizes = [8, 128], strides = [1, 1]} : vector<8x512xf32> to vector<8x128xf32>
      %119 = arith.negf %118 : vector<8x128xf32>
      %120 = math.exp %119 : vector<8x128xf32>
      %cst_61 = arith.constant 1.000000e+00 : f32
      %121 = vector.broadcast %cst_61 : f32 to vector<8x128xf32>
      %122 = arith.addf %121, %120 : vector<8x128xf32>
      %123 = arith.divf %121, %122 : vector<8x128xf32>
      %124 = arith.mulf %115, %92 : vector<8x128xf32>
      %125 = arith.mulf %109, %117 : vector<8x128xf32>
      %126 = arith.addf %124, %125 : vector<8x128xf32>
      %127 = math.tanh %126 : vector<8x128xf32>
      %128 = arith.mulf %123, %127 : vector<8x128xf32>
      %129 = vector.broadcast %93 : i32 to vector<8x1xi32>
      %130 = arith.cmpi sgt, %9, %129 : vector<8x1xi32>
      %131 = vector.shape_cast %130 : vector<8x1xi1> to vector<8x1xi1>
      %132 = vector.broadcast %131 : vector<8x1xi1> to vector<8x128xi1>
      %133 = arith.select %132, %128, %89 : vector<8x128xi1>, vector<8x128xf32>
      %134 = vector.shape_cast %130 : vector<8x1xi1> to vector<8x1xi1>
      %135 = vector.broadcast %134 : vector<8x1xi1> to vector<8x128xi1>
      %136 = arith.select %135, %126, %92 : vector<8x128xi1>, vector<8x128xf32>
      %c2_i32 = arith.constant 2 : i32
      %137 = arith.addi %48, %c2_i32 : i32
      %c7_i32_62 = arith.constant 7 : i32
      %138 = arith.minsi %137, %c7_i32_62 : i32
      %c8_i32_63 = arith.constant 8 : i32
      %139 = arith.muli %138, %c8_i32_63 : i32
      %140 = tpu.assume_multiple %139, 8 : i32
      %141 = arith.index_cast %140 : i32 to index
      %c0_64 = arith.constant 0 : index
      %142 = vector.load %arg12[%141, %c0_64] : memref<64x512xbf16, #tpu.memory_space<vmem>>, vector<8x512xbf16>
      %143 = arith.extf %142 : vector<8x512xbf16> to vector<8x512xf32>
      %144 = arith.truncf %133 : vector<8x128xf32> to vector<8x128xbf16>
      %c0_65 = arith.constant 0 : index
      %c0_66 = arith.constant 0 : index
      %145 = vector.load %arg5[%c0_65, %c0_66] : memref<128x512xbf16, #tpu.memory_space<vmem>>, vector<128x512xbf16>
      %cst_67 = arith.constant dense<0.000000e+00> : vector<8x512xf32>
      %146 = tpu.matmul %144, %145, %cst_67 {dimension_numbers = #tpu.dot_dimension_numbers<[1], [0], [0], [1], [0, 0, 1, 1], [], []>} : vector<8x128xbf16>, vector<128x512xbf16>, vector<8x512xf32> -> vector<8x512xf32>
      %147 = arith.addf %143, %146 : vector<8x512xf32>
      %148 = vector.extract_strided_slice %147 {offsets = [0, 0], sizes = [8, 128], strides = [1, 1]} : vector<8x512xf32> to vector<8x128xf32>
      %149 = arith.negf %148 : vector<8x128xf32>
      %150 = math.exp %149 : vector<8x128xf32>
      %cst_68 = arith.constant 1.000000e+00 : f32
      %151 = vector.broadcast %cst_68 : f32 to vector<8x128xf32>
      %152 = arith.addf %151, %150 : vector<8x128xf32>
      %153 = arith.divf %151, %152 : vector<8x128xf32>
      %154 = vector.extract_strided_slice %147 {offsets = [0, 128], sizes = [8, 128], strides = [1, 1]} : vector<8x512xf32> to vector<8x128xf32>
      %155 = arith.negf %154 : vector<8x128xf32>
      %156 = math.exp %155 : vector<8x128xf32>
      %cst_69 = arith.constant 1.000000e+00 : f32
      %157 = vector.broadcast %cst_69 : f32 to vector<8x128xf32>
      %158 = arith.addf %157, %156 : vector<8x128xf32>
      %159 = arith.divf %157, %158 : vector<8x128xf32>
      %160 = vector.extract_strided_slice %147 {offsets = [0, 256], sizes = [8, 128], strides = [1, 1]} : vector<8x512xf32> to vector<8x128xf32>
      %161 = math.tanh %160 : vector<8x128xf32>
      %162 = vector.extract_strided_slice %147 {offsets = [0, 384], sizes = [8, 128], strides = [1, 1]} : vector<8x512xf32> to vector<8x128xf32>
      %163 = arith.negf %162 : vector<8x128xf32>
      %164 = math.exp %163 : vector<8x128xf32>
      %cst_70 = arith.constant 1.000000e+00 : f32
      %165 = vector.broadcast %cst_70 : f32 to vector<8x128xf32>
      %166 = arith.addf %165, %164 : vector<8x128xf32>
      %167 = arith.divf %165, %166 : vector<8x128xf32>
      %168 = arith.mulf %159, %136 : vector<8x128xf32>
      %169 = arith.mulf %153, %161 : vector<8x128xf32>
      %170 = arith.addf %168, %169 : vector<8x128xf32>
      %171 = math.tanh %170 : vector<8x128xf32>
      %172 = arith.mulf %167, %171 : vector<8x128xf32>
      %173 = vector.broadcast %137 : i32 to vector<8x1xi32>
      %174 = arith.cmpi sgt, %9, %173 : vector<8x1xi32>
      %175 = vector.shape_cast %174 : vector<8x1xi1> to vector<8x1xi1>
      %176 = vector.broadcast %175 : vector<8x1xi1> to vector<8x128xi1>
      %177 = arith.select %176, %172, %133 : vector<8x128xi1>, vector<8x128xf32>
      %178 = vector.shape_cast %174 : vector<8x1xi1> to vector<8x1xi1>
      %179 = vector.broadcast %178 : vector<8x1xi1> to vector<8x128xi1>
      %180 = arith.select %179, %170, %136 : vector<8x128xi1>, vector<8x128xf32>
      %c3_i32 = arith.constant 3 : i32
      %181 = arith.addi %48, %c3_i32 : i32
      %c7_i32_71 = arith.constant 7 : i32
      %182 = arith.minsi %181, %c7_i32_71 : i32
      %c8_i32_72 = arith.constant 8 : i32
      %183 = arith.muli %182, %c8_i32_72 : i32
      %184 = tpu.assume_multiple %183, 8 : i32
      %185 = arith.index_cast %184 : i32 to index
      %c0_73 = arith.constant 0 : index
      %186 = vector.load %arg12[%185, %c0_73] : memref<64x512xbf16, #tpu.memory_space<vmem>>, vector<8x512xbf16>
      %187 = arith.extf %186 : vector<8x512xbf16> to vector<8x512xf32>
      %188 = arith.truncf %177 : vector<8x128xf32> to vector<8x128xbf16>
      %c0_74 = arith.constant 0 : index
      %c0_75 = arith.constant 0 : index
      %189 = vector.load %arg5[%c0_74, %c0_75] : memref<128x512xbf16, #tpu.memory_space<vmem>>, vector<128x512xbf16>
      %cst_76 = arith.constant dense<0.000000e+00> : vector<8x512xf32>
      %190 = tpu.matmul %188, %189, %cst_76 {dimension_numbers = #tpu.dot_dimension_numbers<[1], [0], [0], [1], [0, 0, 1, 1], [], []>} : vector<8x128xbf16>, vector<128x512xbf16>, vector<8x512xf32> -> vector<8x512xf32>
      %191 = arith.addf %187, %190 : vector<8x512xf32>
      %192 = vector.extract_strided_slice %191 {offsets = [0, 0], sizes = [8, 128], strides = [1, 1]} : vector<8x512xf32> to vector<8x128xf32>
      %193 = arith.negf %192 : vector<8x128xf32>
      %194 = math.exp %193 : vector<8x128xf32>
      %cst_77 = arith.constant 1.000000e+00 : f32
      %195 = vector.broadcast %cst_77 : f32 to vector<8x128xf32>
      %196 = arith.addf %195, %194 : vector<8x128xf32>
      %197 = arith.divf %195, %196 : vector<8x128xf32>
      %198 = vector.extract_strided_slice %191 {offsets = [0, 128], sizes = [8, 128], strides = [1, 1]} : vector<8x512xf32> to vector<8x128xf32>
      %199 = arith.negf %198 : vector<8x128xf32>
      %200 = math.exp %199 : vector<8x128xf32>
      %cst_78 = arith.constant 1.000000e+00 : f32
      %201 = vector.broadcast %cst_78 : f32 to vector<8x128xf32>
      %202 = arith.addf %201, %200 : vector<8x128xf32>
      %203 = arith.divf %201, %202 : vector<8x128xf32>
      %204 = vector.extract_strided_slice %191 {offsets = [0, 256], sizes = [8, 128], strides = [1, 1]} : vector<8x512xf32> to vector<8x128xf32>
      %205 = math.tanh %204 : vector<8x128xf32>
      %206 = vector.extract_strided_slice %191 {offsets = [0, 384], sizes = [8, 128], strides = [1, 1]} : vector<8x512xf32> to vector<8x128xf32>
      %207 = arith.negf %206 : vector<8x128xf32>
      %208 = math.exp %207 : vector<8x128xf32>
      %cst_79 = arith.constant 1.000000e+00 : f32
      %209 = vector.broadcast %cst_79 : f32 to vector<8x128xf32>
      %210 = arith.addf %209, %208 : vector<8x128xf32>
      %211 = arith.divf %209, %210 : vector<8x128xf32>
      %212 = arith.mulf %203, %180 : vector<8x128xf32>
      %213 = arith.mulf %197, %205 : vector<8x128xf32>
      %214 = arith.addf %212, %213 : vector<8x128xf32>
      %215 = math.tanh %214 : vector<8x128xf32>
      %216 = arith.mulf %211, %215 : vector<8x128xf32>
      %217 = vector.broadcast %181 : i32 to vector<8x1xi32>
      %218 = arith.cmpi sgt, %9, %217 : vector<8x1xi32>
      %219 = vector.shape_cast %218 : vector<8x1xi1> to vector<8x1xi1>
      %220 = vector.broadcast %219 : vector<8x1xi1> to vector<8x128xi1>
      %221 = arith.select %220, %216, %177 : vector<8x128xi1>, vector<8x128xf32>
      %222 = vector.shape_cast %218 : vector<8x1xi1> to vector<8x1xi1>
      %223 = vector.broadcast %222 : vector<8x1xi1> to vector<8x128xi1>
      %224 = arith.select %223, %214, %180 : vector<8x128xi1>, vector<8x128xf32>
      %c4_i32 = arith.constant 4 : i32
      %225 = arith.addi %48, %c4_i32 : i32
      %c7_i32_80 = arith.constant 7 : i32
      %226 = arith.minsi %225, %c7_i32_80 : i32
      %c8_i32_81 = arith.constant 8 : i32
      %227 = arith.muli %226, %c8_i32_81 : i32
      %228 = tpu.assume_multiple %227, 8 : i32
      %229 = arith.index_cast %228 : i32 to index
      %c0_82 = arith.constant 0 : index
      %230 = vector.load %arg12[%229, %c0_82] : memref<64x512xbf16, #tpu.memory_space<vmem>>, vector<8x512xbf16>
      %231 = arith.extf %230 : vector<8x512xbf16> to vector<8x512xf32>
      %232 = arith.truncf %221 : vector<8x128xf32> to vector<8x128xbf16>
      %c0_83 = arith.constant 0 : index
      %c0_84 = arith.constant 0 : index
      %233 = vector.load %arg5[%c0_83, %c0_84] : memref<128x512xbf16, #tpu.memory_space<vmem>>, vector<128x512xbf16>
      %cst_85 = arith.constant dense<0.000000e+00> : vector<8x512xf32>
      %234 = tpu.matmul %232, %233, %cst_85 {dimension_numbers = #tpu.dot_dimension_numbers<[1], [0], [0], [1], [0, 0, 1, 1], [], []>} : vector<8x128xbf16>, vector<128x512xbf16>, vector<8x512xf32> -> vector<8x512xf32>
      %235 = arith.addf %231, %234 : vector<8x512xf32>
      %236 = vector.extract_strided_slice %235 {offsets = [0, 0], sizes = [8, 128], strides = [1, 1]} : vector<8x512xf32> to vector<8x128xf32>
      %237 = arith.negf %236 : vector<8x128xf32>
      %238 = math.exp %237 : vector<8x128xf32>
      %cst_86 = arith.constant 1.000000e+00 : f32
      %239 = vector.broadcast %cst_86 : f32 to vector<8x128xf32>
      %240 = arith.addf %239, %238 : vector<8x128xf32>
      %241 = arith.divf %239, %240 : vector<8x128xf32>
      %242 = vector.extract_strided_slice %235 {offsets = [0, 128], sizes = [8, 128], strides = [1, 1]} : vector<8x512xf32> to vector<8x128xf32>
      %243 = arith.negf %242 : vector<8x128xf32>
      %244 = math.exp %243 : vector<8x128xf32>
      %cst_87 = arith.constant 1.000000e+00 : f32
      %245 = vector.broadcast %cst_87 : f32 to vector<8x128xf32>
      %246 = arith.addf %245, %244 : vector<8x128xf32>
      %247 = arith.divf %245, %246 : vector<8x128xf32>
      %248 = vector.extract_strided_slice %235 {offsets = [0, 256], sizes = [8, 128], strides = [1, 1]} : vector<8x512xf32> to vector<8x128xf32>
      %249 = math.tanh %248 : vector<8x128xf32>
      %250 = vector.extract_strided_slice %235 {offsets = [0, 384], sizes = [8, 128], strides = [1, 1]} : vector<8x512xf32> to vector<8x128xf32>
      %251 = arith.negf %250 : vector<8x128xf32>
      %252 = math.exp %251 : vector<8x128xf32>
      %cst_88 = arith.constant 1.000000e+00 : f32
      %253 = vector.broadcast %cst_88 : f32 to vector<8x128xf32>
      %254 = arith.addf %253, %252 : vector<8x128xf32>
      %255 = arith.divf %253, %254 : vector<8x128xf32>
      %256 = arith.mulf %247, %224 : vector<8x128xf32>
      %257 = arith.mulf %241, %249 : vector<8x128xf32>
      %258 = arith.addf %256, %257 : vector<8x128xf32>
      %259 = math.tanh %258 : vector<8x128xf32>
      %260 = arith.mulf %255, %259 : vector<8x128xf32>
      %261 = vector.broadcast %225 : i32 to vector<8x1xi32>
      %262 = arith.cmpi sgt, %9, %261 : vector<8x1xi32>
      %263 = vector.shape_cast %262 : vector<8x1xi1> to vector<8x1xi1>
      %264 = vector.broadcast %263 : vector<8x1xi1> to vector<8x128xi1>
      %265 = arith.select %264, %260, %221 : vector<8x128xi1>, vector<8x128xf32>
      %266 = vector.shape_cast %262 : vector<8x1xi1> to vector<8x1xi1>
      %267 = vector.broadcast %266 : vector<8x1xi1> to vector<8x128xi1>
      %268 = arith.select %267, %258, %224 : vector<8x128xi1>, vector<8x128xf32>
      %c5_i32 = arith.constant 5 : i32
      %269 = arith.addi %48, %c5_i32 : i32
      %c7_i32_89 = arith.constant 7 : i32
      %270 = arith.minsi %269, %c7_i32_89 : i32
      %c8_i32_90 = arith.constant 8 : i32
      %271 = arith.muli %270, %c8_i32_90 : i32
      %272 = tpu.assume_multiple %271, 8 : i32
      %273 = arith.index_cast %272 : i32 to index
      %c0_91 = arith.constant 0 : index
      %274 = vector.load %arg12[%273, %c0_91] : memref<64x512xbf16, #tpu.memory_space<vmem>>, vector<8x512xbf16>
      %275 = arith.extf %274 : vector<8x512xbf16> to vector<8x512xf32>
      %276 = arith.truncf %265 : vector<8x128xf32> to vector<8x128xbf16>
      %c0_92 = arith.constant 0 : index
      %c0_93 = arith.constant 0 : index
      %277 = vector.load %arg5[%c0_92, %c0_93] : memref<128x512xbf16, #tpu.memory_space<vmem>>, vector<128x512xbf16>
      %cst_94 = arith.constant dense<0.000000e+00> : vector<8x512xf32>
      %278 = tpu.matmul %276, %277, %cst_94 {dimension_numbers = #tpu.dot_dimension_numbers<[1], [0], [0], [1], [0, 0, 1, 1], [], []>} : vector<8x128xbf16>, vector<128x512xbf16>, vector<8x512xf32> -> vector<8x512xf32>
      %279 = arith.addf %275, %278 : vector<8x512xf32>
      %280 = vector.extract_strided_slice %279 {offsets = [0, 0], sizes = [8, 128], strides = [1, 1]} : vector<8x512xf32> to vector<8x128xf32>
      %281 = arith.negf %280 : vector<8x128xf32>
      %282 = math.exp %281 : vector<8x128xf32>
      %cst_95 = arith.constant 1.000000e+00 : f32
      %283 = vector.broadcast %cst_95 : f32 to vector<8x128xf32>
      %284 = arith.addf %283, %282 : vector<8x128xf32>
      %285 = arith.divf %283, %284 : vector<8x128xf32>
      %286 = vector.extract_strided_slice %279 {offsets = [0, 128], sizes = [8, 128], strides = [1, 1]} : vector<8x512xf32> to vector<8x128xf32>
      %287 = arith.negf %286 : vector<8x128xf32>
      %288 = math.exp %287 : vector<8x128xf32>
      %cst_96 = arith.constant 1.000000e+00 : f32
      %289 = vector.broadcast %cst_96 : f32 to vector<8x128xf32>
      %290 = arith.addf %289, %288 : vector<8x128xf32>
      %291 = arith.divf %289, %290 : vector<8x128xf32>
      %292 = vector.extract_strided_slice %279 {offsets = [0, 256], sizes = [8, 128], strides = [1, 1]} : vector<8x512xf32> to vector<8x128xf32>
      %293 = math.tanh %292 : vector<8x128xf32>
      %294 = vector.extract_strided_slice %279 {offsets = [0, 384], sizes = [8, 128], strides = [1, 1]} : vector<8x512xf32> to vector<8x128xf32>
      %295 = arith.negf %294 : vector<8x128xf32>
      %296 = math.exp %295 : vector<8x128xf32>
      %cst_97 = arith.constant 1.000000e+00 : f32
      %297 = vector.broadcast %cst_97 : f32 to vector<8x128xf32>
      %298 = arith.addf %297, %296 : vector<8x128xf32>
      %299 = arith.divf %297, %298 : vector<8x128xf32>
      %300 = arith.mulf %291, %268 : vector<8x128xf32>
      %301 = arith.mulf %285, %293 : vector<8x128xf32>
      %302 = arith.addf %300, %301 : vector<8x128xf32>
      %303 = math.tanh %302 : vector<8x128xf32>
      %304 = arith.mulf %299, %303 : vector<8x128xf32>
      %305 = vector.broadcast %269 : i32 to vector<8x1xi32>
      %306 = arith.cmpi sgt, %9, %305 : vector<8x1xi32>
      %307 = vector.shape_cast %306 : vector<8x1xi1> to vector<8x1xi1>
      %308 = vector.broadcast %307 : vector<8x1xi1> to vector<8x128xi1>
      %309 = arith.select %308, %304, %265 : vector<8x128xi1>, vector<8x128xf32>
      %310 = vector.shape_cast %306 : vector<8x1xi1> to vector<8x1xi1>
      %311 = vector.broadcast %310 : vector<8x1xi1> to vector<8x128xi1>
      %312 = arith.select %311, %302, %268 : vector<8x128xi1>, vector<8x128xf32>
      %c6_i32 = arith.constant 6 : i32
      %313 = arith.addi %48, %c6_i32 : i32
      %c7_i32_98 = arith.constant 7 : i32
      %314 = arith.minsi %313, %c7_i32_98 : i32
      %c8_i32_99 = arith.constant 8 : i32
      %315 = arith.muli %314, %c8_i32_99 : i32
      %316 = tpu.assume_multiple %315, 8 : i32
      %317 = arith.index_cast %316 : i32 to index
      %c0_100 = arith.constant 0 : index
      %318 = vector.load %arg12[%317, %c0_100] : memref<64x512xbf16, #tpu.memory_space<vmem>>, vector<8x512xbf16>
      %319 = arith.extf %318 : vector<8x512xbf16> to vector<8x512xf32>
      %320 = arith.truncf %309 : vector<8x128xf32> to vector<8x128xbf16>
      %c0_101 = arith.constant 0 : index
      %c0_102 = arith.constant 0 : index
      %321 = vector.load %arg5[%c0_101, %c0_102] : memref<128x512xbf16, #tpu.memory_space<vmem>>, vector<128x512xbf16>
      %cst_103 = arith.constant dense<0.000000e+00> : vector<8x512xf32>
      %322 = tpu.matmul %320, %321, %cst_103 {dimension_numbers = #tpu.dot_dimension_numbers<[1], [0], [0], [1], [0, 0, 1, 1], [], []>} : vector<8x128xbf16>, vector<128x512xbf16>, vector<8x512xf32> -> vector<8x512xf32>
      %323 = arith.addf %319, %322 : vector<8x512xf32>
      %324 = vector.extract_strided_slice %323 {offsets = [0, 0], sizes = [8, 128], strides = [1, 1]} : vector<8x512xf32> to vector<8x128xf32>
      %325 = arith.negf %324 : vector<8x128xf32>
      %326 = math.exp %325 : vector<8x128xf32>
      %cst_104 = arith.constant 1.000000e+00 : f32
      %327 = vector.broadcast %cst_104 : f32 to vector<8x128xf32>
      %328 = arith.addf %327, %326 : vector<8x128xf32>
      %329 = arith.divf %327, %328 : vector<8x128xf32>
      %330 = vector.extract_strided_slice %323 {offsets = [0, 128], sizes = [8, 128], strides = [1, 1]} : vector<8x512xf32> to vector<8x128xf32>
      %331 = arith.negf %330 : vector<8x128xf32>
      %332 = math.exp %331 : vector<8x128xf32>
      %cst_105 = arith.constant 1.000000e+00 : f32
      %333 = vector.broadcast %cst_105 : f32 to vector<8x128xf32>
      %334 = arith.addf %333, %332 : vector<8x128xf32>
      %335 = arith.divf %333, %334 : vector<8x128xf32>
      %336 = vector.extract_strided_slice %323 {offsets = [0, 256], sizes = [8, 128], strides = [1, 1]} : vector<8x512xf32> to vector<8x128xf32>
      %337 = math.tanh %336 : vector<8x128xf32>
      %338 = vector.extract_strided_slice %323 {offsets = [0, 384], sizes = [8, 128], strides = [1, 1]} : vector<8x512xf32> to vector<8x128xf32>
      %339 = arith.negf %338 : vector<8x128xf32>
      %340 = math.exp %339 : vector<8x128xf32>
      %cst_106 = arith.constant 1.000000e+00 : f32
      %341 = vector.broadcast %cst_106 : f32 to vector<8x128xf32>
      %342 = arith.addf %341, %340 : vector<8x128xf32>
      %343 = arith.divf %341, %342 : vector<8x128xf32>
      %344 = arith.mulf %335, %312 : vector<8x128xf32>
      %345 = arith.mulf %329, %337 : vector<8x128xf32>
      %346 = arith.addf %344, %345 : vector<8x128xf32>
      %347 = math.tanh %346 : vector<8x128xf32>
      %348 = arith.mulf %343, %347 : vector<8x128xf32>
      %349 = vector.broadcast %313 : i32 to vector<8x1xi32>
      %350 = arith.cmpi sgt, %9, %349 : vector<8x1xi32>
      %351 = vector.shape_cast %350 : vector<8x1xi1> to vector<8x1xi1>
      %352 = vector.broadcast %351 : vector<8x1xi1> to vector<8x128xi1>
      %353 = arith.select %352, %348, %309 : vector<8x128xi1>, vector<8x128xf32>
      %354 = vector.shape_cast %350 : vector<8x1xi1> to vector<8x1xi1>
      %355 = vector.broadcast %354 : vector<8x1xi1> to vector<8x128xi1>
      %356 = arith.select %355, %346, %312 : vector<8x128xi1>, vector<8x128xf32>
      %c7_i32_107 = arith.constant 7 : i32
      %357 = arith.addi %48, %c7_i32_107 : i32
      %c7_i32_108 = arith.constant 7 : i32
      %358 = arith.minsi %357, %c7_i32_108 : i32
      %c8_i32_109 = arith.constant 8 : i32
      %359 = arith.muli %358, %c8_i32_109 : i32
      %360 = tpu.assume_multiple %359, 8 : i32
      %361 = arith.index_cast %360 : i32 to index
      %c0_110 = arith.constant 0 : index
      %362 = vector.load %arg12[%361, %c0_110] : memref<64x512xbf16, #tpu.memory_space<vmem>>, vector<8x512xbf16>
      %363 = arith.extf %362 : vector<8x512xbf16> to vector<8x512xf32>
      %364 = arith.truncf %353 : vector<8x128xf32> to vector<8x128xbf16>
      %c0_111 = arith.constant 0 : index
      %c0_112 = arith.constant 0 : index
      %365 = vector.load %arg5[%c0_111, %c0_112] : memref<128x512xbf16, #tpu.memory_space<vmem>>, vector<128x512xbf16>
      %cst_113 = arith.constant dense<0.000000e+00> : vector<8x512xf32>
      %366 = tpu.matmul %364, %365, %cst_113 {dimension_numbers = #tpu.dot_dimension_numbers<[1], [0], [0], [1], [0, 0, 1, 1], [], []>} : vector<8x128xbf16>, vector<128x512xbf16>, vector<8x512xf32> -> vector<8x512xf32>
      %367 = arith.addf %363, %366 : vector<8x512xf32>
      %368 = vector.extract_strided_slice %367 {offsets = [0, 0], sizes = [8, 128], strides = [1, 1]} : vector<8x512xf32> to vector<8x128xf32>
      %369 = arith.negf %368 : vector<8x128xf32>
      %370 = math.exp %369 : vector<8x128xf32>
      %cst_114 = arith.constant 1.000000e+00 : f32
      %371 = vector.broadcast %cst_114 : f32 to vector<8x128xf32>
      %372 = arith.addf %371, %370 : vector<8x128xf32>
      %373 = arith.divf %371, %372 : vector<8x128xf32>
      %374 = vector.extract_strided_slice %367 {offsets = [0, 128], sizes = [8, 128], strides = [1, 1]} : vector<8x512xf32> to vector<8x128xf32>
      %375 = arith.negf %374 : vector<8x128xf32>
      %376 = math.exp %375 : vector<8x128xf32>
      %cst_115 = arith.constant 1.000000e+00 : f32
      %377 = vector.broadcast %cst_115 : f32 to vector<8x128xf32>
      %378 = arith.addf %377, %376 : vector<8x128xf32>
      %379 = arith.divf %377, %378 : vector<8x128xf32>
      %380 = vector.extract_strided_slice %367 {offsets = [0, 256], sizes = [8, 128], strides = [1, 1]} : vector<8x512xf32> to vector<8x128xf32>
      %381 = math.tanh %380 : vector<8x128xf32>
      %382 = vector.extract_strided_slice %367 {offsets = [0, 384], sizes = [8, 128], strides = [1, 1]} : vector<8x512xf32> to vector<8x128xf32>
      %383 = arith.negf %382 : vector<8x128xf32>
      %384 = math.exp %383 : vector<8x128xf32>
      %cst_116 = arith.constant 1.000000e+00 : f32
      %385 = vector.broadcast %cst_116 : f32 to vector<8x128xf32>
      %386 = arith.addf %385, %384 : vector<8x128xf32>
      %387 = arith.divf %385, %386 : vector<8x128xf32>
      %388 = arith.mulf %379, %356 : vector<8x128xf32>
      %389 = arith.mulf %373, %381 : vector<8x128xf32>
      %390 = arith.addf %388, %389 : vector<8x128xf32>
      %391 = math.tanh %390 : vector<8x128xf32>
      %392 = arith.mulf %387, %391 : vector<8x128xf32>
      %393 = vector.broadcast %357 : i32 to vector<8x1xi32>
      %394 = arith.cmpi sgt, %9, %393 : vector<8x1xi32>
      %395 = vector.shape_cast %394 : vector<8x1xi1> to vector<8x1xi1>
      %396 = vector.broadcast %395 : vector<8x1xi1> to vector<8x128xi1>
      %397 = arith.select %396, %392, %353 : vector<8x128xi1>, vector<8x128xf32>
      %398 = vector.shape_cast %394 : vector<8x1xi1> to vector<8x1xi1>
      %399 = vector.broadcast %398 : vector<8x1xi1> to vector<8x128xi1>
      %400 = arith.select %399, %390, %356 : vector<8x128xi1>, vector<8x128xf32>
      %c0_117 = arith.constant 0 : index
      %c0_118 = arith.constant 0 : index
      %401 = vector.load %arg13[%c0_117, %c0_118] : memref<8x128xf32, #tpu.memory_space<vmem>>, vector<8x128xf32>
      tpu.vector_store %arg13[%c0_117, %c0_118], %397 {strides = array<i32>} : memref<8x128xf32, #tpu.memory_space<vmem>>, vector<8x128xf32>,
      %c0_119 = arith.constant 0 : index
      %c0_120 = arith.constant 0 : index
      %402 = vector.load %arg14[%c0_119, %c0_120] : memref<8x128xf32, #tpu.memory_space<vmem>>, vector<8x128xf32>
      tpu.vector_store %arg14[%c0_119, %c0_120], %400 {strides = array<i32>} : memref<8x128xf32, #tpu.memory_space<vmem>>, vector<8x128xf32>,
    }
    %c0_22 = arith.constant 0 : index
    %c0_23 = arith.constant 0 : index
    %22 = vector.load %arg13[%c0_22, %c0_23] : memref<8x128xf32, #tpu.memory_space<vmem>>, vector<8x128xf32>
    %23 = arith.truncf %22 : vector<8x128xf32> to vector<8x128xbf16>
    %c0_24 = arith.constant 0 : index
    %c0_25 = arith.constant 0 : index
    %24 = vector.load %arg7[%c0_24, %c0_25] : memref<128x256xbf16, #tpu.memory_space<vmem>>, vector<128x256xbf16>
    %cst_26 = arith.constant dense<0.000000e+00> : vector<8x256xf32>
    %25 = tpu.matmul %23, %24, %cst_26 {dimension_numbers = #tpu.dot_dimension_numbers<[1], [0], [0], [1], [0, 0, 1, 1], [], []>} : vector<8x128xbf16>, vector<128x256xbf16>, vector<8x256xf32> -> vector<8x256xf32>
    %c0_27 = arith.constant 0 : index
    %c0_28 = arith.constant 0 : index
    %26 = vector.load %arg8[%c0_27, %c0_28] : memref<1x256xf32, #tpu.memory_space<vmem>>, vector<1x256xf32>
    %27 = vector.broadcast %26 : vector<1x256xf32> to vector<8x256xf32>
    %28 = arith.addf %25, %27 : vector<8x256xf32>
    %cst_29 = arith.constant 5.000000e-01 : f32
    %29 = vector.broadcast %cst_29 : f32 to vector<8x256xf32>
    %30 = arith.mulf %29, %28 : vector<8x256xf32>
    %cst_30 = arith.constant 0.707106769 : f32
    %31 = vector.broadcast %cst_30 : f32 to vector<8x256xf32>
    %32 = arith.mulf %28, %31 : vector<8x256xf32>
    %33 = math.erf %32 : vector<8x256xf32>
    %cst_31 = arith.constant 1.000000e+00 : f32
    %34 = vector.broadcast %cst_31 : f32 to vector<8x256xf32>
    %35 = arith.addf %34, %33 : vector<8x256xf32>
    %36 = arith.mulf %30, %35 : vector<8x256xf32>
    %37 = arith.truncf %36 : vector<8x256xf32> to vector<8x256xbf16>
    %c0_32 = arith.constant 0 : index
    %c0_33 = arith.constant 0 : index
    %38 = vector.load %arg9[%c0_32, %c0_33] : memref<256x128xbf16, #tpu.memory_space<vmem>>, vector<256x128xbf16>
    %cst_34 = arith.constant dense<0.000000e+00> : vector<8x128xf32>
    %39 = tpu.matmul %37, %38, %cst_34 {dimension_numbers = #tpu.dot_dimension_numbers<[1], [0], [0], [1], [0, 0, 1, 1], [], []>} : vector<8x256xbf16>, vector<256x128xbf16>, vector<8x128xf32> -> vector<8x128xf32>
    %c0_35 = arith.constant 0 : index
    %c0_36 = arith.constant 0 : index
    %40 = vector.load %arg10[%c0_35, %c0_36] : memref<1x128xf32, #tpu.memory_space<vmem>>, vector<1x128xf32>
    %41 = vector.broadcast %40 : vector<1x128xf32> to vector<8x128xf32>
    %42 = arith.addf %39, %41 : vector<8x128xf32>
    %c0_37 = arith.constant 0 : index
    %c0_38 = arith.constant 0 : index
    %43 = vector.load %arg11[%c0_37, %c0_38] : memref<8x128xf32, #tpu.memory_space<vmem>>, vector<8x128xf32>
    tpu.vector_store %arg11[%c0_37, %c0_38], %42 {strides = array<i32>} : memref<8x128xf32, #tpu.memory_space<vmem>>, vector<8x128xf32>,
    return
  }
  func.func @transform_0(%arg0: i32, %arg1: memref<1xi32, #tpu.memory_space<smem>>) -> (i32, i32, i32) {
    %c0_i32 = arith.constant 0 : i32
    %c0_i32_0 = arith.constant 0 : i32
    %c0_i32_1 = arith.constant 0 : i32
    return %arg0, %c0_i32, %c0_i32_0 : i32, i32, i32
  }
  func.func @transform_1(%arg0: i32, %arg1: memref<1xi32, #tpu.memory_space<smem>>) -> (i32, i32) {
    %c0_i32 = arith.constant 0 : i32
    %c0_i32_0 = arith.constant 0 : i32
    return %arg0, %c0_i32 : i32, i32
  }
  func.func @transform_2(%arg0: i32, %arg1: memref<1xi32, #tpu.memory_space<smem>>) -> (i32, i32) {
    %c0_i32 = arith.constant 0 : i32
    %c0_i32_0 = arith.constant 0 : i32
    %c0_i32_1 = arith.constant 0 : i32
    return %c0_i32, %c0_i32_0 : i32, i32
  }
  func.func @transform_3(%arg0: i32, %arg1: memref<1xi32, #tpu.memory_space<smem>>) -> (i32, i32) {
    %c0_i32 = arith.constant 0 : i32
    %c0_i32_0 = arith.constant 0 : i32
    %c0_i32_1 = arith.constant 0 : i32
    return %c0_i32, %c0_i32_0 : i32, i32
  }
  func.func @transform_4(%arg0: i32, %arg1: memref<1xi32, #tpu.memory_space<smem>>) -> (i32, i32) {
    %c0_i32 = arith.constant 0 : i32
    %c0_i32_0 = arith.constant 0 : i32
    %c0_i32_1 = arith.constant 0 : i32
    return %c0_i32, %c0_i32_0 : i32, i32
  }
  func.func @transform_5(%arg0: i32, %arg1: memref<1xi32, #tpu.memory_space<smem>>) -> (i32, i32) {
    %c0_i32 = arith.constant 0 : i32
    %c0_i32_0 = arith.constant 0 : i32
    %c0_i32_1 = arith.constant 0 : i32
    return %c0_i32, %c0_i32_0 : i32, i32
  }
  func.func @transform_6(%arg0: i32, %arg1: memref<1xi32, #tpu.memory_space<smem>>) -> (i32, i32) {
    %c0_i32 = arith.constant 0 : i32
    %c0_i32_0 = arith.constant 0 : i32
    %c0_i32_1 = arith.constant 0 : i32
    return %c0_i32, %c0_i32_0 : i32, i32
  }
  func.func @transform_7(%arg0: i32, %arg1: memref<1xi32, #tpu.memory_space<smem>>) -> (i32, i32) {
    %c0_i32 = arith.constant 0 : i32
    %c0_i32_0 = arith.constant 0 : i32
    %c0_i32_1 = arith.constant 0 : i32
    return %c0_i32, %c0_i32_0 : i32, i32
  }
  func.func @transform_8(%arg0: i32, %arg1: memref<1xi32, #tpu.memory_space<smem>>) -> (i32, i32) {
    %c0_i32 = arith.constant 0 : i32
    %c0_i32_0 = arith.constant 0 : i32
    %c0_i32_1 = arith.constant 0 : i32
    return %c0_i32, %c0_i32_0 : i32, i32
  }
  func.func @transform_9(%arg0: i32, %arg1: memref<1xi32, #tpu.memory_space<smem>>) -> (i32, i32) {
    %c0_i32 = arith.constant 0 : i32
    %c0_i32_0 = arith.constant 0 : i32
    return %arg0, %c0_i32 : i32, i32
  }
}

</mosaic_0001>

<bundles_post_ra>
// kernel: tpu_custom_call.1
= control target key start
LH: loop header
LB: loop body
LE: loop exit
PB: predicated region body
PF: predicated region fallthrough
CT: control target
= control target key end

     0   :  { %16 = vsyncpa [#allocation8], 0  ;;  %s3788_s0 = inlined_call_operand.<no memory space> [shape: s32[1], index: 0, kind: input, shape index: {}]   ;;  %s3789_s1 = inlined_call_operand.hbm [shape: bf16[1,64,128], index: 1, kind: input, shape index: {}]   ;;  %s3790_s2 = inlined_call_operand.vmem [shape: s32[8,1], index: 2, kind: input, shape index: {}]   ;;  %s3791_s3 = inlined_call_operand.hbm [shape: bf16[128,512], index: 3, kind: input, shape index: {}]   ;;  %s3792_s4 = inlined_call_operand.hbm [shape: bf16[128,512], index: 4, kind: input, shape index: {}]   ;;  %s3793_s5 = inlined_call_operand.vmem [shape: f32[1,512], index: 5, kind: input, shape index: {}]   ;;  %s3794_s6 = inlined_call_operand.hbm [shape: bf16[128,256], index: 6, kind: input, shape index: {}]   ;;  %s3795_s7 = inlined_call_operand.vmem [shape: f32[1,256], index: 7, kind: input, shape index: {}]   ;;  %s3796_s8 = inlined_call_operand.hbm [shape: bf16[256,128], index: 8, kind: input, shape index: {}]   ;;  %s3797_s9 = inlined_call_operand.vmem [shape: f32[1,128], index: 9, kind: input, shape index: {}]   ;;  %s3798_s10 = inlined_call_operand.hbm [shape: f32[8,128], index: 10, kind: output, shape index: {}]  }
   0x1   :  { %17 = vsyncpa [#allocation11], 0 }
   0x2   :  { %18 = vsyncpa [#allocation14], 0  ;;  %s39_s15 = sshll.u32 %s3791_s3, 4  ;;  %s40_s15 = int_to_ptr.hbm [resolvable:$true] %s39_s15 }
   0x3   :  { %19 = vsyncpa [#allocation9], 0  ;;  %s3150_s16 = smov [#allocation10]   ;;  %s67_s20 = sshll.u32 %s3794_s6, 4  ;;  %s68_s20 = int_to_ptr.hbm [resolvable:$true] %s67_s20 }
   0x4   :  { %s41_s17 = sshll.u32 %s3150_s16, 4  ;;  %s3151_s21 = smov 256   ;;  %s42_s17 = int_to_ptr.vmem [resolvable:$true] %s41_s17 }
   0x5   :  { %s3152_s22 = smov 16   ;;  %s3153_s23 = smov [#allocation13]  }
   0x6   :  { %47 = dma.hbm_to_vmem [thread:$0]  %s40_s15, 4096, %s42_s17, [#allocation11], %s3151_s21, %s3151_s21, %s3152_s22  }
   0x7   :  { %s69_s24 = sshll.u32 %s3153_s23, 4  ;;  %s3154_s25 = smov 128   ;;  %s70_s24 = int_to_ptr.vmem [resolvable:$true] %s69_s24 }
   0x8   :  { %s3155_s26 = smov 8   ;;  %s24_s28 = sshll.u32 %s3789_s1, 4  ;;  %s25_s28 = int_to_ptr.hbm [resolvable:$true] %s24_s28 }
   0x9   :  { %75 = dma.hbm_to_vmem [thread:$0]  %s68_s20, 2048, %s70_s24, [#allocation14], %s3154_s25, %s3154_s25, %s3155_s26  }
   0xa   :  { %s3156_s29 = smov [#allocation7]   ;;  %s52_s12 = sshll.u32 %s3792_s4, 4  ;;  %s53_s12 = int_to_ptr.hbm [resolvable:$true] %s52_s12 }
   0xb   :  { %s26_s30 = sshll.u32 %s3156_s29, 4  ;;  %s3157_s13 = smov 64   ;;  %s27_s30 = int_to_ptr.vmem [resolvable:$true] %s26_s30 }
   0xc   :  { %s3158_s14 = smov 4   ;;  %s3159_s15 = smov [#allocation12]  }
   0xd   :  { %32 = dma.hbm_to_vmem [thread:$0]  %s25_s28, 512, %s27_s30, [#allocation8], %s3157_s13, %s3157_s13, %s3158_s14  }
   0xe   :  { %s54_s16 = sshll.u32 %s3159_s15, 4  ;;  %s82_s19 = sshll.u32 %s3796_s8, 4  ;;  %s55_s16 = int_to_ptr.vmem [resolvable:$true] %s54_s16  ;;  %s83_s19 = int_to_ptr.hbm [resolvable:$true] %s82_s19 }
   0xf   :  { %60 = dma.hbm_to_vmem [thread:$0]  %s53_s12, 4096, %s55_s16, [#allocation11], %s3151_s21, %s3151_s21, %s3152_s22  }
  0x10   :  { %s3160_s1 = smov [#allocation15]  }
  0x11   :  { %s84_s20 = sshll.u32 %s3160_s1, 4  ;;  %s85_s20 = int_to_ptr.vmem [resolvable:$true] %s84_s20 }
  0x12   :  { %90 = dma.hbm_to_vmem [thread:$0]  %s83_s19, 2048, %s85_s20, [#allocation14], %s3157_s13, %s3157_s13, %s3158_s14  }
  0x13   :  { %3138 = dma.done.wait [#allocation8], 512  }
  0x14   :  { %3139 = vsyncadd [#allocation8], 4294966784 }
  0x15   :  { %3140 = dma.done.wait [#allocation11], 8192  }
  0x16   :  { %3141 = vsyncadd [#allocation11], 4294959104 }
  0x17   :  { %3142 = dma.done.wait [#allocation14], 4096  }
  0x18   :  { %3143 = vsyncadd [#allocation14], 4294963200  ;;  %v3161_v0 = vmov 0.0   ;;  %v3237_v1 = vld [vmem:[%s3790_s2] sm:$0xff]  ;;  %v2402_v2 = vld [vmem:[#allocation10 + $0xe0] sm:$0xf] }
  0x19   :  { %496 = vst [vmem:[#allocation3] sm:$0xff] %v3161_v0  ;;  %v2758_v3 = vld [vmem:[#allocation10 + $0xec] sm:$0xf0]  ;;  %v2756_v5 = vld [vmem:[#allocation10 + $0xe4] sm:$0xf]  ;;  %p2416_p0 = scmp.le.s32.totalorder %s3788_s0, 0 }
  0x1a   :  { %497 = vst [vmem:[#allocation4] sm:$0xff] %v3161_v0  ;;  %v2403_v4 = vor.u32 %v2758_v3, %v2402_v2  ;;  %v2404_v6 = vld [vmem:[#allocation10 + $0xf0] sm:$0xf0]  ;;  %v2410_v7 = vld [vmem:[#allocation10 + $0xe8] sm:$0xf]  ;;  %s3285_s22 = smov (!%p2416_p0), 0  }
  0x1b   :  { %v2407_v8 = vor.u32 %v2756_v5, %v2404_v6  ;;  %v2759_v9 = vld [vmem:[#allocation10 + $0xf4] sm:$0xf0]  ;;  %v2757_v10 = vld [vmem:[#allocation10 + $0xec] sm:$0xf]  ;;  %v2412_v11 = vld [vmem:[#allocation10 + $0xf8] sm:$0xf0] }
  0x1c   :  { %347 = vmatpush.bf16.msra.mxu0 %v2403_v4  ;;  %v2411_v12 = vor.u32 %v2759_v9, %v2410_v7  ;;  %v2415_v13 = vor.u32 %v2757_v10, %v2412_v11  ;;  %v2386_v14 = vld [vmem:[#allocation10 + $0xc0] sm:$0xf]  ;;  %v2754_v15 = vld [vmem:[#allocation10 + $0xcc] sm:$0xf0]  ;;  %v2752_v16 = vld [vmem:[#allocation10 + $0xc4] sm:$0xf] }
  0x1d   :  { %376 = vmatpush.bf16.msra.mxu1 %v2407_v8  ;;  %v2387_v17 = vor.u32 %v2754_v15, %v2386_v14  ;;  %v2388_v18 = vld [vmem:[#allocation10 + $0xd0] sm:$0xf0]  ;;  %v2394_v19 = vld [vmem:[#allocation10 + $0xc8] sm:$0xf]  ;;  %v2755_v20 = vld [vmem:[#allocation10 + $0xd4] sm:$0xf0] }
  0x1e   :  { %405 = vmatpush.bf16.msra.mxu2 %v2411_v12  ;;  %434 = vmatpush.bf16.msra.mxu3 %v2415_v13  ;;  %v2391_v21 = vor.u32 %v2752_v16, %v2388_v18  ;;  %v2395_v22 = vor.u32 %v2755_v20, %v2394_v19  ;;  %v2753_v23 = vld [vmem:[#allocation10 + $0xcc] sm:$0xf]  ;;  %v2396_v24 = vld [vmem:[#allocation10 + $0xd8] sm:$0xf0]  ;;  %v2370_v25 = vld [vmem:[#allocation10 + $0xa0] sm:$0xf] }
  0x1f   :  { %v2399_v26 = vor.u32 %v2753_v23, %v2396_v24  ;;  %v2750_v27 = vld [vmem:[#allocation10 + $0xac] sm:$0xf0]  ;;  %v2748_v28 = vld [vmem:[#allocation10 + $0xa4] sm:$0xf]  ;;  %v2372_v29 = vld [vmem:[#allocation10 + $0xb0] sm:$0xf0] }
  0x20   :  { %348 = vmatpush.bf16.msra.mxu0 %v2387_v17  ;;  %v2371_v30 = vor.u32 %v2750_v27, %v2370_v25  ;;  %v2378_v31 = vld [vmem:[#allocation10 + $0xa8] sm:$0xf]  ;;  %v2751_v32 = vld [vmem:[#allocation10 + $0xb4] sm:$0xf0]  ;;  %v2749_v33 = vld [vmem:[#allocation10 + $0xac] sm:$0xf]  ;;  %v2375_v34 = vor.u32 %v2748_v28, %v2372_v29 }
  0x21   :  { %377 = vmatpush.bf16.msra.mxu1 %v2391_v21  ;;  %v2380_v35 = vld [vmem:[#allocation10 + $0xb8] sm:$0xf0]  ;;  %v2354_v36 = vld [vmem:[#allocation10 + $0x80] sm:$0xf]  ;;  %v2746_v37 = vld [vmem:[#allocation10 + $0x8c] sm:$0xf0]  ;;  %v2379_v38 = vor.u32 %v2751_v32, %v2378_v31 }
  0x22   :  { %406 = vmatpush.bf16.msra.mxu2 %v2395_v22  ;;  %435 = vmatpush.bf16.msra.mxu3 %v2399_v26  ;;  %v2383_v39 = vor.u32 %v2749_v33, %v2380_v35  ;;  %v2744_v40 = vld [vmem:[#allocation10 + $0x84] sm:$0xf]  ;;  %v2356_v41 = vld [vmem:[#allocation10 + $0x90] sm:$0xf0]  ;;  %v2362_v42 = vld [vmem:[#allocation10 + $0x88] sm:$0xf]  ;;  %v2355_v46 = vor.u32 %v2746_v37, %v2354_v36 }
  0x23   :  { %v2747_v43 = vld [vmem:[#allocation10 + $0x94] sm:$0xf0]  ;;  %v2745_v44 = vld [vmem:[#allocation10 + $0x8c] sm:$0xf]  ;;  %v2364_v45 = vld [vmem:[#allocation10 + $0x98] sm:$0xf0]  ;;  %v2359_v47 = vor.u32 %v2744_v40, %v2356_v41 }
  0x24   :  { %349 = vmatpush.bf16.msra.mxu0 %v2371_v30  ;;  %v2338_v48 = vld [vmem:[#allocation10 + $0x60] sm:$0xf]  ;;  %v2742_v49 = vld [vmem:[#allocation10 + $0x6c] sm:$0xf0]  ;;  %v2363_v50 = vor.u32 %v2747_v43, %v2362_v42  ;;  %v2367_v51 = vor.u32 %v2745_v44, %v2364_v45  ;;  %v2740_v52 = vld [vmem:[#allocation10 + $0x64] sm:$0xf] }
  0x25   :  { %378 = vmatpush.bf16.msra.mxu1 %v2375_v34  ;;  %v2340_v53 = vld [vmem:[#allocation10 + $0x70] sm:$0xf0]  ;;  %v2346_v54 = vld [vmem:[#allocation10 + $0x68] sm:$0xf]  ;;  %v2743_v55 = vld [vmem:[#allocation10 + $0x74] sm:$0xf0]  ;;  %v2339_v58 = vor.u32 %v2742_v49, %v2338_v48 }
  0x26   :  { %407 = vmatpush.bf16.msra.mxu2 %v2379_v38  ;;  %436 = vmatpush.bf16.msra.mxu3 %v2383_v39  ;;  %v2741_v56 = vld [vmem:[#allocation10 + $0x6c] sm:$0xf]  ;;  %v2348_v57 = vld [vmem:[#allocation10 + $0x78] sm:$0xf0]  ;;  %v2343_v59 = vor.u32 %v2740_v52, %v2340_v53  ;;  %v2322_v60 = vld [vmem:[#allocation10 + $0x40] sm:$0xf]  ;;  %v2347_v62 = vor.u32 %v2743_v55, %v2346_v54 }
  0x27   :  { %v2738_v61 = vld [vmem:[#allocation10 + $0x4c] sm:$0xf0]  ;;  %v2351_v63 = vor.u32 %v2741_v56, %v2348_v57  ;;  %v2736_v0 = vld [vmem:[#allocation10 + $0x44] sm:$0xf]  ;;  %v2324_v2 = vld [vmem:[#allocation10 + $0x50] sm:$0xf0] }
  0x28   :  { %350 = vmatpush.bf16.msra.mxu0 %v2355_v46  ;;  %v2330_v3 = vld [vmem:[#allocation10 + $0x48] sm:$0xf]  ;;  %v2739_v4 = vld [vmem:[#allocation10 + $0x54] sm:$0xf0]  ;;  %v2737_v5 = vld [vmem:[#allocation10 + $0x4c] sm:$0xf]  ;;  %v2323_v7 = vor.u32 %v2738_v61, %v2322_v60  ;;  %v2327_v8 = vor.u32 %v2736_v0, %v2324_v2 }
  0x29   :  { %379 = vmatpush.bf16.msra.mxu1 %v2359_v47  ;;  %v2332_v6 = vld [vmem:[#allocation10 + $0x58] sm:$0xf0]  ;;  %v2306_v9 = vld [vmem:[#allocation10 + $0x20] sm:$0xf]  ;;  %v2734_v10 = vld [vmem:[#allocation10 + $0x2c] sm:$0xf0]  ;;  %v2331_v11 = vor.u32 %v2739_v4, %v2330_v3 }
  0x2a   :  { %408 = vmatpush.bf16.msra.mxu2 %v2363_v50  ;;  %437 = vmatpush.bf16.msra.mxu3 %v2367_v51  ;;  %v2335_v12 = vor.u32 %v2737_v5, %v2332_v6  ;;  %v2732_v13 = vld [vmem:[#allocation10 + $0x24] sm:$0xf]  ;;  %v2308_v14 = vld [vmem:[#allocation10 + $0x30] sm:$0xf0]  ;;  %v2314_v15 = vld [vmem:[#allocation10 + $0x28] sm:$0xf]  ;;  %v2307_v19 = vor.u32 %v2734_v10, %v2306_v9 }
  0x2b   :  { %v2735_v16 = vld [vmem:[#allocation10 + $0x34] sm:$0xf0]  ;;  %v2733_v17 = vld [vmem:[#allocation10 + $0x2c] sm:$0xf]  ;;  %v2316_v18 = vld [vmem:[#allocation10 + $0x38] sm:$0xf0]  ;;  %v2311_v20 = vor.u32 %v2732_v13, %v2308_v14 }
  0x2c   :  { %351 = vmatpush.bf16.msra.mxu0 %v2339_v58  ;;  %v2290_v21 = vld [vmem:[#allocation10] sm:$0xf]  ;;  %v2730_v22 = vld [vmem:[#allocation10 + $0xc] sm:$0xf0]  ;;  %v2315_v23 = vor.u32 %v2735_v16, %v2314_v15  ;;  %v2319_v24 = vor.u32 %v2733_v17, %v2316_v18  ;;  %v2728_v25 = vld [vmem:[#allocation10 + $0x4] sm:$0xf] }
  0x2d   :  { %380 = vmatpush.bf16.msra.mxu1 %v2343_v59  ;;  %v2292_v26 = vld [vmem:[#allocation10 + $0x10] sm:$0xf0]  ;;  %v2298_v27 = vld [vmem:[#allocation10 + $0x8] sm:$0xf]  ;;  %v2731_v28 = vld [vmem:[#allocation10 + $0x14] sm:$0xf0]  ;;  %v2291_v31 = vor.u32 %v2730_v22, %v2290_v21 }
  0x2e   :  { %409 = vmatpush.bf16.msra.mxu2 %v2347_v62  ;;  %438 = vmatpush.bf16.msra.mxu3 %v2351_v63  ;;  %v2729_v29 = vld [vmem:[#allocation10 + $0xc] sm:$0xf]  ;;  %v2300_v30 = vld [vmem:[#allocation10 + $0x18] sm:$0xf0]  ;;  %v2295_v32 = vor.u32 %v2728_v25, %v2292_v26  ;;  %v2299_v33 = vor.u32 %v2731_v28, %v2298_v27  ;;  %v2724_v35 = vld [vmem:[#allocation7] sm:$0xff] }
  0x2f   :  { %v2303_v34 = vor.u32 %v2729_v29, %v2300_v30  ;;  %v2725_v36 = vld [vmem:[#allocation7 + $0x8] sm:$0xff]  ;;  %v2726_v37 = vld [vmem:[#allocation7 + $0x10] sm:$0xff]  ;;  %v2727_v38 = vld [vmem:[#allocation7 + $0x18] sm:$0xff] }
  0x30   :  { %352 = vmatpush.bf16.msra.mxu0 %v2323_v7  ;;  %v153_v39 = vld [vmem:[%s3793_s5] sm:$0xf] }
  0x31   :  { %381 = vmatpush.bf16.msra.mxu1 %v2327_v8  ;;  %v3242_v40 = vperm.slane %v153_v39, 0  ;;  %v3244_v41 = vperm.slane %v153_v39, 1  ;;  %v3248_v47 = vperm.slane %v153_v39, 2  ;;  %v3250_v48 = vperm.slane %v153_v39, 3 }
  0x32   :  { %410 = vmatpush.bf16.msra.mxu2 %v2331_v11  ;;  %439 = vmatpush.bf16.msra.mxu3 %v2335_v12 }
  0x34   :  { %353 = vmatpush.bf16.msra.mxu0 %v2307_v19 }
  0x35   :  { %382 = vmatpush.bf16.msra.mxu1 %v2311_v20 }
  0x36   :  { %411 = vmatpush.bf16.msra.mxu2 %v2315_v23  ;;  %440 = vmatpush.bf16.msra.mxu3 %v2319_v24 }
  0x38   :  { %354 = vmatpush.bf16.msra.mxu0 %v2291_v31 }
  0x39   :  { %383 = vmatpush.bf16.msra.mxu1 %v2295_v32 }
  0x3a   :  { %412 = vmatpush.bf16.msra.mxu2 %v2299_v33  ;;  %441 = vmatpush.bf16.msra.mxu3 %v2303_v34 }
  0x3b   :  { %355 = vmatmul.bf16.vlgmr.msra.gmra.mxu0 %v2724_v35 }
  0x3c   :  { %384 = vmatmul.bf16.vlgmr.msra.gmra.mxu1 %v2724_v35 }
  0x3d   :  { %413 = vmatmul.bf16.vlgmr.msra.gmra.mxu2 %v2724_v35  ;;  %442 = vmatmul.bf16.vlgmr.msra.gmra.mxu3 %v2724_v35 }
  0x4b   :  { %360 = vmatmul.bf16.gmra.mxu0 %v2725_v36 }
  0x4c   :  { %389 = vmatmul.bf16.gmra.mxu1 %v2725_v36 }
  0x4d   :  { %418 = vmatmul.bf16.gmra.mxu2 %v2725_v36  ;;  %447 = vmatmul.bf16.gmra.mxu3 %v2725_v36 }
  0x5b   :  { %365 = vmatmul.bf16.gmra.mxu0 %v2726_v37 }
  0x5c   :  { %394 = vmatmul.bf16.gmra.mxu1 %v2726_v37 }
  0x5d   :  { %423 = vmatmul.bf16.gmra.mxu2 %v2726_v37  ;;  %452 = vmatmul.bf16.gmra.mxu3 %v2726_v37 }
  0x6b   :  { %370 = vmatmul.bf16.gmra.mxu0 %v2727_v38 }
  0x6c   :  { %399 = vmatmul.bf16.gmra.mxu1 %v2727_v38 }
  0x6d   :  { %428 = vmatmul.bf16.gmra.mxu2 %v2727_v38  ;;  %457 = vmatmul.bf16.gmra.mxu3 %v2727_v38 }
  0xb8   :  { %v356_v42 = vpop.f32.mrf.mxu0 }
  0xb9   :  { %v357_v43 = vadd.f32 %v356_v42, %v3242_v40  ;;  %v385_v44 = vpop.f32.mrf.mxu1 }
  0xba   :  { %v386_v45 = vadd.f32 %v385_v44, %v3244_v41 }
  0xbc   :  { %v463_v46 = vpack.c.bf16 %v386_v45, %v357_v43 }
  0xbe   :  { %479 = vst [vmem:[#allocation2] sm:$0xff] %v463_v46 }
  0xc0   :  { %v414_v49 = vpop.f32.mrf.mxu2  ;;  %v443_v50 = vpop.f32.mrf.mxu3 }
  0xc1   :  { %v415_v51 = vadd.f32 %v414_v49, %v3248_v47  ;;  %v444_v52 = vadd.f32 %v443_v50, %v3250_v48  ;;  %v358_v53 = vpop.f32.mrf.mxu0  ;;  %v387_v54 = vpop.f32.mrf.mxu1 }
  0xc2   :  { %v359_v55 = vadd.f32 %v358_v53, %v3242_v40  ;;  %v388_v56 = vadd.f32 %v387_v54, %v3244_v41 }
  0xc3   :  { %v464_v57 = vpack.c.bf16 %v444_v52, %v415_v51 }
  0xc4   :  { %v465_v58 = vpack.c.bf16 %v388_v56, %v359_v55 }
  0xc5   :  { %480 = vst [vmem:[#allocation2 + $0x8] sm:$0xff] %v464_v57 }
  0xc6   :  { %481 = vst [vmem:[#allocation2 + $0x10] sm:$0xff] %v465_v58 }
  0xc8   :  { %v416_v59 = vpop.f32.mrf.mxu2  ;;  %v445_v60 = vpop.f32.mrf.mxu3 }
  0xc9   :  { %v417_v61 = vadd.f32 %v416_v59, %v3248_v47  ;;  %v446_v62 = vadd.f32 %v445_v60, %v3250_v48  ;;  %v361_v63 = vpop.f32.mrf.mxu0  ;;  %v390_v0 = vpop.f32.mrf.mxu1 }
  0xca   :  { %v362_v2 = vadd.f32 %v361_v63, %v3242_v40  ;;  %v391_v3 = vadd.f32 %v390_v0, %v3244_v41 }
  0xcb   :  { %v466_v4 = vpack.c.bf16 %v446_v62, %v417_v61 }
  0xcc   :  { %v467_v5 = vpack.c.bf16 %v391_v3, %v362_v2 }
  0xcd   :  { %482 = vst [vmem:[#allocation2 + $0x18] sm:$0xff] %v466_v4 }
  0xce   :  { %483 = vst [vmem:[#allocation2 + $0x20] sm:$0xff] %v467_v5 }
  0xd0   :  { %v419_v6 = vpop.f32.mrf.mxu2  ;;  %v448_v7 = vpop.f32.mrf.mxu3 }
  0xd1   :  { %v420_v8 = vadd.f32 %v419_v6, %v3248_v47  ;;  %v449_v9 = vadd.f32 %v448_v7, %v3250_v48  ;;  %v363_v10 = vpop.f32.mrf.mxu0  ;;  %v392_v11 = vpop.f32.mrf.mxu1 }
  0xd2   :  { %v364_v12 = vadd.f32 %v363_v10, %v3242_v40  ;;  %v393_v13 = vadd.f32 %v392_v11, %v3244_v41 }
  0xd3   :  { %v468_v14 = vpack.c.bf16 %v449_v9, %v420_v8 }
  0xd4   :  { %v469_v15 = vpack.c.bf16 %v393_v13, %v364_v12 }
  0xd5   :  { %484 = vst [vmem:[#allocation2 + $0x28] sm:$0xff] %v468_v14 }
  0xd6   :  { %485 = vst [vmem:[#allocation2 + $0x30] sm:$0xff] %v469_v15 }
  0xd8   :  { %v421_v16 = vpop.f32.mrf.mxu2  ;;  %v450_v17 = vpop.f32.mrf.mxu3 }
  0xd9   :  { %v422_v18 = vadd.f32 %v421_v16, %v3248_v47  ;;  %v451_v19 = vadd.f32 %v450_v17, %v3250_v48  ;;  %v366_v20 = vpop.f32.mrf.mxu0  ;;  %v395_v21 = vpop.f32.mrf.mxu1 }
  0xda   :  { %v367_v22 = vadd.f32 %v366_v20, %v3242_v40  ;;  %v396_v23 = vadd.f32 %v395_v21, %v3244_v41 }
  0xdb   :  { %v470_v24 = vpack.c.bf16 %v451_v19, %v422_v18 }
  0xdc   :  { %v471_v25 = vpack.c.bf16 %v396_v23, %v367_v22 }
  0xdd   :  { %486 = vst [vmem:[#allocation2 + $0x38] sm:$0xff] %v470_v24 }
  0xde   :  { %487 = vst [vmem:[#allocation2 + $0x40] sm:$0xff] %v471_v25 }
  0xe0   :  { %v424_v26 = vpop.f32.mrf.mxu2  ;;  %v453_v27 = vpop.f32.mrf.mxu3 }
  0xe1   :  { %v425_v28 = vadd.f32 %v424_v26, %v3248_v47  ;;  %v454_v29 = vadd.f32 %v453_v27, %v3250_v48  ;;  %v368_v30 = vpop.f32.mrf.mxu0  ;;  %v397_v31 = vpop.f32.mrf.mxu1 }
  0xe2   :  { %v369_v32 = vadd.f32 %v368_v30, %v3242_v40  ;;  %v398_v33 = vadd.f32 %v397_v31, %v3244_v41 }
  0xe3   :  { %v472_v34 = vpack.c.bf16 %v454_v29, %v425_v28 }
  0xe4   :  { %v473_v35 = vpack.c.bf16 %v398_v33, %v369_v32 }
  0xe5   :  { %488 = vst [vmem:[#allocation2 + $0x48] sm:$0xff] %v472_v34 }
  0xe6   :  { %489 = vst [vmem:[#allocation2 + $0x50] sm:$0xff] %v473_v35 }
  0xe8   :  { %v426_v36 = vpop.f32.mrf.mxu2  ;;  %v455_v37 = vpop.f32.mrf.mxu3 }
  0xe9   :  { %v427_v38 = vadd.f32 %v426_v36, %v3248_v47  ;;  %v456_v39 = vadd.f32 %v455_v37, %v3250_v48  ;;  %v371_v42 = vpop.f32.mrf.mxu0  ;;  %v400_v43 = vpop.f32.mrf.mxu1 }
  0xea   :  { %v372_v44 = vadd.f32 %v371_v42, %v3242_v40  ;;  %v401_v45 = vadd.f32 %v400_v43, %v3244_v41 }
  0xeb   :  { %v474_v46 = vpack.c.bf16 %v456_v39, %v427_v38 }
  0xec   :  { %v475_v49 = vpack.c.bf16 %v401_v45, %v372_v44 }
  0xed   :  { %490 = vst [vmem:[#allocation2 + $0x58] sm:$0xff] %v474_v46 }
  0xee   :  { %491 = vst [vmem:[#allocation2 + $0x60] sm:$0xff] %v475_v49 }
  0xf0   :  { %v429_v50 = vpop.f32.mrf.mxu2  ;;  %v458_v51 = vpop.f32.mrf.mxu3 }
  0xf1   :  { %v430_v52 = vadd.f32 %v429_v50, %v3248_v47  ;;  %v459_v53 = vadd.f32 %v458_v51, %v3250_v48  ;;  %v373_v54 = vpop.f32.mrf.mxu0  ;;  %v402_v55 = vpop.f32.mrf.mxu1 }
  0xf2   :  { %v374_v56 = vadd.f32 %v373_v54, %v3242_v40  ;;  %v403_v57 = vadd.f32 %v402_v55, %v3244_v41 }
  0xf3   :  { %v476_v58 = vpack.c.bf16 %v459_v53, %v430_v52 }
  0xf4   :  { %v477_v59 = vpack.c.bf16 %v403_v57, %v374_v56 }
  0xf5   :  { %492 = vst [vmem:[#allocation2 + $0x68] sm:$0xff] %v476_v58 }
  0xf6   :  { %493 = vst [vmem:[#allocation2 + $0x70] sm:$0xff] %v477_v59 }
  0xf8   :  { %v431_v60 = vpop.f32.mrf.mxu2  ;;  %v460_v61 = vpop.f32.mrf.mxu3 }
  0xf9   :  { %v432_v62 = vadd.f32 %v431_v60, %v3248_v47  ;;  %v461_v63 = vadd.f32 %v460_v61, %v3250_v48  ;;  %2269 = sbr.rel (%p2416_p0) target bundleno = 1671 (0x687), region = 85 }
  0xfb   :  { %v478_v0 = vpack.c.bf16 %v461_v63, %v432_v62 }
  0xfd   :  { %494 = vst [vmem:[#allocation2 + $0x78] sm:$0xff] %v478_v0 }
  0xfe LB: > { %v2535_v40 = vld [vmem:[#allocation12 + $0xe0] sm:$0xf]  ;;  %v2791_v41 = vld [vmem:[#allocation12 + $0xec] sm:$0xf0]  ;;  %v2789_v2 = vld [vmem:[#allocation12 + $0xe4] sm:$0xf]  ;;  %s3148_s22 = sphi %s3285_s22, %s502_s22  }
  0xff   : > { %v3290_v47 = vor.u32 %v2791_v41, %v2535_v40  ;;  %v2537_v48 = vld [vmem:[#allocation12 + $0xf0] sm:$0xf0]  ;;  %v2790_v3 = vld [vmem:[#allocation12 + $0xec] sm:$0xf]  ;;  %v2545_v4 = vld [vmem:[#allocation12 + $0xf8] sm:$0xf0] }
 0x100   : > { %v3292_v5 = vor.u32 %v2789_v2, %v2537_v48  ;;  %v3294_v6 = vor.u32 %v2790_v3, %v2545_v4  ;;  %v2519_v7 = vld [vmem:[#allocation12 + $0xc0] sm:$0xf]  ;;  %v2787_v8 = vld [vmem:[#allocation12 + $0xcc] sm:$0xf0]  ;;  %v2785_v9 = vld [vmem:[#allocation12 + $0xc4] sm:$0xf] }
 0x101   : > { %715 = vmatpush.bf16.msra.mxu0 %v3290_v47  ;;  %v3297_v10 = vor.u32 %v2787_v8, %v2519_v7  ;;  %v2521_v11 = vld [vmem:[#allocation12 + $0xd0] sm:$0xf0]  ;;  %v2786_v12 = vld [vmem:[#allocation12 + $0xcc] sm:$0xf]  ;;  %v2529_v13 = vld [vmem:[#allocation12 + $0xd8] sm:$0xf0] }
 0x102   : > { %728 = vmatpush.bf16.msra.mxu1 %v3292_v5  ;;  %754 = vmatpush.bf16.msra.mxu3 %v3294_v6  ;;  %v3301_v14 = vor.u32 %v2785_v9, %v2521_v11  ;;  %v3303_v15 = vor.u32 %v2786_v12, %v2529_v13  ;;  %v2543_v16 = vld [vmem:[#allocation12 + $0xe8] sm:$0xf]  ;;  %v2792_v17 = vld [vmem:[#allocation12 + $0xf4] sm:$0xf0]  ;;  %v2503_v18 = vld [vmem:[#allocation12 + $0xa0] sm:$0xf] }
 0x103   : > { %v3305_v19 = vor.u32 %v2792_v17, %v2543_v16  ;;  %v2783_v20 = vld [vmem:[#allocation12 + $0xac] sm:$0xf0]  ;;  %v2781_v21 = vld [vmem:[#allocation12 + $0xa4] sm:$0xf]  ;;  %v2505_v22 = vld [vmem:[#allocation12 + $0xb0] sm:$0xf0] }
 0x104   : > { %v2782_v23 = vld [vmem:[#allocation12 + $0xac] sm:$0xf]  ;;  %v2513_v24 = vld [vmem:[#allocation12 + $0xb8] sm:$0xf0]  ;;  %v2527_v25 = vld [vmem:[#allocation12 + $0xc8] sm:$0xf]  ;;  %v3309_v26 = vor.u32 %v2783_v20, %v2503_v18  ;;  %v3313_v30 = vor.u32 %v2781_v21, %v2505_v22 }
 0x105   : > { %716 = vmatpush.bf16.msra.mxu0 %v3297_v10  ;;  %741 = vmatpush.bf16.msra.mxu2 %v3305_v19  ;;  %v2788_v27 = vld [vmem:[#allocation12 + $0xd4] sm:$0xf0]  ;;  %v2487_v28 = vld [vmem:[#allocation12 + $0x80] sm:$0xf]  ;;  %v2779_v29 = vld [vmem:[#allocation12 + $0x8c] sm:$0xf0]  ;;  %v3315_v31 = vor.u32 %v2782_v23, %v2513_v24 }
 0x106   : > { %729 = vmatpush.bf16.msra.mxu1 %v3301_v14  ;;  %755 = vmatpush.bf16.msra.mxu3 %v3303_v15  ;;  %v3317_v32 = vor.u32 %v2788_v27, %v2527_v25  ;;  %v2777_v33 = vld [vmem:[#allocation12 + $0x84] sm:$0xf]  ;;  %v2489_v34 = vld [vmem:[#allocation12 + $0x90] sm:$0xf0]  ;;  %v2778_v35 = vld [vmem:[#allocation12 + $0x8c] sm:$0xf]  ;;  %v3321_v39 = vor.u32 %v2779_v29, %v2487_v28 }
 0x107   : > { %v2497_v36 = vld [vmem:[#allocation12 + $0x98] sm:$0xf0]  ;;  %v2511_v37 = vld [vmem:[#allocation12 + $0xa8] sm:$0xf]  ;;  %v2784_v38 = vld [vmem:[#allocation12 + $0xb4] sm:$0xf0]  ;;  %v3327_v45 = vor.u32 %v2777_v33, %v2489_v34 }
 0x108   : > { %v3323_v42 = vor.u32 %v2784_v38, %v2511_v37  ;;  %v2471_v43 = vld [vmem:[#allocation12 + $0x60] sm:$0xf]  ;;  %v2775_v44 = vld [vmem:[#allocation12 + $0x6c] sm:$0xf0]  ;;  %v3329_v46 = vor.u32 %v2778_v35, %v2497_v36  ;;  %v2773_v49 = vld [vmem:[#allocation12 + $0x64] sm:$0xf] }
 0x109   : > { %717 = vmatpush.bf16.msra.mxu0 %v3309_v26  ;;  %742 = vmatpush.bf16.msra.mxu2 %v3317_v32  ;;  %v2495_v50 = vld [vmem:[#allocation12 + $0x88] sm:$0xf]  ;;  %v2780_v51 = vld [vmem:[#allocation12 + $0x94] sm:$0xf0]  ;;  %v2473_v52 = vld [vmem:[#allocation12 + $0x70] sm:$0xf0]  ;;  %v3333_v55 = vor.u32 %v2775_v44, %v2471_v43 }
 0x10a   : > { %730 = vmatpush.bf16.msra.mxu1 %v3313_v30  ;;  %756 = vmatpush.bf16.msra.mxu3 %v3315_v31  ;;  %v2774_v53 = vld [vmem:[#allocation12 + $0x6c] sm:$0xf]  ;;  %v2481_v54 = vld [vmem:[#allocation12 + $0x78] sm:$0xf0]  ;;  %v3335_v56 = vor.u32 %v2780_v51, %v2495_v50  ;;  %v2455_v57 = vld [vmem:[#allocation12 + $0x40] sm:$0xf]  ;;  %v3339_v59 = vor.u32 %v2773_v49, %v2473_v52 }
 0x10b   : > { %v2771_v58 = vld [vmem:[#allocation12 + $0x4c] sm:$0xf0]  ;;  %v3341_v60 = vor.u32 %v2774_v53, %v2481_v54  ;;  %v2769_v61 = vld [vmem:[#allocation12 + $0x44] sm:$0xf]  ;;  %v2479_v62 = vld [vmem:[#allocation12 + $0x68] sm:$0xf] }
 0x10c   : > { %v2776_v63 = vld [vmem:[#allocation12 + $0x74] sm:$0xf0]  ;;  %v2457_v0 = vld [vmem:[#allocation12 + $0x50] sm:$0xf0]  ;;  %v2770_v40 = vld [vmem:[#allocation12 + $0x4c] sm:$0xf]  ;;  %v3345_v48 = vor.u32 %v2771_v58, %v2455_v57 }
 0x10d   : > { %718 = vmatpush.bf16.msra.mxu0 %v3321_v39  ;;  %743 = vmatpush.bf16.msra.mxu2 %v3323_v42  ;;  %v2465_v41 = vld [vmem:[#allocation12 + $0x58] sm:$0xf0]  ;;  %v2439_v2 = vld [vmem:[#allocation12 + $0x20] sm:$0xf]  ;;  %v3347_v3 = vor.u32 %v2776_v63, %v2479_v62  ;;  %v2767_v4 = vld [vmem:[#allocation12 + $0x2c] sm:$0xf0]  ;;  %v3351_v9 = vor.u32 %v2769_v61, %v2457_v0 }
 0x10e   : > { %731 = vmatpush.bf16.msra.mxu1 %v3327_v45  ;;  %757 = vmatpush.bf16.msra.mxu3 %v3329_v46  ;;  %v2765_v7 = vld [vmem:[#allocation12 + $0x24] sm:$0xf]  ;;  %v2441_v8 = vld [vmem:[#allocation12 + $0x30] sm:$0xf0]  ;;  %v3353_v11 = vor.u32 %v2770_v40, %v2465_v41  ;;  %v2463_v12 = vld [vmem:[#allocation12 + $0x48] sm:$0xf]  ;;  %v3367_v21 = vor.u32 %v2767_v4, %v2439_v2 }
 0x10f   : > { %v2772_v13 = vld [vmem:[#allocation12 + $0x54] sm:$0xf0]  ;;  %v2766_v16 = vld [vmem:[#allocation12 + $0x2c] sm:$0xf]  ;;  %v2449_v17 = vld [vmem:[#allocation12 + $0x38] sm:$0xf0]  ;;  %v3374_v27 = vor.u32 %v2765_v7, %v2441_v8 }
 0x110   : > { %v3162_v18 = vmov 0   ;;  %s3357_s24 = sshll.u32 %s3148_s22, 3  ;;  %v3369_v22 = vor.u32 %v2772_v13, %v2463_v12  ;;  %v2423_v23 = vld [vmem:[#allocation12] sm:$0xf]  ;;  %v2763_v24 = vld [vmem:[#allocation12 + $0xc] sm:$0xf0]  ;;  %v3376_v28 = vor.u32 %v2766_v16, %v2449_v17 }
 0x111   : > { %719 = vmatpush.bf16.msra.mxu0 %v3333_v55  ;;  %744 = vmatpush.bf16.msra.mxu2 %v3335_v56  ;;  %v834_v20 = vstv %s3357_s24  ;;  %s3362_s25 = sadd.s32 1, %s3357_s24  ;;  %v2761_v25 = vld [vmem:[#allocation12 + $0x4] sm:$0xf]  ;;  %v2447_v29 = vld [vmem:[#allocation12 + $0x28] sm:$0xf]  ;;  %v3382_v43 = vor.u32 %v2763_v24, %v2423_v23  ;;  %v3384_v44 = vld [vmem:[#allocation3] sm:$0xff] }
 0x112   : > { %732 = vmatpush.bf16.msra.mxu1 %v3339_v59  ;;  %758 = vmatpush.bf16.msra.mxu3 %v3341_v60  ;;  %vm835_vm0 = vcmp.gt.s32.totalorder %v3237_v1, %v834_v20  ;;  %v2768_v33 = vld [vmem:[#allocation12 + $0x34] sm:$0xf0]  ;;  %v978_v35 = vstv %s3362_s25  ;;  %v2425_v36 = vld [vmem:[#allocation12 + $0x10] sm:$0xf0]  ;;  %v2762_v37 = vld [vmem:[#allocation12 + $0xc] sm:$0xf]  ;;  %v522_v54 = vpack.c.bf16 %v3384_v44, %v3384_v44 }
 0x113   : > { %2854 = vset.pattern.permute.xlu0 %v3162_v18  ;;  %2855 = vset.pattern.permute.xlu1 %v3162_v18  ;;  %v836_v34 = vsel %vm835_vm0, 1, %v3162_v18  ;;  %v2433_v38 = vld [vmem:[#allocation12 + $0x18] sm:$0xf0]  ;;  %v3386_v49 = vor.u32 %v2768_v33, %v2447_v29  ;;  %vm979_vm1 = vcmp.gt.s32.totalorder %v3237_v1, %v978_v35  ;;  %v3391_v50 = vor.u32 %v2761_v25, %v2425_v36  ;;  %v2431_v52 = vld [vmem:[#allocation12 + $0x8] sm:$0xf]  ;;  %s3396_s26 = sadd.s32 6, %s3357_s24 }
 0x114   : > { %2856 = vset.pattern.permute.xlu2 %v3162_v18  ;;  %838 = vperm.xlu0 %2854, %v836_v34   ;;  %v3393_v51 = vor.u32 %v2762_v37, %v2433_v38  ;;  %v2764_v53 = vld [vmem:[#allocation12 + $0x14] sm:$0xf0]  ;;  %v980_v57 = vsel %vm979_vm1, 1, %v3162_v18  ;;  %v1698_v61 = vstv %s3396_s26  ;;  %p508_p1 = scmp.lt.s32.totalorder %s3357_s24, 7  ;;  %p844_p2 = scmp.lt.s32.totalorder %s3362_s25, 7 }
 0x115   : > { %720 = vmatpush.bf16.msra.mxu0 %v3345_v48  ;;  %745 = vmatpush.bf16.msra.mxu2 %v3347_v3  ;;  %v3405_v58 = vor.u32 %v2764_v53, %v2431_v52  ;;  %vm1699_vm2 = vcmp.gt.s32.totalorder %v3237_v1, %v1698_v61  ;;  %s3521_s14 = sadd.s32 2, %s3357_s24  ;;  %s3524_s15 = sadd.s32 3, %s3357_s24 }
 0x116   : > { %733 = vmatpush.bf16.msra.mxu1 %v3351_v9  ;;  %759 = vmatpush.bf16.msra.mxu3 %v3353_v11  ;;  %v1700_v62 = vsel %vm1699_vm2, 1, %v3162_v18  ;;  %s509_s3 = scalar_select %p508_p1, %s3357_s24, 7 }
 0x117   : > { %s3800_s25 = smov (!%p844_p2, %s3362_s25), 7  ;;  %s3532_s16 = sadd.s32 7, %s3357_s24 }
 0x118   : > { %s2418_s27 = sshll.u32 %s509_s3, 3  ;;  %s2552_s11 = sshll.u32 %s3800_s25, 3 }
 0x119   : > { %721 = vmatpush.bf16.msra.mxu0 %v3367_v21  ;;  %746 = vmatpush.bf16.msra.mxu2 %v3369_v22  ;;  %s511_s28 = sshra.s32 %s2418_s27, 3  ;;  %s847_s6 = sshra.s32 %s2552_s11, 3 }
 0x11a   : > { %734 = vmatpush.bf16.msra.mxu1 %v3374_v27  ;;  %760 = vmatpush.bf16.msra.mxu3 %v3376_v28  ;;  %s2760_s29 = sshll.u32 %s511_s28, 4  ;;  %s2793_s12 = sshll.u32 %s847_s6, 4 }
 0x11b   : > { %s515_s30 = scalar_lea.vmem [#allocation2], %s2760_s29  ;;  %s851_s13 = scalar_lea.vmem [#allocation2], %s2793_s12 }
 0x11c   : > { %982 = vperm.xlu0 %2854, %v980_v57   ;;  %v516_v63 = vld [vmem:[%s515_s30] sm:$0xff]  ;;  %v517_v7 = vld [vmem:[%s515_s30 + $0x8] sm:$0xff]  ;;  %p988_p3 = scmp.lt.s32.totalorder %s3521_s14, 7  ;;  %p1132_p4 = scmp.lt.s32.totalorder %s3524_s15, 7 }
 0x11d   : > { %722 = vmatpush.bf16.msra.mxu0 %v3382_v43  ;;  %747 = vmatpush.bf16.msra.mxu2 %v3386_v49  ;;  %v518_v0 = vunpack.c.l.bf16 %v516_v63  ;;  %v519_v40 = vunpack.c.h.bf16 %v516_v63  ;;  %v521_v16 = vunpack.c.h.bf16 %v517_v7  ;;  %v520_v37 = vunpack.c.l.bf16 %v517_v7  ;;  %s3629_s8 = sadd.s32 4, %s3357_s24  ;;  %s3632_s5 = sadd.s32 5, %s3357_s24 }
 0x11e   : > { %735 = vmatpush.bf16.msra.mxu1 %v3391_v50  ;;  %761 = vmatpush.bf16.msra.mxu3 %v3393_v51  ;;  %p1276_p5 = scmp.lt.s32.totalorder %s3629_s8, 7  ;;  %p1420_p6 = scmp.lt.s32.totalorder %s3632_s5, 7 }
 0x11f   : > { %p1564_p7 = scmp.lt.s32.totalorder %s3396_s26, 7  ;;  %p1708_p8 = scmp.lt.s32.totalorder %s3532_s16, 7 }
 0x120   : > { %723 = vmatmul.bf16.vlgmr.msra.gmra.mxu0 %v522_v54  ;;  %s502_s22 = sadd.s32 1, %s3148_s22  }
 0x121   : > { %859 = vmatpush.bf16.msrb.mxu0 %v3290_v47  ;;  %736 = vmatmul.bf16.vlgmr.msra.gmra.mxu1 %v522_v54  ;;  %s3810_s26 = smov (!%p1564_p7, %s3396_s26), 7  ;;  %p501_p9 = scmp.ge.s32.totalorder %s502_s22, %s3788_s0 }
 0x122   : > { %872 = vmatpush.bf16.msrb.mxu1 %v3292_v5  ;;  %762 = vmatmul.bf16.vlgmr.msra.gmra.mxu3 %v522_v54  ;;  %s2582_s11 = sshll.u32 %s3810_s26, 3 }
 0x123   : > { %748 = vmatpush.bf16.msra.mxu2 %v3405_v58  ;;  %898 = vmatpush.bf16.msrb.mxu3 %v3294_v6  ;;  %s1567_s6 = sshra.s32 %s2582_s11, 3 }
 0x124   : > { %1702 = vperm.xlu0 %2854, %v1700_v62   ;;  %s2798_s12 = sshll.u32 %s1567_s6, 4 }
 0x125   : > { %860 = vmatpush.bf16.msrb.mxu0 %v3297_v10 }
 0x126   : > { %873 = vmatpush.bf16.msrb.mxu1 %v3301_v14  ;;  %749 = vmatmul.bf16.vlgmr.msra.gmra.mxu2 %v522_v54 }
 0x127   : > { %885 = vmatpush.bf16.msrb.mxu2 %v3305_v19  ;;  %899 = vmatpush.bf16.msrb.mxu3 %v3303_v15 }
 0x129   : > { %861 = vmatpush.bf16.msrb.mxu0 %v3309_v26 }
 0x12a   : > { %874 = vmatpush.bf16.msrb.mxu1 %v3313_v30 }
 0x12b   : > { %886 = vmatpush.bf16.msrb.mxu2 %v3317_v32  ;;  %900 = vmatpush.bf16.msrb.mxu3 %v3315_v31 }
 0x12d   : > { %862 = vmatpush.bf16.msrb.mxu0 %v3321_v39 }
 0x12e   : > { %875 = vmatpush.bf16.msrb.mxu1 %v3327_v45 }
 0x12f   : > { %887 = vmatpush.bf16.msrb.mxu2 %v3323_v42  ;;  %901 = vmatpush.bf16.msrb.mxu3 %v3329_v46 }
 0x131   : > { %863 = vmatpush.bf16.msrb.mxu0 %v3333_v55 }
 0x132   : > { %876 = vmatpush.bf16.msrb.mxu1 %v3339_v59 }
 0x133   : > { %888 = vmatpush.bf16.msrb.mxu2 %v3335_v56  ;;  %902 = vmatpush.bf16.msrb.mxu3 %v3341_v60 }
 0x135   : > { %864 = vmatpush.bf16.msrb.mxu0 %v3345_v48 }
 0x136   : > { %877 = vmatpush.bf16.msrb.mxu1 %v3351_v9 }
 0x137   : > { %889 = vmatpush.bf16.msrb.mxu2 %v3347_v3  ;;  %903 = vmatpush.bf16.msrb.mxu3 %v3353_v11 }
 0x139   : > { %865 = vmatpush.bf16.msrb.mxu0 %v3367_v21 }
 0x13a   : > { %878 = vmatpush.bf16.msrb.mxu1 %v3374_v27 }
 0x13b   : > { %890 = vmatpush.bf16.msrb.mxu2 %v3369_v22  ;;  %904 = vmatpush.bf16.msrb.mxu3 %v3376_v28 }
 0x13d   : > { %866 = vmatpush.bf16.msrb.mxu0 %v3382_v43 }
 0x13e   : > { %879 = vmatpush.bf16.msrb.mxu1 %v3391_v50 }
 0x13f   : > { %891 = vmatpush.bf16.msrb.mxu2 %v3386_v49  ;;  %905 = vmatpush.bf16.msrb.mxu3 %v3393_v51 }
 0x141   : > { %1003 = vmatpush.bf16.msra.mxu0 %v3290_v47 }
 0x142   : > { %1016 = vmatpush.bf16.msra.mxu1 %v3292_v5 }
 0x143   : > { %892 = vmatpush.bf16.msrb.mxu2 %v3405_v58  ;;  %1042 = vmatpush.bf16.msra.mxu3 %v3294_v6 }
 0x145   : > { %1004 = vmatpush.bf16.msra.mxu0 %v3297_v10 }
 0x146   : > { %1017 = vmatpush.bf16.msra.mxu1 %v3301_v14 }
 0x147   : > { %1029 = vmatpush.bf16.msra.mxu2 %v3305_v19  ;;  %1043 = vmatpush.bf16.msra.mxu3 %v3303_v15 }
 0x149   : > { %1005 = vmatpush.bf16.msra.mxu0 %v3309_v26 }
 0x14a   : > { %1018 = vmatpush.bf16.msra.mxu1 %v3313_v30 }
 0x14b   : > { %1030 = vmatpush.bf16.msra.mxu2 %v3317_v32  ;;  %1044 = vmatpush.bf16.msra.mxu3 %v3315_v31 }
 0x14d   : > { %1006 = vmatpush.bf16.msra.mxu0 %v3321_v39 }
 0x14e   : > { %1019 = vmatpush.bf16.msra.mxu1 %v3327_v45 }
 0x14f   : > { %1031 = vmatpush.bf16.msra.mxu2 %v3323_v42  ;;  %1045 = vmatpush.bf16.msra.mxu3 %v3329_v46 }
 0x151   : > { %1007 = vmatpush.bf16.msra.mxu0 %v3333_v55 }
 0x152   : > { %1020 = vmatpush.bf16.msra.mxu1 %v3339_v59 }
 0x153   : > { %1032 = vmatpush.bf16.msra.mxu2 %v3335_v56  ;;  %1046 = vmatpush.bf16.msra.mxu3 %v3341_v60 }
 0x155   : > { %1008 = vmatpush.bf16.msra.mxu0 %v3345_v48 }
 0x156   : > { %1021 = vmatpush.bf16.msra.mxu1 %v3351_v9 }
 0x157   : > { %1033 = vmatpush.bf16.msra.mxu2 %v3347_v3  ;;  %1047 = vmatpush.bf16.msra.mxu3 %v3353_v11 }
 0x159   : > { %1009 = vmatpush.bf16.msra.mxu0 %v3367_v21 }
 0x15a   : > { %1022 = vmatpush.bf16.msra.mxu1 %v3374_v27 }
 0x15b   : > { %1034 = vmatpush.bf16.msra.mxu2 %v3369_v22  ;;  %1048 = vmatpush.bf16.msra.mxu3 %v3376_v28 }
 0x15d   : > { %1010 = vmatpush.bf16.msra.mxu0 %v3382_v43 }
 0x15e   : > { %1023 = vmatpush.bf16.msra.mxu1 %v3391_v50 }
 0x15f   : > { %1035 = vmatpush.bf16.msra.mxu2 %v3386_v49  ;;  %1049 = vmatpush.bf16.msra.mxu3 %v3393_v51 }
 0x163   : > { %1036 = vmatpush.bf16.msra.mxu2 %v3405_v58 }
 0x19d   : > { %v724_v41 = vpop.f32.mrf.mxu0 }
 0x19e   : > { %v767_v2 = vadd.f32 %v724_v41, %v518_v0  ;;  %v737_v4 = vpop.f32.mrf.mxu1 }
 0x19f   : > { %v768_v8 = vadd.f32 %v737_v4, %v519_v40 }
 0x1a0   : > { %v2549_v12 = vmul.f32 -1.442695, %v767_v2 }
 0x1a1   : > { %v2550_v13 = vmul.f32 -1.442695, %v768_v8 }
 0x1a2   : > { %2857 = vpow2.f32 %v2549_v12 }
 0x1a3   : > { %2859 = vpow2.f32 %v2550_v13 }
 0x1a5   : > { %v763_v17 = vpop.f32.mrf.mxu3  ;;  %v726_v23 = vpop.f32.mrf.mxu0 }
 0x1a6   : > { %v770_v20 = vadd.f32 %v763_v17, %v521_v16  ;;  %v739_v24 = vpop.f32.mrf.mxu1 }
 0x1a8   : > { %v2551_v25 = vmul.f32 -1.442695, %v770_v20  ;;  %v2858_v29 = vpop.eup %2857 }
 0x1a9   : > { %v750_v33 = vpop.f32.mrf.mxu2  ;;  %v2860_v34 = vpop.eup %2859  ;;  %v774_v35 = vadd.f32 1.0, %v2858_v29 }
 0x1aa   : > { %2861 = vpow2.f32 %v2551_v25  ;;  %v793_v36 = vadd.f32 1.0, %v2860_v34  ;;  %v769_v53 = vadd.f32 %v750_v33, %v520_v37  ;;  %v506_v33 = vld [vmem:[#allocation4] sm:$0xff] }
 0x1ab   : > { %2863 = vrcp.f32 %v774_v35  ;;  %v786_v2 = vand.u32 2147483648, %v774_v35  ;;  %v784_v8 = vand.u32 2147483647, %v774_v35  ;;  %vm780_vm5 = vweird.f32 %v774_v35 }
 0x1ac   : > { %2865 = vrcp.f32 %v793_v36  ;;  %v805_v12 = vand.u32 2147483648, %v793_v36  ;;  %v803_v13 = vand.u32 2147483647, %v793_v36  ;;  %vm799_vm7 = vweird.f32 %v793_v36 }
 0x1ad   : > { %v765_v38 = vpop.f32.mrf.mxu3  ;;  %v787_v24 = vor.u32 1.1754944e-38, %v786_v2  ;;  %vm785_vm8 = vcmp.eq.f32.partialorder %v784_v8, 8.507059e+37 }
 0x1ae   : > { %v806_v34 = vor.u32 1.1754944e-38, %v805_v12  ;;  %vm804_vm10 = vcmp.eq.f32.partialorder %v803_v13, 8.507059e+37 }
 0x1b0   : > { %v2862_v52 = vpop.eup %2861 }
 0x1b1   : > { %v813_v54 = vadd.f32 1.0, %v2862_v52  ;;  %v752_v57 = vpop.f32.mrf.mxu2  ;;  %v2864_v61 = vpop.eup %2863 }
 0x1b2   : > { %v2866_v62 = vpop.eup %2865  ;;  %v776_v63 = vmul.f32 %v2864_v61, %v774_v35  ;;  %vm781_vm3 = vweird.f32 %v2864_v61 }
 0x1b3   : > { %2867 = vrcp.f32 %v813_v54  ;;  %v795_v0 = vmul.f32 %v2866_v62, %v793_v36  ;;  %vm800_vm4 = vweird.f32 %v2866_v62  ;;  %vm782_vm6 = vmor %vm780_vm5, %vm781_vm3  ;;  %v825_v2 = vand.u32 2147483648, %v813_v54 }
 0x1b4   : > { %2869 = vtanh.f32 %v769_v53  ;;  %v777_v40 = vsub.f32 1.0, %v776_v63  ;;  %vm801_vm9 = vmor %vm799_vm7, %vm800_vm4  ;;  %v839_v63 = vpop.permute.xlu0 %838  ;;  %vm819_vm13 = vweird.f32 %v813_v54 }
 0x1b5   : > { %v796_v41 = vsub.f32 1.0, %v795_v0  ;;  %vm840_vm11 = vcmp.eq.s32.totalorder %v839_v63, 1 }
 0x1b6   : > { %v778_v4 = vmul.f32 %v2864_v61, %v777_v40 }
 0x1b7   : > { %v797_v7 = vmul.f32 %v2866_v62, %v796_v41 }
 0x1b8   : > { %v779_v17 = vadd.f32 %v2864_v61, %v778_v4 }
 0x1b9   : > { %v2868_v16 = vpop.eup %2867  ;;  %v798_v25 = vadd.f32 %v2866_v62, %v797_v7 }
 0x1ba   : > { %v2870_v20 = vpop.eup %2869  ;;  %v815_v23 = vmul.f32 %v2868_v16, %v813_v54  ;;  %v783_v29 = vsel %vm782_vm6, %v2864_v61, %v779_v17  ;;  %vm820_vm12 = vweird.f32 %v2868_v16  ;;  %v823_v61 = vand.u32 2147483647, %v813_v54 }
 0x1bb   : > { %v788_v38 = vsel %vm785_vm8, %v787_v24, %v783_v29  ;;  %v802_v52 = vsel %vm801_vm9, %v2866_v62, %v798_v25  ;;  %vm821_vm14 = vmor %vm819_vm13, %vm820_vm12  ;;  %v826_v62 = vor.u32 1.1754944e-38, %v825_v2  ;;  %v853_v29 = vld [vmem:[%s851_s13 + $0x8] sm:$0xff] }
 0x1bc   : > { %v816_v37 = vsub.f32 1.0, %v815_v23  ;;  %v830_v53 = vmul.f32 %v2870_v20, %v788_v38  ;;  %v807_v57 = vsel %vm804_vm10, %v806_v34, %v802_v52  ;;  %vm824_vm15 = vcmp.eq.f32.partialorder %v823_v61, 8.507059e+37 }
 0x1bd   : > { %v829_v35 = vmul.f32 %v807_v57, %v506_v33  ;;  %v856_v61 = vunpack.c.l.bf16 %v853_v29 }
 0x1be   : > { %v817_v0 = vmul.f32 %v2868_v16, %v816_v37  ;;  %v857_v37 = vunpack.c.h.bf16 %v853_v29 }
 0x1bf   : > { %v831_v40 = vadd.f32 %v830_v53, %v829_v35 }
 0x1c0   : > { %v818_v41 = vadd.f32 %v2868_v16, %v817_v0 }
 0x1c1   : > { %2871 = vtanh.f32 %v831_v40  ;;  %v3478_v36 = vsel %vm840_vm11, %v831_v40, %v506_v33 }
 0x1c2   : > { %v822_v4 = vsel %vm821_vm14, %v2868_v16, %v818_v41 }
 0x1c3   : > { %v827_v12 = vsel %vm824_vm15, %v826_v62, %v822_v4 }
 0x1c7   : > { %v2872_v8 = vpop.eup %2871 }
 0x1c8   : > { %v833_v7 = vmul.f32 %v2872_v8, %v827_v12  ;;  %v1122_v8 = vstv %s3521_s14  ;;  %s3802_s14 = smov (!%p988_p3, %s3521_s14), 7 }
 0x1c9   : > { %vm1123_vm0 = vcmp.gt.s32.totalorder %v3237_v1, %v1122_v8  ;;  %s2558_s17 = sshll.u32 %s3802_s14, 3 }
 0x1ca   : > { %v3482_v13 = vsel %vm840_vm11, %v833_v7, %v3384_v44  ;;  %v852_v44 = vld [vmem:[%s851_s13] sm:$0xff]  ;;  %s991_s18 = sshra.s32 %s2558_s17, 3  ;;  %s1571_s13 = scalar_lea.vmem [#allocation2], %s2798_s12 }
 0x1cb   : > { %v858_v17 = vpack.c.bf16 %v3482_v13, %v3482_v13  ;;  %v854_v54 = vunpack.c.l.bf16 %v852_v44  ;;  %v855_v16 = vunpack.c.h.bf16 %v852_v44  ;;  %v1124_v44 = vsel %vm1123_vm0, 1, %v3162_v18  ;;  %s2794_s19 = sshll.u32 %s991_s18, 4 }
 0x1cc   : > { %1126 = vperm.xlu1 %2855, %v1124_v44   ;;  %s995_s1 = scalar_lea.vmem [#allocation2], %s2794_s19 }
 0x1cd   : > { %867 = vmatmul.bf16.vlgmr.msrb.gmra.mxu0 %v858_v17  ;;  %880 = vmatmul.bf16.vlgmr.msrb.gmra.mxu1 %v858_v17 }
 0x1ce   : > { %893 = vmatmul.bf16.vlgmr.msrb.gmra.mxu2 %v858_v17  ;;  %906 = vmatmul.bf16.vlgmr.msrb.gmra.mxu3 %v858_v17 }
 0x1cf   : > { %1147 = vmatpush.bf16.msrb.mxu0 %v3290_v47  ;;  %1160 = vmatpush.bf16.msrb.mxu1 %v3292_v5 }
 0x1d0   : > { %1173 = vmatpush.bf16.msrb.mxu2 %v3305_v19  ;;  %1186 = vmatpush.bf16.msrb.mxu3 %v3294_v6 }
 0x1d3   : > { %1148 = vmatpush.bf16.msrb.mxu0 %v3297_v10  ;;  %1161 = vmatpush.bf16.msrb.mxu1 %v3301_v14 }
 0x1d4   : > { %1174 = vmatpush.bf16.msrb.mxu2 %v3317_v32  ;;  %1187 = vmatpush.bf16.msrb.mxu3 %v3303_v15 }
 0x1d7   : > { %1149 = vmatpush.bf16.msrb.mxu0 %v3309_v26  ;;  %1162 = vmatpush.bf16.msrb.mxu1 %v3313_v30 }
 0x1d8   : > { %1175 = vmatpush.bf16.msrb.mxu2 %v3323_v42  ;;  %1188 = vmatpush.bf16.msrb.mxu3 %v3315_v31 }
 0x1db   : > { %1150 = vmatpush.bf16.msrb.mxu0 %v3321_v39  ;;  %1163 = vmatpush.bf16.msrb.mxu1 %v3327_v45 }
 0x1dc   : > { %1176 = vmatpush.bf16.msrb.mxu2 %v3335_v56  ;;  %1189 = vmatpush.bf16.msrb.mxu3 %v3329_v46 }
 0x1df   : > { %1151 = vmatpush.bf16.msrb.mxu0 %v3333_v55  ;;  %1164 = vmatpush.bf16.msrb.mxu1 %v3339_v59 }
 0x1e0   : > { %1177 = vmatpush.bf16.msrb.mxu2 %v3347_v3  ;;  %1190 = vmatpush.bf16.msrb.mxu3 %v3341_v60 }
 0x1e3   : > { %1152 = vmatpush.bf16.msrb.mxu0 %v3345_v48  ;;  %1165 = vmatpush.bf16.msrb.mxu1 %v3351_v9 }
 0x1e4   : > { %1178 = vmatpush.bf16.msrb.mxu2 %v3369_v22  ;;  %1191 = vmatpush.bf16.msrb.mxu3 %v3353_v11 }
 0x1e7   : > { %1153 = vmatpush.bf16.msrb.mxu0 %v3367_v21  ;;  %1166 = vmatpush.bf16.msrb.mxu1 %v3374_v27 }
 0x1e8   : > { %1179 = vmatpush.bf16.msrb.mxu2 %v3386_v49  ;;  %1192 = vmatpush.bf16.msrb.mxu3 %v3376_v28 }
 0x1eb   : > { %1154 = vmatpush.bf16.msrb.mxu0 %v3382_v43  ;;  %1167 = vmatpush.bf16.msrb.mxu1 %v3391_v50 }
 0x1ec   : > { %1180 = vmatpush.bf16.msrb.mxu2 %v3405_v58  ;;  %1193 = vmatpush.bf16.msrb.mxu3 %v3393_v51 }
 0x24a   : > { %v868_v20 = vpop.f32.mrf.mxu0  ;;  %v881_v23 = vpop.f32.mrf.mxu1 }
 0x24b   : > { %v911_v24 = vadd.f32 %v868_v20, %v854_v54  ;;  %v912_v25 = vadd.f32 %v881_v23, %v855_v16  ;;  %v1266_v54 = vstv %s3524_s15  ;;  %s3804_s15 = smov (!%p1132_p4, %s3524_s15), 7 }
 0x24c   : > { %vm1267_vm1 = vcmp.gt.s32.totalorder %v3237_v1, %v1266_v54  ;;  %s2564_s20 = sshll.u32 %s3804_s15, 3 }
 0x24d   : > { %v2555_v33 = vmul.f32 -1.442695, %v911_v24  ;;  %v2556_v34 = vmul.f32 -1.442695, %v912_v25  ;;  %s1135_s4 = sshra.s32 %s2564_s20, 3 }
 0x24e   : > { %s2795_s23 = sshll.u32 %s1135_s4, 4 }
 0x24f   : > { %2873 = vpow2.f32 %v2555_v33  ;;  %s1139_s2 = scalar_lea.vmem [#allocation2], %s2795_s23 }
 0x250   : > { %2875 = vpow2.f32 %v2556_v34 }
 0x251   : > { %v894_v38 = vpop.f32.mrf.mxu2  ;;  %v907_v52 = vpop.f32.mrf.mxu3 }
 0x252   : > { %v914_v53 = vadd.f32 %v907_v52, %v857_v37  ;;  %v870_v57 = vpop.f32.mrf.mxu0  ;;  %v883_v63 = vpop.f32.mrf.mxu1  ;;  %v913_v7 = vadd.f32 %v894_v38, %v856_v61 }
 0x254   : > { %v2557_v0 = vmul.f32 -1.442695, %v914_v53  ;;  %v1268_v53 = vsel %vm1267_vm1, 1, %v3162_v18 }
 0x255   : > { %v2874_v35 = vpop.eup %2873  ;;  %1270 = vperm.xlu1 %2855, %v1268_v53  }
 0x256   : > { %v2876_v40 = vpop.eup %2875  ;;  %v918_v41 = vadd.f32 1.0, %v2874_v35  ;;  %2877 = vpow2.f32 %v2557_v0  ;;  %v1842_v35 = vstv %s3532_s16  ;;  %s3812_s16 = smov (!%p1708_p8, %s3532_s16), 7 }
 0x257   : > { %v937_v2 = vadd.f32 1.0, %v2876_v40  ;;  %vm1843_vm10 = vcmp.gt.s32.totalorder %v3237_v1, %v1842_v35  ;;  %s2588_s26 = sshll.u32 %s3812_s16, 3 }
 0x258   : > { %2879 = vrcp.f32 %v918_v41  ;;  %v928_v34 = vand.u32 2147483647, %v918_v41  ;;  %v930_v37 = vand.u32 2147483648, %v918_v41  ;;  %vm924_vm4 = vweird.f32 %v918_v41  ;;  %s1711_s14 = sshra.s32 %s2588_s26, 3 }
 0x259   : > { %2881 = vrcp.f32 %v937_v2  ;;  %v896_v4 = vpop.f32.mrf.mxu2  ;;  %v909_v62 = vpop.f32.mrf.mxu3  ;;  %v949_v33 = vand.u32 2147483648, %v937_v2  ;;  %v947_v52 = vand.u32 2147483647, %v937_v2  ;;  %vm943_vm5 = vweird.f32 %v937_v2  ;;  %s2799_s15 = sshll.u32 %s1711_s14, 4 }
 0x25a   : > { %v931_v40 = vor.u32 1.1754944e-38, %v930_v37  ;;  %vm929_vm8 = vcmp.eq.f32.partialorder %v928_v34, 8.507059e+37  ;;  %s1715_s17 = scalar_lea.vmem [#allocation2], %s2799_s15 }
 0x25b   : > { %v950_v8 = vor.u32 1.1754944e-38, %v949_v33  ;;  %vm948_vm9 = vcmp.eq.f32.partialorder %v947_v52, 8.507059e+37 }
 0x25c   : > { %v2878_v12 = vpop.eup %2877 }
 0x25d   : > { %v957_v17 = vadd.f32 1.0, %v2878_v12 }
 0x25e   : > { %v2880_v16 = vpop.eup %2879 }
 0x25f   : > { %v2882_v20 = vpop.eup %2881  ;;  %v920_v23 = vmul.f32 %v2880_v16, %v918_v41  ;;  %2883 = vrcp.f32 %v957_v17  ;;  %vm925_vm2 = vweird.f32 %v2880_v16  ;;  %vm963_vm13 = vweird.f32 %v957_v17 }
 0x260   : > { %v939_v24 = vmul.f32 %v2882_v20, %v937_v2  ;;  %2885 = vtanh.f32 %v913_v7  ;;  %vm944_vm3 = vweird.f32 %v2882_v20  ;;  %vm926_vm6 = vmor %vm924_vm4, %vm925_vm2  ;;  %v967_v33 = vand.u32 2147483647, %v957_v17 }
 0x261   : > { %v921_v25 = vsub.f32 1.0, %v920_v23  ;;  %vm945_vm7 = vmor %vm943_vm5, %vm944_vm3 }
 0x262   : > { %v940_v29 = vsub.f32 1.0, %v939_v24  ;;  %vm968_vm15 = vcmp.eq.f32.partialorder %v967_v33, 8.507059e+37 }
 0x263   : > { %v922_v38 = vmul.f32 %v2880_v16, %v921_v25  ;;  %v1844_v25 = vsel %vm1843_vm10, 1, %v3162_v18 }
 0x264   : > { %v941_v57 = vmul.f32 %v2882_v20, %v940_v29  ;;  %v983_v29 = vpop.permute.xlu0 %982  ;;  %1846 = vperm.xlu1 %2855, %v1844_v25  }
 0x265   : > { %v2884_v63 = vpop.eup %2883  ;;  %v923_v0 = vadd.f32 %v2880_v16, %v922_v38  ;;  %vm984_vm11 = vcmp.eq.s32.totalorder %v983_v29, 1 }
 0x266   : > { %v942_v61 = vadd.f32 %v2882_v20, %v941_v57  ;;  %v959_v4 = vmul.f32 %v2884_v63, %v957_v17  ;;  %v2886_v62 = vpop.eup %2885  ;;  %vm964_vm12 = vweird.f32 %v2884_v63 }
 0x267   : > { %v927_v12 = vsel %vm926_vm6, %v2880_v16, %v923_v0  ;;  %v969_v16 = vand.u32 2147483648, %v957_v17  ;;  %vm965_vm14 = vmor %vm963_vm13, %vm964_vm12 }
 0x268   : > { %v932_v7 = vsel %vm929_vm8, %v931_v40, %v927_v12  ;;  %v946_v44 = vsel %vm945_vm7, %v2882_v20, %v942_v61  ;;  %v960_v54 = vsub.f32 1.0, %v959_v4 }
 0x269   : > { %v951_v23 = vsel %vm948_vm9, %v950_v8, %v946_v44  ;;  %v974_v41 = vmul.f32 %v2886_v62, %v932_v7  ;;  %v970_v52 = vor.u32 1.1754944e-38, %v969_v16  ;;  %v997_v8 = vld [vmem:[%s995_s1 + $0x8] sm:$0xff] }
 0x26a   : > { %v973_v2 = vmul.f32 %v951_v23, %v3478_v36  ;;  %v961_v24 = vmul.f32 %v2884_v63, %v960_v54  ;;  %v1001_v44 = vunpack.c.h.bf16 %v997_v8 }
 0x26c   : > { %v975_v37 = vadd.f32 %v974_v41, %v973_v2  ;;  %v962_v38 = vadd.f32 %v2884_v63, %v961_v24 }
 0x26e   : > { %2887 = vtanh.f32 %v975_v37  ;;  %v3541_v20 = vsel %vm984_vm11, %v975_v37, %v3478_v36  ;;  %v966_v34 = vsel %vm965_vm14, %v2884_v63, %v962_v38  ;;  %v996_v36 = vld [vmem:[%s995_s1] sm:$0xff] }
 0x26f   : > { %v971_v57 = vsel %vm968_vm15, %v970_v52, %v966_v34  ;;  %v999_v17 = vunpack.c.h.bf16 %v996_v36  ;;  %v1000_v52 = vunpack.c.l.bf16 %v997_v8 }
 0x274   : > { %v2888_v53 = vpop.eup %2887 }
 0x275   : > { %v977_v0 = vmul.f32 %v2888_v53, %v971_v57 }
 0x277   : > { %v3545_v35 = vsel %vm984_vm11, %v977_v0, %v3482_v13  ;;  %v998_v13 = vunpack.c.l.bf16 %v996_v36 }
 0x278   : > { %v1002_v40 = vpack.c.bf16 %v3545_v35, %v3545_v35 }
 0x27a   : > { %1011 = vmatmul.bf16.vlgmr.msra.gmra.mxu0 %v1002_v40  ;;  %1024 = vmatmul.bf16.vlgmr.msra.gmra.mxu1 %v1002_v40 }
 0x27b   : > { %1037 = vmatmul.bf16.vlgmr.msra.gmra.mxu2 %v1002_v40  ;;  %1050 = vmatmul.bf16.vlgmr.msra.gmra.mxu3 %v1002_v40 }
 0x27c   : > { %1291 = vmatpush.bf16.msra.mxu0 %v3290_v47  ;;  %1304 = vmatpush.bf16.msra.mxu1 %v3292_v5 }
 0x27d   : > { %1317 = vmatpush.bf16.msra.mxu2 %v3305_v19  ;;  %1330 = vmatpush.bf16.msra.mxu3 %v3294_v6 }
 0x280   : > { %1292 = vmatpush.bf16.msra.mxu0 %v3297_v10  ;;  %1305 = vmatpush.bf16.msra.mxu1 %v3301_v14 }
 0x281   : > { %1318 = vmatpush.bf16.msra.mxu2 %v3317_v32  ;;  %1331 = vmatpush.bf16.msra.mxu3 %v3303_v15 }
 0x284   : > { %1293 = vmatpush.bf16.msra.mxu0 %v3309_v26  ;;  %1306 = vmatpush.bf16.msra.mxu1 %v3313_v30 }
 0x285   : > { %1319 = vmatpush.bf16.msra.mxu2 %v3323_v42  ;;  %1332 = vmatpush.bf16.msra.mxu3 %v3315_v31 }
 0x288   : > { %1294 = vmatpush.bf16.msra.mxu0 %v3321_v39  ;;  %1307 = vmatpush.bf16.msra.mxu1 %v3327_v45 }
 0x289   : > { %1320 = vmatpush.bf16.msra.mxu2 %v3335_v56  ;;  %1333 = vmatpush.bf16.msra.mxu3 %v3329_v46 }
 0x28c   : > { %1295 = vmatpush.bf16.msra.mxu0 %v3333_v55  ;;  %1308 = vmatpush.bf16.msra.mxu1 %v3339_v59 }
 0x28d   : > { %1321 = vmatpush.bf16.msra.mxu2 %v3347_v3  ;;  %1334 = vmatpush.bf16.msra.mxu3 %v3341_v60 }
 0x290   : > { %1296 = vmatpush.bf16.msra.mxu0 %v3345_v48  ;;  %1309 = vmatpush.bf16.msra.mxu1 %v3351_v9 }
 0x291   : > { %1322 = vmatpush.bf16.msra.mxu2 %v3369_v22  ;;  %1335 = vmatpush.bf16.msra.mxu3 %v3353_v11 }
 0x294   : > { %1297 = vmatpush.bf16.msra.mxu0 %v3367_v21  ;;  %1310 = vmatpush.bf16.msra.mxu1 %v3374_v27 }
 0x295   : > { %1323 = vmatpush.bf16.msra.mxu2 %v3386_v49  ;;  %1336 = vmatpush.bf16.msra.mxu3 %v3376_v28 }
 0x298   : > { %1298 = vmatpush.bf16.msra.mxu0 %v3382_v43  ;;  %1311 = vmatpush.bf16.msra.mxu1 %v3391_v50 }
 0x299   : > { %1324 = vmatpush.bf16.msra.mxu2 %v3405_v58  ;;  %1337 = vmatpush.bf16.msra.mxu3 %v3393_v51 }
 0x2f7   : > { %v1012_v63 = vpop.f32.mrf.mxu0  ;;  %v1025_v61 = vpop.f32.mrf.mxu1 }
 0x2f8   : > { %v1055_v4 = vadd.f32 %v1012_v63, %v998_v13  ;;  %v1056_v62 = vadd.f32 %v1025_v61, %v999_v17 }
 0x2fa   : > { %v2561_v12 = vmul.f32 -1.442695, %v1055_v4  ;;  %v2562_v7 = vmul.f32 -1.442695, %v1056_v62 }
 0x2fc   : > { %2889 = vpow2.f32 %v2561_v12 }
 0x2fd   : > { %2891 = vpow2.f32 %v2562_v7 }
 0x2fe   : > { %v1038_v54 = vpop.f32.mrf.mxu2  ;;  %v1051_v23 = vpop.f32.mrf.mxu3 }
 0x2ff   : > { %v1058_v41 = vadd.f32 %v1051_v23, %v1001_v44  ;;  %v1014_v2 = vpop.f32.mrf.mxu0  ;;  %v1027_v24 = vpop.f32.mrf.mxu1  ;;  %v1057_v40 = vadd.f32 %v1038_v54, %v1000_v52 }
 0x301   : > { %v2563_v25 = vmul.f32 -1.442695, %v1058_v41 }
 0x302   : > { %v2890_v29 = vpop.eup %2889 }
 0x303   : > { %v2892_v37 = vpop.eup %2891  ;;  %v1062_v38 = vadd.f32 1.0, %v2890_v29  ;;  %2893 = vpow2.f32 %v2563_v25 }
 0x304   : > { %v1081_v16 = vadd.f32 1.0, %v2892_v37 }
 0x305   : > { %2895 = vrcp.f32 %v1062_v38  ;;  %v1074_v4 = vand.u32 2147483648, %v1062_v38  ;;  %v1072_v12 = vand.u32 2147483647, %v1062_v38  ;;  %vm1068_vm2 = vweird.f32 %v1062_v38 }
 0x306   : > { %2897 = vrcp.f32 %v1081_v16  ;;  %v1040_v33 = vpop.f32.mrf.mxu2  ;;  %v1053_v34 = vpop.f32.mrf.mxu3  ;;  %v1093_v7 = vand.u32 2147483648, %v1081_v16  ;;  %v1091_v23 = vand.u32 2147483647, %v1081_v16  ;;  %vm1087_vm4 = vweird.f32 %v1081_v16 }
 0x307   : > { %v1075_v54 = vor.u32 1.1754944e-38, %v1074_v4  ;;  %vm1073_vm5 = vcmp.eq.f32.partialorder %v1072_v12, 8.507059e+37 }
 0x308   : > { %v1094_v29 = vor.u32 1.1754944e-38, %v1093_v7  ;;  %vm1092_vm7 = vcmp.eq.f32.partialorder %v1091_v23, 8.507059e+37 }
 0x309   : > { %v2894_v53 = vpop.eup %2893 }
 0x30a   : > { %v1101_v57 = vadd.f32 1.0, %v2894_v53 }
 0x30b   : > { %v2896_v0 = vpop.eup %2895 }
 0x30c   : > { %v2898_v36 = vpop.eup %2897  ;;  %v1064_v13 = vmul.f32 %v2896_v0, %v1062_v38  ;;  %2899 = vrcp.f32 %v1101_v57  ;;  %vm1069_vm0 = vweird.f32 %v2896_v0  ;;  %vm1107_vm10 = vweird.f32 %v1101_v57 }
 0x30d   : > { %v1083_v17 = vmul.f32 %v2898_v36, %v1081_v16  ;;  %2901 = vtanh.f32 %v1057_v40  ;;  %vm1088_vm1 = vweird.f32 %v2898_v36  ;;  %vm1070_vm3 = vmor %vm1068_vm2, %vm1069_vm0  ;;  %v1113_v16 = vand.u32 2147483648, %v1101_v57 }
 0x30e   : > { %v1065_v63 = vsub.f32 1.0, %v1064_v13  ;;  %vm1089_vm6 = vmor %vm1087_vm4, %vm1088_vm1  ;;  %v1127_v13 = vpop.permute.xlu1 %1126  ;;  %v1111_v4 = vand.u32 2147483647, %v1101_v57 }
 0x30f   : > { %v1084_v61 = vsub.f32 1.0, %v1083_v17  ;;  %vm1128_vm8 = vcmp.eq.s32.totalorder %v1127_v13, 1 }
 0x310   : > { %v1066_v62 = vmul.f32 %v2896_v0, %v1065_v63  ;;  %vm1112_vm12 = vcmp.eq.f32.partialorder %v1111_v4, 8.507059e+37 }
 0x311   : > { %v1085_v44 = vmul.f32 %v2898_v36, %v1084_v61 }
 0x312   : > { %v2900_v8 = vpop.eup %2899  ;;  %v1067_v41 = vadd.f32 %v2896_v0, %v1066_v62  ;;  %v1114_v62 = vor.u32 1.1754944e-38, %v1113_v16 }
 0x313   : > { %v1103_v2 = vmul.f32 %v2900_v8, %v1101_v57  ;;  %v1086_v24 = vadd.f32 %v2898_v36, %v1085_v44  ;;  %v2902_v37 = vpop.eup %2901  ;;  %vm1108_vm9 = vweird.f32 %v2900_v8 }
 0x314   : > { %v1071_v25 = vsel %vm1070_vm3, %v2896_v0, %v1067_v41  ;;  %vm1109_vm11 = vmor %vm1107_vm10, %vm1108_vm9 }
 0x315   : > { %v1076_v33 = vsel %vm1073_vm5, %v1075_v54, %v1071_v25  ;;  %v1104_v34 = vsub.f32 1.0, %v1103_v2  ;;  %v1090_v52 = vsel %vm1089_vm6, %v2898_v36, %v1086_v24  ;;  %v1141_v25 = vld [vmem:[%s1139_s2 + $0x8] sm:$0xff] }
 0x316   : > { %v1118_v53 = vmul.f32 %v2902_v37, %v1076_v33  ;;  %v1095_v40 = vsel %vm1092_vm7, %v1094_v29, %v1090_v52  ;;  %v1145_v33 = vunpack.c.h.bf16 %v1141_v25 }
 0x317   : > { %v1105_v17 = vmul.f32 %v2900_v8, %v1104_v34  ;;  %v1117_v38 = vmul.f32 %v1095_v40, %v3541_v20 }
 0x319   : > { %v1119_v63 = vadd.f32 %v1118_v53, %v1117_v38  ;;  %v1106_v61 = vadd.f32 %v2900_v8, %v1105_v17 }
 0x31b   : > { %2903 = vtanh.f32 %v1119_v63  ;;  %v3586_v0 = vsel %vm1128_vm8, %v1119_v63, %v3541_v20  ;;  %v1110_v36 = vsel %vm1109_vm11, %v2900_v8, %v1106_v61  ;;  %v1140_v20 = vld [vmem:[%s1139_s2] sm:$0xff] }
 0x31c   : > { %v1115_v7 = vsel %vm1112_vm12, %v1114_v62, %v1110_v36  ;;  %v1143_v57 = vunpack.c.h.bf16 %v1140_v20  ;;  %v1144_v62 = vunpack.c.l.bf16 %v1141_v25 }
 0x321   : > { %v2904_v12 = vpop.eup %2903 }
 0x322   : > { %v1121_v44 = vmul.f32 %v2904_v12, %v1115_v7  ;;  %v1410_v12 = vstv %s3629_s8  ;;  %s3806_s8 = smov (!%p1276_p5, %s3629_s8), 7 }
 0x323   : > { %vm1411_vm13 = vcmp.gt.s32.totalorder %v3237_v1, %v1410_v12  ;;  %s2570_s21 = sshll.u32 %s3806_s8, 3 }
 0x324   : > { %v3590_v23 = vsel %vm1128_vm8, %v1121_v44, %v3545_v35  ;;  %v1142_v35 = vunpack.c.l.bf16 %v1140_v20  ;;  %v1554_v20 = vstv %s3632_s5  ;;  %s1279_s24 = sshra.s32 %s2570_s21, 3  ;;  %s3808_s5 = smov (!%p1420_p6, %s3632_s5), 7 }
 0x325   : > { %v1146_v41 = vpack.c.bf16 %v3590_v23, %v3590_v23  ;;  %vm1555_vm14 = vcmp.gt.s32.totalorder %v3237_v1, %v1554_v20  ;;  %s2796_s25 = sshll.u32 %s1279_s24, 4  ;;  %s2576_s27 = sshll.u32 %s3808_s5, 3 }
 0x326   : > { %s1283_s3 = scalar_lea.vmem [#allocation2], %s2796_s25  ;;  %s1423_s28 = sshra.s32 %s2576_s27, 3 }
 0x327   : > { %1155 = vmatmul.bf16.vlgmr.msrb.gmra.mxu0 %v1146_v41  ;;  %1168 = vmatmul.bf16.vlgmr.msrb.gmra.mxu1 %v1146_v41  ;;  %s2797_s29 = sshll.u32 %s1423_s28, 4 }
 0x328   : > { %1181 = vmatmul.bf16.vlgmr.msrb.gmra.mxu2 %v1146_v41  ;;  %1194 = vmatmul.bf16.vlgmr.msrb.gmra.mxu3 %v1146_v41  ;;  %v1412_v41 = vsel %vm1411_vm13, 1, %v3162_v18  ;;  %s1427_s30 = scalar_lea.vmem [#allocation2], %s2797_s29 }
 0x329   : > { %1435 = vmatpush.bf16.msrb.mxu0 %v3290_v47  ;;  %1448 = vmatpush.bf16.msrb.mxu1 %v3292_v5 }
 0x32a   : > { %1461 = vmatpush.bf16.msrb.mxu2 %v3305_v19  ;;  %1474 = vmatpush.bf16.msrb.mxu3 %v3294_v6 }
 0x32b   : > { %1414 = vperm.xlu2 %2856, %v1412_v41  }
 0x32d   : > { %1436 = vmatpush.bf16.msrb.mxu0 %v3297_v10  ;;  %1449 = vmatpush.bf16.msrb.mxu1 %v3301_v14 }
 0x32e   : > { %1462 = vmatpush.bf16.msrb.mxu2 %v3317_v32  ;;  %1475 = vmatpush.bf16.msrb.mxu3 %v3303_v15 }
 0x331   : > { %1437 = vmatpush.bf16.msrb.mxu0 %v3309_v26  ;;  %1450 = vmatpush.bf16.msrb.mxu1 %v3313_v30 }
 0x332   : > { %1463 = vmatpush.bf16.msrb.mxu2 %v3323_v42  ;;  %1476 = vmatpush.bf16.msrb.mxu3 %v3315_v31 }
 0x335   : > { %1438 = vmatpush.bf16.msrb.mxu0 %v3321_v39  ;;  %1451 = vmatpush.bf16.msrb.mxu1 %v3327_v45 }
 0x336   : > { %1464 = vmatpush.bf16.msrb.mxu2 %v3335_v56  ;;  %1477 = vmatpush.bf16.msrb.mxu3 %v3329_v46 }
 0x339   : > { %1439 = vmatpush.bf16.msrb.mxu0 %v3333_v55  ;;  %1452 = vmatpush.bf16.msrb.mxu1 %v3339_v59 }
 0x33a   : > { %1465 = vmatpush.bf16.msrb.mxu2 %v3347_v3  ;;  %1478 = vmatpush.bf16.msrb.mxu3 %v3341_v60 }
 0x33d   : > { %1440 = vmatpush.bf16.msrb.mxu0 %v3345_v48  ;;  %1453 = vmatpush.bf16.msrb.mxu1 %v3351_v9 }
 0x33e   : > { %1466 = vmatpush.bf16.msrb.mxu2 %v3369_v22  ;;  %1479 = vmatpush.bf16.msrb.mxu3 %v3353_v11 }
 0x341   : > { %1441 = vmatpush.bf16.msrb.mxu0 %v3367_v21  ;;  %1454 = vmatpush.bf16.msrb.mxu1 %v3374_v27 }
 0x342   : > { %1467 = vmatpush.bf16.msrb.mxu2 %v3386_v49  ;;  %1480 = vmatpush.bf16.msrb.mxu3 %v3376_v28 }
 0x345   : > { %1442 = vmatpush.bf16.msrb.mxu0 %v3382_v43  ;;  %1455 = vmatpush.bf16.msrb.mxu1 %v3391_v50 }
 0x346   : > { %1468 = vmatpush.bf16.msrb.mxu2 %v3405_v58  ;;  %1481 = vmatpush.bf16.msrb.mxu3 %v3393_v51 }
 0x3a4   : > { %v1156_v8 = vpop.f32.mrf.mxu0  ;;  %v1169_v54 = vpop.f32.mrf.mxu1 }
 0x3a5   : > { %v1199_v2 = vadd.f32 %v1156_v8, %v1142_v35  ;;  %v1200_v24 = vadd.f32 %v1169_v54, %v1143_v57 }
 0x3a7   : > { %v2567_v29 = vmul.f32 -1.442695, %v1199_v2  ;;  %v2568_v37 = vmul.f32 -1.442695, %v1200_v24 }
 0x3a9   : > { %2905 = vpow2.f32 %v2567_v29 }
 0x3aa   : > { %2907 = vpow2.f32 %v2568_v37 }
 0x3ab   : > { %v1182_v34 = vpop.f32.mrf.mxu2  ;;  %v1195_v52 = vpop.f32.mrf.mxu3 }
 0x3ac   : > { %v1202_v53 = vadd.f32 %v1195_v52, %v1145_v33  ;;  %v1158_v40 = vpop.f32.mrf.mxu0  ;;  %v1171_v13 = vpop.f32.mrf.mxu1  ;;  %v1201_v57 = vadd.f32 %v1182_v34, %v1144_v62 }
 0x3ae   : > { %v2569_v17 = vmul.f32 -1.442695, %v1202_v53  ;;  %v1556_v53 = vsel %vm1555_vm14, 1, %v3162_v18 }
 0x3af   : > { %v2906_v38 = vpop.eup %2905  ;;  %1558 = vperm.xlu2 %2856, %v1556_v53  }
 0x3b0   : > { %v2908_v63 = vpop.eup %2907  ;;  %v1206_v61 = vadd.f32 1.0, %v2906_v38  ;;  %2909 = vpow2.f32 %v2569_v17 }
 0x3b1   : > { %v1225_v16 = vadd.f32 1.0, %v2908_v63 }
 0x3b2   : > { %2911 = vrcp.f32 %v1206_v61  ;;  %v1216_v29 = vand.u32 2147483647, %v1206_v61  ;;  %v1218_v37 = vand.u32 2147483648, %v1206_v61  ;;  %vm1212_vm1 = vweird.f32 %v1206_v61 }
 0x3b3   : > { %2913 = vrcp.f32 %v1225_v16  ;;  %v1184_v4 = vpop.f32.mrf.mxu2  ;;  %v1197_v36 = vpop.f32.mrf.mxu3  ;;  %v1237_v33 = vand.u32 2147483648, %v1225_v16  ;;  %v1235_v34 = vand.u32 2147483647, %v1225_v16  ;;  %vm1231_vm2 = vweird.f32 %v1225_v16 }
 0x3b4   : > { %v1219_v38 = vor.u32 1.1754944e-38, %v1218_v37  ;;  %vm1217_vm5 = vcmp.eq.f32.partialorder %v1216_v29, 8.507059e+37 }
 0x3b5   : > { %v1238_v36 = vor.u32 1.1754944e-38, %v1237_v33  ;;  %vm1236_vm6 = vcmp.eq.f32.partialorder %v1235_v34, 8.507059e+37 }
 0x3b6   : > { %v2910_v7 = vpop.eup %2909 }
 0x3b7   : > { %v1245_v44 = vadd.f32 1.0, %v2910_v7 }
 0x3b8   : > { %v2912_v35 = vpop.eup %2911 }
 0x3b9   : > { %v2914_v8 = vpop.eup %2913  ;;  %v1208_v54 = vmul.f32 %v2912_v35, %v1206_v61  ;;  %2915 = vrcp.f32 %v1245_v44  ;;  %vm1213_vm15 = vweird.f32 %v2912_v35  ;;  %vm1251_vm9 = vweird.f32 %v1245_v44 }
 0x3ba   : > { %v1227_v2 = vmul.f32 %v2914_v8, %v1225_v16  ;;  %2917 = vtanh.f32 %v1201_v57  ;;  %vm1232_vm0 = vweird.f32 %v2914_v8  ;;  %vm1214_vm3 = vmor %vm1212_vm1, %vm1213_vm15  ;;  %v1271_v16 = vpop.permute.xlu1 %1270  ;;  %v1255_v29 = vand.u32 2147483647, %v1245_v44 }
 0x3bb   : > { %v1209_v24 = vsub.f32 1.0, %v1208_v54  ;;  %vm1233_vm4 = vmor %vm1231_vm2, %vm1232_vm0  ;;  %vm1272_vm7 = vcmp.eq.s32.totalorder %v1271_v16, 1 }
 0x3bc   : > { %v1228_v25 = vsub.f32 1.0, %v1227_v2  ;;  %vm1256_vm11 = vcmp.eq.f32.partialorder %v1255_v29, 8.507059e+37 }
 0x3bd   : > { %v1210_v52 = vmul.f32 %v2912_v35, %v1209_v24 }
 0x3be   : > { %v1229_v40 = vmul.f32 %v2914_v8, %v1228_v25  ;;  %v1257_v25 = vand.u32 2147483648, %v1245_v44 }
 0x3bf   : > { %v2916_v13 = vpop.eup %2915  ;;  %v1211_v17 = vadd.f32 %v2912_v35, %v1210_v52 }
 0x3c0   : > { %v1230_v63 = vadd.f32 %v2914_v8, %v1229_v40  ;;  %v1247_v4 = vmul.f32 %v2916_v13, %v1245_v44  ;;  %v2918_v12 = vpop.eup %2917  ;;  %vm1252_vm8 = vweird.f32 %v2916_v13  ;;  %v1258_v37 = vor.u32 1.1754944e-38, %v1257_v25 }
 0x3c1   : > { %v1215_v62 = vsel %vm1214_vm3, %v2912_v35, %v1211_v17  ;;  %vm1253_vm10 = vmor %vm1251_vm9, %vm1252_vm8 }
 0x3c2   : > { %v1220_v7 = vsel %vm1217_vm5, %v1219_v38, %v1215_v62  ;;  %v1234_v41 = vsel %vm1233_vm4, %v2914_v8, %v1230_v63  ;;  %v1248_v18 = vsub.f32 1.0, %v1247_v4  ;;  %v1285_v4 = vld [vmem:[%s1283_s3 + $0x8] sm:$0xff] }
 0x3c3   : > { %v1239_v20 = vsel %vm1236_vm6, %v1238_v36, %v1234_v41  ;;  %v1262_v57 = vmul.f32 %v2918_v12, %v1220_v7  ;;  %v1289_v12 = vunpack.c.h.bf16 %v1285_v4 }
 0x3c4   : > { %v1261_v54 = vmul.f32 %v1239_v20, %v3586_v0  ;;  %v1249_v61 = vmul.f32 %v2916_v13, %v1248_v18 }
 0x3c6   : > { %v1263_v2 = vadd.f32 %v1262_v57, %v1261_v54  ;;  %v1250_v24 = vadd.f32 %v2916_v13, %v1249_v61 }
 0x3c8   : > { %2919 = vtanh.f32 %v1263_v2  ;;  %v3642_v35 = vsel %vm1272_vm7, %v1263_v2, %v3586_v0  ;;  %v1254_v8 = vsel %vm1253_vm10, %v2916_v13, %v1250_v24  ;;  %v1284_v0 = vld [vmem:[%s1283_s3] sm:$0xff] }
 0x3c9   : > { %v1259_v52 = vsel %vm1256_vm11, %v1258_v37, %v1254_v8  ;;  %v1287_v44 = vunpack.c.h.bf16 %v1284_v0  ;;  %v1288_v8 = vunpack.c.l.bf16 %v1285_v4 }
 0x3ce   : > { %v2920_v33 = vpop.eup %2919 }
 0x3cf   : > { %v1265_v53 = vmul.f32 %v2920_v33, %v1259_v52 }
 0x3d1   : > { %v3645_v40 = vsel %vm1272_vm7, %v1265_v53, %v3590_v23  ;;  %v1286_v23 = vunpack.c.l.bf16 %v1284_v0 }
 0x3d2   : > { %v1290_v34 = vpack.c.bf16 %v3645_v40, %v3645_v40 }
 0x3d4   : > { %1299 = vmatmul.bf16.vlgmr.msra.gmra.mxu0 %v1290_v34  ;;  %1312 = vmatmul.bf16.vlgmr.msra.gmra.mxu1 %v1290_v34 }
 0x3d5   : > { %1325 = vmatmul.bf16.vlgmr.msra.gmra.mxu2 %v1290_v34  ;;  %1338 = vmatmul.bf16.vlgmr.msra.gmra.mxu3 %v1290_v34 }
 0x3d6   : > { %1579 = vmatpush.bf16.msra.mxu0 %v3290_v47  ;;  %1592 = vmatpush.bf16.msra.mxu1 %v3292_v5 }
 0x3d7   : > { %1605 = vmatpush.bf16.msra.mxu2 %v3305_v19  ;;  %1618 = vmatpush.bf16.msra.mxu3 %v3294_v6 }
 0x3da   : > { %1580 = vmatpush.bf16.msra.mxu0 %v3297_v10  ;;  %1593 = vmatpush.bf16.msra.mxu1 %v3301_v14 }
 0x3db   : > { %1606 = vmatpush.bf16.msra.mxu2 %v3317_v32  ;;  %1619 = vmatpush.bf16.msra.mxu3 %v3303_v15 }
 0x3de   : > { %1581 = vmatpush.bf16.msra.mxu0 %v3309_v26  ;;  %1594 = vmatpush.bf16.msra.mxu1 %v3313_v30 }
 0x3df   : > { %1607 = vmatpush.bf16.msra.mxu2 %v3323_v42  ;;  %1620 = vmatpush.bf16.msra.mxu3 %v3315_v31 }
 0x3e2   : > { %1582 = vmatpush.bf16.msra.mxu0 %v3321_v39  ;;  %1595 = vmatpush.bf16.msra.mxu1 %v3327_v45 }
 0x3e3   : > { %1608 = vmatpush.bf16.msra.mxu2 %v3335_v56  ;;  %1621 = vmatpush.bf16.msra.mxu3 %v3329_v46 }
 0x3e6   : > { %1583 = vmatpush.bf16.msra.mxu0 %v3333_v55  ;;  %1596 = vmatpush.bf16.msra.mxu1 %v3339_v59 }
 0x3e7   : > { %1609 = vmatpush.bf16.msra.mxu2 %v3347_v3  ;;  %1622 = vmatpush.bf16.msra.mxu3 %v3341_v60 }
 0x3ea   : > { %1584 = vmatpush.bf16.msra.mxu0 %v3345_v48  ;;  %1597 = vmatpush.bf16.msra.mxu1 %v3351_v9 }
 0x3eb   : > { %1610 = vmatpush.bf16.msra.mxu2 %v3369_v22  ;;  %1623 = vmatpush.bf16.msra.mxu3 %v3353_v11 }
 0x3ee   : > { %1585 = vmatpush.bf16.msra.mxu0 %v3367_v21  ;;  %1598 = vmatpush.bf16.msra.mxu1 %v3374_v27 }
 0x3ef   : > { %1611 = vmatpush.bf16.msra.mxu2 %v3386_v49  ;;  %1624 = vmatpush.bf16.msra.mxu3 %v3376_v28 }
 0x3f2   : > { %1586 = vmatpush.bf16.msra.mxu0 %v3382_v43  ;;  %1599 = vmatpush.bf16.msra.mxu1 %v3391_v50 }
 0x3f3   : > { %1612 = vmatpush.bf16.msra.mxu2 %v3405_v58  ;;  %1625 = vmatpush.bf16.msra.mxu3 %v3393_v51 }
 0x451   : > { %v1300_v13 = vpop.f32.mrf.mxu0  ;;  %v1313_v17 = vpop.f32.mrf.mxu1 }
 0x452   : > { %v1343_v38 = vadd.f32 %v1300_v13, %v1286_v23  ;;  %v1344_v63 = vadd.f32 %v1313_v17, %v1287_v44 }
 0x454   : > { %v2573_v36 = vmul.f32 -1.442695, %v1343_v38  ;;  %v2574_v62 = vmul.f32 -1.442695, %v1344_v63 }
 0x456   : > { %2921 = vpow2.f32 %v2573_v36 }
 0x457   : > { %2923 = vpow2.f32 %v2574_v62 }
 0x458   : > { %v1326_v7 = vpop.f32.mrf.mxu2  ;;  %v1339_v41 = vpop.f32.mrf.mxu3 }
 0x459   : > { %v1346_v18 = vadd.f32 %v1339_v41, %v1289_v12  ;;  %v1302_v20 = vpop.f32.mrf.mxu0  ;;  %v1315_v57 = vpop.f32.mrf.mxu1  ;;  %v1345_v53 = vadd.f32 %v1326_v7, %v1288_v8 }
 0x45b   : > { %v2575_v54 = vmul.f32 -1.442695, %v1346_v18 }
 0x45c   : > { %v2922_v61 = vpop.eup %2921 }
 0x45d   : > { %v2924_v16 = vpop.eup %2923  ;;  %v1350_v2 = vadd.f32 1.0, %v2922_v61  ;;  %2925 = vpow2.f32 %v2575_v54 }
 0x45e   : > { %v1369_v24 = vadd.f32 1.0, %v2924_v16 }
 0x45f   : > { %2927 = vrcp.f32 %v1350_v2  ;;  %v1362_v17 = vand.u32 2147483648, %v1350_v2  ;;  %v1360_v63 = vand.u32 2147483647, %v1350_v2  ;;  %vm1356_vm14 = vweird.f32 %v1350_v2 }
 0x460   : > { %2929 = vrcp.f32 %v1369_v24  ;;  %v1328_v25 = vpop.f32.mrf.mxu2  ;;  %v1341_v29 = vpop.f32.mrf.mxu3  ;;  %v1381_v36 = vand.u32 2147483648, %v1369_v24  ;;  %v1379_v12 = vand.u32 2147483647, %v1369_v24  ;;  %vm1375_vm0 = vweird.f32 %v1369_v24 }
 0x461   : > { %v1363_v7 = vor.u32 1.1754944e-38, %v1362_v17  ;;  %vm1361_vm1 = vcmp.eq.f32.partialorder %v1360_v63, 8.507059e+37  ;;  %v1415_v29 = vpop.permute.xlu2 %1414 }
 0x462   : > { %v1382_v54 = vor.u32 1.1754944e-38, %v1381_v36  ;;  %vm1380_vm3 = vcmp.eq.f32.partialorder %v1379_v12, 8.507059e+37  ;;  %vm1416_vm4 = vcmp.eq.s32.totalorder %v1415_v29, 1 }
 0x463   : > { %v2926_v37 = vpop.eup %2925 }
 0x464   : > { %v1389_v33 = vadd.f32 1.0, %v2926_v37 }
 0x465   : > { %v2928_v52 = vpop.eup %2927 }
 0x466   : > { %v2930_v34 = vpop.eup %2929  ;;  %v1352_v0 = vmul.f32 %v2928_v52, %v1350_v2  ;;  %2931 = vrcp.f32 %v1389_v33  ;;  %vm1357_vm12 = vweird.f32 %v2928_v52  ;;  %vm1395_vm6 = vweird.f32 %v1389_v33 }
 0x467   : > { %v1371_v23 = vmul.f32 %v2930_v34, %v1369_v24  ;;  %2933 = vtanh.f32 %v1345_v53  ;;  %vm1376_vm13 = vweird.f32 %v2930_v34  ;;  %vm1358_vm15 = vmor %vm1356_vm14, %vm1357_vm12  ;;  %v1401_v24 = vand.u32 2147483648, %v1389_v33 }
 0x468   : > { %v1353_v44 = vsub.f32 1.0, %v1352_v0  ;;  %vm1377_vm2 = vmor %vm1375_vm0, %vm1376_vm13 }
 0x469   : > { %v1372_v13 = vsub.f32 1.0, %v1371_v23  ;;  %v1402_v17 = vor.u32 1.1754944e-38, %v1401_v24 }
 0x46a   : > { %v1354_v38 = vmul.f32 %v2928_v52, %v1353_v44 }
 0x46b   : > { %v1373_v62 = vmul.f32 %v2930_v34, %v1372_v13  ;;  %v1399_v13 = vand.u32 2147483647, %v1389_v33 }
 0x46c   : > { %v2932_v4 = vpop.eup %2931  ;;  %v1355_v41 = vadd.f32 %v2928_v52, %v1354_v38 }
 0x46d   : > { %v1391_v18 = vmul.f32 %v2932_v4, %v1389_v33  ;;  %v1374_v20 = vadd.f32 %v2930_v34, %v1373_v62  ;;  %v2934_v61 = vpop.eup %2933  ;;  %vm1396_vm5 = vweird.f32 %v2932_v4  ;;  %vm1400_vm8 = vcmp.eq.f32.partialorder %v1399_v13, 8.507059e+37 }
 0x46e   : > { %v1359_v57 = vsel %vm1358_vm15, %v2928_v52, %v1355_v41  ;;  %vm1397_vm7 = vmor %vm1395_vm6, %vm1396_vm5 }
 0x46f   : > { %v1364_v16 = vsel %vm1361_vm1, %v1363_v7, %v1359_v57  ;;  %v1392_v25 = vsub.f32 1.0, %v1391_v18  ;;  %v1378_v8 = vsel %vm1377_vm2, %v2930_v34, %v1374_v20 }
 0x470   : > { %v1406_v37 = vmul.f32 %v2934_v61, %v1364_v16  ;;  %v1383_v53 = vsel %vm1380_vm3, %v1382_v54, %v1378_v8 }
 0x471   : > { %v1393_v0 = vmul.f32 %v2932_v4, %v1392_v25  ;;  %v1405_v2 = vmul.f32 %v1383_v53, %v3642_v35 }
 0x473   : > { %v1407_v23 = vadd.f32 %v1406_v37, %v1405_v2  ;;  %v1394_v44 = vadd.f32 %v2932_v4, %v1393_v0 }
 0x475   : > { %2935 = vtanh.f32 %v1407_v23  ;;  %v3686_v52 = vsel %vm1416_vm4, %v1407_v23, %v3642_v35  ;;  %v1398_v34 = vsel %vm1397_vm7, %v2932_v4, %v1394_v44  ;;  %v1559_v44 = vpop.permute.xlu2 %1558 }
 0x476   : > { %v1403_v63 = vsel %vm1400_vm8, %v1402_v17, %v1398_v34  ;;  %vm1560_vm1 = vcmp.eq.s32.totalorder %v1559_v44, 1 }
 0x47b   : > { %v2936_v38 = vpop.eup %2935 }
 0x47c   : > { %v1409_v36 = vmul.f32 %v2936_v38, %v1403_v63 }
 0x47e   : > { %v3690_v62 = vsel %vm1416_vm4, %v1409_v36, %v3645_v40 }
 0x47f   : > { %v1434_v12 = vpack.c.bf16 %v3690_v62, %v3690_v62 }
 0x481   : > { %1443 = vmatmul.bf16.vlgmr.msrb.gmra.mxu0 %v1434_v12  ;;  %1456 = vmatmul.bf16.vlgmr.msrb.gmra.mxu1 %v1434_v12 }
 0x482   : > { %1469 = vmatmul.bf16.vlgmr.msrb.gmra.mxu2 %v1434_v12  ;;  %1482 = vmatmul.bf16.vlgmr.msrb.gmra.mxu3 %v1434_v12 }
 0x483   : > { %1723 = vmatpush.bf16.msrb.mxu0 %v3290_v47  ;;  %1736 = vmatpush.bf16.msrb.mxu1 %v3292_v5  ;;  %v1428_v47 = vld [vmem:[%s1427_s30] sm:$0xff] }
 0x484   : > { %1749 = vmatpush.bf16.msrb.mxu2 %v3305_v19  ;;  %1762 = vmatpush.bf16.msrb.mxu3 %v3294_v6  ;;  %v1430_v5 = vunpack.c.l.bf16 %v1428_v47  ;;  %v1431_v6 = vunpack.c.h.bf16 %v1428_v47 }
 0x487   : > { %1724 = vmatpush.bf16.msrb.mxu0 %v3297_v10  ;;  %1737 = vmatpush.bf16.msrb.mxu1 %v3301_v14 }
 0x488   : > { %1750 = vmatpush.bf16.msrb.mxu2 %v3317_v32  ;;  %1763 = vmatpush.bf16.msrb.mxu3 %v3303_v15 }
 0x48b   : > { %1725 = vmatpush.bf16.msrb.mxu0 %v3309_v26  ;;  %1738 = vmatpush.bf16.msrb.mxu1 %v3313_v30  ;;  %v1429_v26 = vld [vmem:[%s1427_s30 + $0x8] sm:$0xff] }
 0x48c   : > { %1751 = vmatpush.bf16.msrb.mxu2 %v3323_v42  ;;  %1764 = vmatpush.bf16.msrb.mxu3 %v3315_v31  ;;  %v1433_v32 = vunpack.c.h.bf16 %v1429_v26 }
 0x48f   : > { %1726 = vmatpush.bf16.msrb.mxu0 %v3321_v39  ;;  %1739 = vmatpush.bf16.msrb.mxu1 %v3327_v45 }
 0x490   : > { %1752 = vmatpush.bf16.msrb.mxu2 %v3335_v56  ;;  %1765 = vmatpush.bf16.msrb.mxu3 %v3329_v46 }
 0x493   : > { %1727 = vmatpush.bf16.msrb.mxu0 %v3333_v55  ;;  %1740 = vmatpush.bf16.msrb.mxu1 %v3339_v59 }
 0x494   : > { %1753 = vmatpush.bf16.msrb.mxu2 %v3347_v3  ;;  %1766 = vmatpush.bf16.msrb.mxu3 %v3341_v60 }
 0x497   : > { %1728 = vmatpush.bf16.msrb.mxu0 %v3345_v48  ;;  %1741 = vmatpush.bf16.msrb.mxu1 %v3351_v9 }
 0x498   : > { %1754 = vmatpush.bf16.msrb.mxu2 %v3369_v22  ;;  %1767 = vmatpush.bf16.msrb.mxu3 %v3353_v11 }
 0x49b   : > { %1729 = vmatpush.bf16.msrb.mxu0 %v3367_v21  ;;  %1742 = vmatpush.bf16.msrb.mxu1 %v3374_v27  ;;  %v1432_v21 = vunpack.c.l.bf16 %v1429_v26 }
 0x49c   : > { %1755 = vmatpush.bf16.msrb.mxu2 %v3386_v49  ;;  %1768 = vmatpush.bf16.msrb.mxu3 %v3376_v28 }
 0x49f   : > { %1730 = vmatpush.bf16.msrb.mxu0 %v3382_v43  ;;  %1743 = vmatpush.bf16.msrb.mxu1 %v3391_v50 }
 0x4a0   : > { %1756 = vmatpush.bf16.msrb.mxu2 %v3405_v58  ;;  %1769 = vmatpush.bf16.msrb.mxu3 %v3393_v51 }
 0x4fe   : > { %v1444_v10 = vpop.f32.mrf.mxu0  ;;  %v1457_v14 = vpop.f32.mrf.mxu1 }
 0x4ff   : > { %v1487_v15 = vadd.f32 %v1444_v10, %v1430_v5  ;;  %v1488_v19 = vadd.f32 %v1457_v14, %v1431_v6 }
 0x501   : > { %v2579_v30 = vmul.f32 -1.442695, %v1487_v15  ;;  %v2580_v31 = vmul.f32 -1.442695, %v1488_v19 }
 0x503   : > { %2937 = vpow2.f32 %v2579_v30 }
 0x504   : > { %2939 = vpow2.f32 %v2580_v31 }
 0x505   : > { %v1470_v39 = vpop.f32.mrf.mxu2  ;;  %v1483_v42 = vpop.f32.mrf.mxu3 }
 0x506   : > { %v1490_v45 = vadd.f32 %v1483_v42, %v1433_v32  ;;  %v1446_v46 = vpop.f32.mrf.mxu0  ;;  %v1459_v55 = vpop.f32.mrf.mxu1  ;;  %v1489_v43 = vadd.f32 %v1470_v39, %v1432_v21  ;;  %v1573_v39 = vld [vmem:[%s1571_s13 + $0x8] sm:$0xff] }
 0x507   : > { %v1577_v46 = vunpack.c.h.bf16 %v1573_v39 }
 0x508   : > { %v2581_v56 = vmul.f32 -1.442695, %v1490_v45 }
 0x509   : > { %v2938_v59 = vpop.eup %2937 }
 0x50a   : > { %v2940_v60 = vpop.eup %2939  ;;  %v1494_v48 = vadd.f32 1.0, %v2938_v59  ;;  %2941 = vpow2.f32 %v2581_v56 }
 0x50b   : > { %v1513_v3 = vadd.f32 1.0, %v2940_v60 }
 0x50c   : > { %2943 = vrcp.f32 %v1494_v48  ;;  %v1506_v40 = vand.u32 2147483648, %v1494_v48  ;;  %v1504_v41 = vand.u32 2147483647, %v1494_v48  ;;  %vm1500_vm11 = vweird.f32 %v1494_v48 }
 0x50d   : > { %2945 = vrcp.f32 %v1513_v3  ;;  %v1472_v9 = vpop.f32.mrf.mxu2  ;;  %v1485_v11 = vpop.f32.mrf.mxu3  ;;  %v1525_v33 = vand.u32 2147483648, %v1513_v3  ;;  %v1523_v18 = vand.u32 2147483647, %v1513_v3  ;;  %vm1519_vm12 = vweird.f32 %v1513_v3 }
 0x50e   : > { %v1507_v54 = vor.u32 1.1754944e-38, %v1506_v40  ;;  %vm1505_vm15 = vcmp.eq.f32.partialorder %v1504_v41, 8.507059e+37 }
 0x50f   : > { %v1526_v25 = vor.u32 1.1754944e-38, %v1525_v33  ;;  %vm1524_vm0 = vcmp.eq.f32.partialorder %v1523_v18, 8.507059e+37 }
 0x510   : > { %v2942_v22 = vpop.eup %2941 }
 0x511   : > { %v1533_v27 = vadd.f32 1.0, %v2942_v22 }
 0x512   : > { %v2944_v28 = vpop.eup %2943 }
 0x513   : > { %v2946_v49 = vpop.eup %2945  ;;  %v1496_v50 = vmul.f32 %v2944_v28, %v1494_v48  ;;  %2947 = vrcp.f32 %v1533_v27  ;;  %vm1501_vm9 = vweird.f32 %v2944_v28  ;;  %v1545_v38 = vand.u32 2147483648, %v1533_v27 }
 0x514   : > { %v1515_v51 = vmul.f32 %v2946_v49, %v1513_v3  ;;  %2949 = vtanh.f32 %v1489_v43  ;;  %vm1520_vm10 = vweird.f32 %v2946_v49  ;;  %vm1502_vm13 = vmor %vm1500_vm11, %vm1501_vm9  ;;  %vm1539_vm3 = vweird.f32 %v1533_v27 }
 0x515   : > { %v1497_v58 = vsub.f32 1.0, %v1496_v50  ;;  %vm1521_vm14 = vmor %vm1519_vm12, %vm1520_vm10  ;;  %v1543_v36 = vand.u32 2147483647, %v1533_v27  ;;  %v1546_v47 = vor.u32 1.1754944e-38, %v1545_v38  ;;  %v1576_v43 = vunpack.c.l.bf16 %v1573_v39 }
 0x516   : > { %v1516_v35 = vsub.f32 1.0, %v1515_v51 }
 0x517   : > { %v1498_v4 = vmul.f32 %v2944_v28, %v1497_v58  ;;  %vm1544_vm5 = vcmp.eq.f32.partialorder %v1543_v36, 8.507059e+37 }
 0x518   : > { %v1517_v7 = vmul.f32 %v2946_v49, %v1516_v35 }
 0x519   : > { %v2948_v20 = vpop.eup %2947  ;;  %v1499_v57 = vadd.f32 %v2944_v28, %v1498_v4 }
 0x51a   : > { %v1518_v61 = vadd.f32 %v2946_v49, %v1517_v7  ;;  %v1535_v16 = vmul.f32 %v2948_v20, %v1533_v27  ;;  %v2950_v8 = vpop.eup %2949  ;;  %vm1540_vm2 = vweird.f32 %v2948_v20 }
 0x51b   : > { %v1503_v29 = vsel %vm1502_vm13, %v2944_v28, %v1499_v57  ;;  %vm1541_vm4 = vmor %vm1539_vm3, %vm1540_vm2 }
 0x51c   : > { %v1508_v37 = vsel %vm1505_vm15, %v1507_v54, %v1503_v29  ;;  %v1522_v53 = vsel %vm1521_vm14, %v2946_v49, %v1518_v61  ;;  %v1536_v0 = vsub.f32 1.0, %v1535_v16 }
 0x51d   : > { %v1527_v2 = vsel %vm1524_vm0, %v1526_v25, %v1522_v53  ;;  %v1550_v23 = vmul.f32 %v2950_v8, %v1508_v37 }
 0x51e   : > { %v1549_v24 = vmul.f32 %v1527_v2, %v3686_v52  ;;  %v1537_v13 = vmul.f32 %v2948_v20, %v1536_v0 }
 0x520   : > { %v1551_v34 = vadd.f32 %v1550_v23, %v1549_v24  ;;  %v1538_v17 = vadd.f32 %v2948_v20, %v1537_v13 }
 0x522   : > { %2951 = vtanh.f32 %v1551_v34  ;;  %v3730_v63 = vsel %vm1560_vm1, %v1551_v34, %v3686_v52  ;;  %v1542_v12 = vsel %vm1541_vm4, %v2948_v20, %v1538_v17  ;;  %v1572_v52 = vld [vmem:[%s1571_s13] sm:$0xff]  ;;  %v1703_v17 = vpop.permute.xlu0 %1702 }
 0x523   : > { %v1547_v6 = vsel %vm1544_vm5, %v1546_v47, %v1542_v12  ;;  %v1574_v19 = vunpack.c.l.bf16 %v1572_v52  ;;  %v1575_v26 = vunpack.c.h.bf16 %v1572_v52  ;;  %vm1704_vm14 = vcmp.eq.s32.totalorder %v1703_v17, 1 }
 0x528   : > { %v2952_v5 = vpop.eup %2951 }
 0x529   : > { %v1553_v10 = vmul.f32 %v2952_v5, %v1547_v6 }
 0x52b   : > { %v3733_v14 = vsel %vm1560_vm1, %v1553_v10, %v3690_v62 }
 0x52c   : > { %v1578_v15 = vpack.c.bf16 %v3733_v14, %v3733_v14 }
 0x52e   : > { %1587 = vmatmul.bf16.vlgmr.msra.gmra.mxu0 %v1578_v15  ;;  %1600 = vmatmul.bf16.vlgmr.msra.gmra.mxu1 %v1578_v15 }
 0x52f   : > { %1613 = vmatmul.bf16.vlgmr.msra.gmra.mxu2 %v1578_v15  ;;  %1626 = vmatmul.bf16.vlgmr.msra.gmra.mxu3 %v1578_v15 }
 0x5ab   : > { %v1588_v30 = vpop.f32.mrf.mxu0  ;;  %v1601_v31 = vpop.f32.mrf.mxu1 }
 0x5ac   : > { %v1631_v62 = vadd.f32 %v1588_v30, %v1574_v19  ;;  %v1632_v32 = vadd.f32 %v1601_v31, %v1575_v26 }
 0x5ae   : > { %v2585_v42 = vmul.f32 -1.442695, %v1631_v62  ;;  %v2586_v45 = vmul.f32 -1.442695, %v1632_v32 }
 0x5b0   : > { %2953 = vpow2.f32 %v2585_v42 }
 0x5b1   : > { %2955 = vpow2.f32 %v2586_v45 }
 0x5b2   : > { %v1614_v55 = vpop.f32.mrf.mxu2  ;;  %v1627_v56 = vpop.f32.mrf.mxu3 }
 0x5b3   : > { %v1634_v59 = vadd.f32 %v1627_v56, %v1577_v46  ;;  %v1590_v60 = vpop.f32.mrf.mxu0  ;;  %v1603_v48 = vpop.f32.mrf.mxu1  ;;  %v1633_v58 = vadd.f32 %v1614_v55, %v1576_v43  ;;  %v1717_v55 = vld [vmem:[%s1715_s17 + $0x8] sm:$0xff] }
 0x5b4   : > { %v1721_v60 = vunpack.c.h.bf16 %v1717_v55 }
 0x5b5   : > { %v2587_v3 = vmul.f32 -1.442695, %v1634_v59 }
 0x5b6   : > { %v2954_v9 = vpop.eup %2953 }
 0x5b7   : > { %v2956_v11 = vpop.eup %2955  ;;  %v1638_v21 = vadd.f32 1.0, %v2954_v9  ;;  %2957 = vpow2.f32 %v2587_v3 }
 0x5b8   : > { %v1657_v22 = vadd.f32 1.0, %v2956_v11 }
 0x5b9   : > { %2959 = vrcp.f32 %v1638_v21  ;;  %v1650_v7 = vand.u32 2147483648, %v1638_v21  ;;  %v1648_v57 = vand.u32 2147483647, %v1638_v21  ;;  %vm1644_vm8 = vweird.f32 %v1638_v21 }
 0x5ba   : > { %2961 = vrcp.f32 %v1657_v22  ;;  %v1616_v27 = vpop.f32.mrf.mxu2  ;;  %v1629_v28 = vpop.f32.mrf.mxu3  ;;  %v1669_v18 = vand.u32 2147483648, %v1657_v22  ;;  %v1667_v61 = vand.u32 2147483647, %v1657_v22  ;;  %vm1663_vm9 = vweird.f32 %v1657_v22 }
 0x5bb   : > { %v1651_v29 = vor.u32 1.1754944e-38, %v1650_v7  ;;  %vm1649_vm12 = vcmp.eq.f32.partialorder %v1648_v57, 8.507059e+37 }
 0x5bc   : > { %v1670_v53 = vor.u32 1.1754944e-38, %v1669_v18  ;;  %vm1668_vm13 = vcmp.eq.f32.partialorder %v1667_v61, 8.507059e+37 }
 0x5bd   : > { %v2958_v49 = vpop.eup %2957 }
 0x5be   : > { %v1677_v50 = vadd.f32 1.0, %v2958_v49 }
 0x5bf   : > { %v2960_v51 = vpop.eup %2959 }
 0x5c0   : > { %v2962_v35 = vpop.eup %2961  ;;  %v1640_v40 = vmul.f32 %v2960_v51, %v1638_v21  ;;  %2963 = vrcp.f32 %v1677_v50  ;;  %vm1645_vm6 = vweird.f32 %v2960_v51  ;;  %v1689_v5 = vand.u32 2147483648, %v1677_v50 }
 0x5c1   : > { %v1659_v33 = vmul.f32 %v2962_v35, %v1657_v22  ;;  %2965 = vtanh.f32 %v1633_v58  ;;  %vm1664_vm7 = vweird.f32 %v2962_v35  ;;  %vm1646_vm10 = vmor %vm1644_vm8, %vm1645_vm6  ;;  %vm1683_vm0 = vweird.f32 %v1677_v50 }
 0x5c2   : > { %v1641_v4 = vsub.f32 1.0, %v1640_v40  ;;  %vm1665_vm11 = vmor %vm1663_vm9, %vm1664_vm7  ;;  %v1687_v10 = vand.u32 2147483647, %v1677_v50  ;;  %v1690_v52 = vor.u32 1.1754944e-38, %v1689_v5  ;;  %v1720_v58 = vunpack.c.l.bf16 %v1717_v55 }
 0x5c3   : > { %v1660_v41 = vsub.f32 1.0, %v1659_v33 }
 0x5c4   : > { %v1642_v20 = vmul.f32 %v2960_v51, %v1641_v4  ;;  %vm1688_vm2 = vcmp.eq.f32.partialorder %v1687_v10, 8.507059e+37 }
 0x5c5   : > { %v1661_v54 = vmul.f32 %v2962_v35, %v1660_v41 }
 0x5c6   : > { %v2964_v16 = vpop.eup %2963  ;;  %v1643_v25 = vadd.f32 %v2960_v51, %v1642_v20 }
 0x5c7   : > { %v1662_v8 = vadd.f32 %v2962_v35, %v1661_v54  ;;  %v1679_v37 = vmul.f32 %v2964_v16, %v1677_v50  ;;  %v2966_v2 = vpop.eup %2965  ;;  %vm1684_vm15 = vweird.f32 %v2964_v16 }
 0x5c8   : > { %v1647_v0 = vsel %vm1646_vm10, %v2960_v51, %v1643_v25  ;;  %vm1685_vm1 = vmor %vm1683_vm0, %vm1684_vm15 }
 0x5c9   : > { %v1652_v23 = vsel %vm1649_vm12, %v1651_v29, %v1647_v0  ;;  %v1666_v44 = vsel %vm1665_vm11, %v2962_v35, %v1662_v8  ;;  %v1680_v24 = vsub.f32 1.0, %v1679_v37 }
 0x5ca   : > { %v1671_v13 = vsel %vm1668_vm13, %v1670_v53, %v1666_v44  ;;  %v1694_v34 = vmul.f32 %v2966_v2, %v1652_v23 }
 0x5cb   : > { %v1693_v38 = vmul.f32 %v1671_v13, %v3730_v63  ;;  %v1681_v36 = vmul.f32 %v2964_v16, %v1680_v24 }
 0x5cd   : > { %v1695_v12 = vadd.f32 %v1694_v34, %v1693_v38  ;;  %v1682_v47 = vadd.f32 %v2964_v16, %v1681_v36 }
 0x5cf   : > { %2967 = vtanh.f32 %v1695_v12  ;;  %v3741_v6 = vsel %vm1704_vm14, %v1695_v12, %v3730_v63  ;;  %v1686_v15 = vsel %vm1685_vm1, %v2964_v16, %v1682_v47  ;;  %v1716_v63 = vld [vmem:[%s1715_s17] sm:$0xff]  ;;  %v1847_v47 = vpop.permute.xlu1 %1846 }
 0x5d0   : > { %v1691_v26 = vsel %vm1688_vm2, %v1690_v52, %v1686_v15  ;;  %v1718_v32 = vunpack.c.l.bf16 %v1716_v63  ;;  %v1719_v39 = vunpack.c.h.bf16 %v1716_v63  ;;  %vm1848_vm11 = vcmp.eq.s32.totalorder %v1847_v47, 1 }
 0x5d5   : > { %v2968_v19 = vpop.eup %2967 }
 0x5d6   : > { %v1697_v30 = vmul.f32 %v2968_v19, %v1691_v26 }
 0x5d8   : > { %v3744_v31 = vsel %vm1704_vm14, %v1697_v30, %v3733_v14 }
 0x5d9   : > { %v1722_v62 = vpack.c.bf16 %v3744_v31, %v3744_v31 }
 0x5db   : > { %1731 = vmatmul.bf16.vlgmr.msrb.gmra.mxu0 %v1722_v62  ;;  %1744 = vmatmul.bf16.vlgmr.msrb.gmra.mxu1 %v1722_v62 }
 0x5dc   : > { %1757 = vmatmul.bf16.vlgmr.msrb.gmra.mxu2 %v1722_v62  ;;  %1770 = vmatmul.bf16.vlgmr.msrb.gmra.mxu3 %v1722_v62 }
 0x658   : > { %v1732_v42 = vpop.f32.mrf.mxu0  ;;  %v1745_v45 = vpop.f32.mrf.mxu1 }
 0x659   : > { %v1775_v14 = vadd.f32 %v1732_v42, %v1718_v32  ;;  %v1776_v46 = vadd.f32 %v1745_v45, %v1719_v39 }
 0x65b   : > { %v2591_v56 = vmul.f32 -1.442695, %v1775_v14  ;;  %v2592_v59 = vmul.f32 -1.442695, %v1776_v46 }
 0x65d   : > { %2969 = vpow2.f32 %v2591_v56 }
 0x65e   : > { %2971 = vpow2.f32 %v2592_v59 }
 0x65f   : > { %v1758_v48 = vpop.f32.mrf.mxu2  ;;  %v1771_v3 = vpop.f32.mrf.mxu3 }
 0x660   : > { %v1778_v9 = vadd.f32 %v1771_v3, %v1721_v60  ;;  %v1734_v11 = vpop.f32.mrf.mxu0  ;;  %v1747_v21 = vpop.f32.mrf.mxu1  ;;  %v1777_v4 = vadd.f32 %v1758_v48, %v1720_v58 }
 0x662   : > { %v2593_v22 = vmul.f32 -1.442695, %v1778_v9 }
 0x663   : > { %v2970_v27 = vpop.eup %2969 }
 0x664   : > { %v2972_v28 = vpop.eup %2971  ;;  %v1782_v43 = vadd.f32 1.0, %v2970_v27  ;;  %2973 = vpow2.f32 %v2593_v22 }
 0x665   : > { %v1801_v49 = vadd.f32 1.0, %v2972_v28 }
 0x666   : > { %2975 = vrcp.f32 %v1782_v43  ;;  %v1794_v54 = vand.u32 2147483648, %v1782_v43  ;;  %v1792_v25 = vand.u32 2147483647, %v1782_v43  ;;  %vm1788_vm5 = vweird.f32 %v1782_v43 }
 0x667   : > { %2977 = vrcp.f32 %v1801_v49  ;;  %v1760_v50 = vpop.f32.mrf.mxu2  ;;  %v1773_v51 = vpop.f32.mrf.mxu3  ;;  %v1813_v61 = vand.u32 2147483648, %v1801_v49  ;;  %v1811_v8 = vand.u32 2147483647, %v1801_v49  ;;  %vm1807_vm6 = vweird.f32 %v1801_v49 }
 0x668   : > { %v1795_v0 = vor.u32 1.1754944e-38, %v1794_v54  ;;  %vm1793_vm9 = vcmp.eq.f32.partialorder %v1792_v25, 8.507059e+37 }
 0x669   : > { %v1814_v44 = vor.u32 1.1754944e-38, %v1813_v61  ;;  %vm1812_vm10 = vcmp.eq.f32.partialorder %v1811_v8, 8.507059e+37 }
 0x66a   : > { %v2974_v35 = vpop.eup %2973 }
 0x66b   : > { %v1821_v40 = vadd.f32 1.0, %v2974_v35 }
 0x66c   : > { %v2976_v33 = vpop.eup %2975 }
 0x66d   : > { %v2978_v41 = vpop.eup %2977  ;;  %v1784_v7 = vmul.f32 %v2976_v33, %v1782_v43  ;;  %2979 = vrcp.f32 %v1821_v40  ;;  %vm1789_vm3 = vweird.f32 %v2976_v33  ;;  %v1833_v26 = vand.u32 2147483648, %v1821_v40 }
 0x66e   : > { %v1803_v18 = vmul.f32 %v2978_v41, %v1801_v49  ;;  %2981 = vtanh.f32 %v1777_v4  ;;  %vm1808_vm4 = vweird.f32 %v2978_v41  ;;  %vm1790_vm7 = vmor %vm1788_vm5, %vm1789_vm3  ;;  %vm1827_vm13 = vweird.f32 %v1821_v40 }
 0x66f   : > { %v1785_v20 = vsub.f32 1.0, %v1784_v7  ;;  %vm1809_vm8 = vmor %vm1807_vm6, %vm1808_vm4  ;;  %v1831_v30 = vand.u32 2147483647, %v1821_v40  ;;  %v1834_v63 = vor.u32 1.1754944e-38, %v1833_v26 }
 0x670   : > { %v1804_v57 = vsub.f32 1.0, %v1803_v18 }
 0x671   : > { %v1786_v16 = vmul.f32 %v2976_v33, %v1785_v20  ;;  %vm1832_vm15 = vcmp.eq.f32.partialorder %v1831_v30, 8.507059e+37 }
 0x672   : > { %v1805_v29 = vmul.f32 %v2978_v41, %v1804_v57 }
 0x673   : > { %v2980_v37 = vpop.eup %2979  ;;  %v1787_v53 = vadd.f32 %v2976_v33, %v1786_v16 }
 0x674   : > { %v1806_v2 = vadd.f32 %v2978_v41, %v1805_v29  ;;  %v1823_v23 = vmul.f32 %v2980_v37, %v1821_v40  ;;  %v2982_v13 = vpop.eup %2981  ;;  %vm1828_vm12 = vweird.f32 %v2980_v37 }
 0x675   : > { %v1791_v24 = vsel %vm1790_vm7, %v2976_v33, %v1787_v53  ;;  %vm1829_vm14 = vmor %vm1827_vm13, %vm1828_vm12 }
 0x676   : > { %v1796_v34 = vsel %vm1793_vm9, %v1795_v0, %v1791_v24  ;;  %v1810_v17 = vsel %vm1809_vm8, %v2978_v41, %v1806_v2  ;;  %v1824_v38 = vsub.f32 1.0, %v1823_v23 }
 0x677   : > { %v1815_v36 = vsel %vm1812_vm10, %v1814_v44, %v1810_v17  ;;  %v1838_v12 = vmul.f32 %v2982_v13, %v1796_v34 }
 0x678   : > { %v1837_v5 = vmul.f32 %v1815_v36, %v3741_v6  ;;  %v1825_v10 = vmul.f32 %v2980_v37, %v1824_v38 }
 0x67a   : > { %v1839_v15 = vadd.f32 %v1838_v12, %v1837_v5  ;;  %v1826_v52 = vadd.f32 %v2980_v37, %v1825_v10 }
 0x67c   : > { %2983 = vtanh.f32 %v1839_v15  ;;  %v1850_v19 = vsel %vm1848_vm11, %v1839_v15, %v3741_v6  ;;  %v1830_v62 = vsel %vm1829_vm14, %v2980_v37, %v1826_v52 }
 0x67d   : > { %1852 = vst [vmem:[#allocation4] sm:$0xff] %v1850_v19  ;;  %v1835_v39 = vsel %vm1832_vm15, %v1834_v63, %v1830_v62 }
 0x682   : > { %v2984_v32 = vpop.eup %2983  ;;  %504 = sbr.rel (!%p501_p9) target bundleno = 254 (0xfe), region = 91 }
 0x683   : > { %v1841_v42 = vmul.f32 %v2984_v32, %v1835_v39 }
 0x685   : > { %v1849_v45 = vsel %vm1848_vm11, %v1841_v42, %v3744_v31 }
 0x686   : > { %1851 = vst [vmem:[#allocation3] sm:$0xff] %v1849_v45 }
 0x687 PF:  { %v2652_v6 = vld [vmem:[#allocation13 + $0x70] sm:$0xf]  ;;  %v2815_v14 = vld [vmem:[#allocation13 + $0x74] sm:$0xf0]  ;;  %v2814_v46 = vld [vmem:[#allocation13 + $0x74] sm:$0xf] }
 0x688   :  { %v2653_v55 = vor.u32 %v2815_v14, %v2652_v6  ;;  %v2654_v56 = vld [vmem:[#allocation13 + $0x78] sm:$0xf0]  ;;  %v2644_v59 = vld [vmem:[#allocation13 + $0x60] sm:$0xf]  ;;  %v2813_v60 = vld [vmem:[#allocation13 + $0x64] sm:$0xf0] }
 0x689   :  { %v2657_v48 = vor.u32 %v2814_v46, %v2654_v56  ;;  %v2812_v31 = vld [vmem:[#allocation13 + $0x64] sm:$0xf]  ;;  %v2646_v3 = vld [vmem:[#allocation13 + $0x68] sm:$0xf0]  ;;  %v2645_v9 = vor.u32 %v2813_v60, %v2644_v59  ;;  %v2636_v21 = vld [vmem:[#allocation13 + $0x50] sm:$0xf] }
 0x68a   :  { %1957 = vmatpush.bf16.msra.mxu0 %v2653_v55  ;;  %v2649_v11 = vor.u32 %v2812_v31, %v2646_v3  ;;  %v2811_v22 = vld [vmem:[#allocation13 + $0x54] sm:$0xf0]  ;;  %v2810_v27 = vld [vmem:[#allocation13 + $0x54] sm:$0xf]  ;;  %v2638_v28 = vld [vmem:[#allocation13 + $0x58] sm:$0xf0] }
 0x68b   :  { %1970 = vmatpush.bf16.msra.mxu1 %v2657_v48  ;;  %v2637_v1 = vor.u32 %v2811_v22, %v2636_v21  ;;  %v2641_v43 = vor.u32 %v2810_v27, %v2638_v28  ;;  %v2628_v49 = vld [vmem:[#allocation13 + $0x40] sm:$0xf]  ;;  %v2809_v50 = vld [vmem:[#allocation13 + $0x44] sm:$0xf0]  ;;  %v2808_v51 = vld [vmem:[#allocation13 + $0x44] sm:$0xf] }
 0x68c   :  { %v2630_v58 = vld [vmem:[#allocation13 + $0x48] sm:$0xf0]  ;;  %v2629_v35 = vor.u32 %v2809_v50, %v2628_v49  ;;  %v2620_v33 = vld [vmem:[#allocation13 + $0x30] sm:$0xf]  ;;  %v2807_v4 = vld [vmem:[#allocation13 + $0x34] sm:$0xf0] }
 0x68d   :  { %v2633_v40 = vor.u32 %v2808_v51, %v2630_v58  ;;  %v2806_v41 = vld [vmem:[#allocation13 + $0x34] sm:$0xf]  ;;  %v2622_v7 = vld [vmem:[#allocation13 + $0x38] sm:$0xf0]  ;;  %v2621_v18 = vor.u32 %v2807_v4, %v2620_v33  ;;  %v2612_v57 = vld [vmem:[#allocation13 + $0x20] sm:$0xf] }
 0x68e   :  { %1958 = vmatpush.bf16.msra.mxu0 %v2645_v9  ;;  %v2625_v20 = vor.u32 %v2806_v41, %v2622_v7  ;;  %v2805_v54 = vld [vmem:[#allocation13 + $0x24] sm:$0xf0]  ;;  %v2804_v61 = vld [vmem:[#allocation13 + $0x24] sm:$0xf]  ;;  %v2614_v16 = vld [vmem:[#allocation13 + $0x28] sm:$0xf0] }
 0x68f   :  { %1971 = vmatpush.bf16.msra.mxu1 %v2649_v11  ;;  %v2613_v25 = vor.u32 %v2805_v54, %v2612_v57  ;;  %v2617_v29 = vor.u32 %v2804_v61, %v2614_v16  ;;  %v2604_v8 = vld [vmem:[#allocation13 + $0x10] sm:$0xf]  ;;  %v2803_v37 = vld [vmem:[#allocation13 + $0x14] sm:$0xf0]  ;;  %v2802_v53 = vld [vmem:[#allocation13 + $0x14] sm:$0xf] }
 0x690   :  { %v2606_v0 = vld [vmem:[#allocation13 + $0x18] sm:$0xf0]  ;;  %v2605_v2 = vor.u32 %v2803_v37, %v2604_v8  ;;  %v2596_v44 = vld [vmem:[#allocation13] sm:$0xf]  ;;  %v2801_v24 = vld [vmem:[#allocation13 + $0x4] sm:$0xf0] }
 0x691   :  { %v2609_v23 = vor.u32 %v2802_v53, %v2606_v0  ;;  %v2800_v13 = vld [vmem:[#allocation13 + $0x4] sm:$0xf]  ;;  %v2598_v34 = vld [vmem:[#allocation13 + $0x8] sm:$0xf0]  ;;  %v2597_v17 = vor.u32 %v2801_v24, %v2596_v44  ;;  %v1853_v38 = vld [vmem:[#allocation3] sm:$0xff]  ;;  %s3163_s1 = smov [#allocation16]  }
 0x692   :  { %1959 = vmatpush.bf16.msra.mxu0 %v2637_v1  ;;  %v2601_v36 = vor.u32 %v2800_v13, %v2598_v34  ;;  %v1854_v12 = vpack.c.bf16 %v1853_v38, %v1853_v38  ;;  %v2823_v47 = vld [vmem:[#allocation15 + $0x38] sm:$0xff]  ;;  %v1871_v10 = vld [vmem:[%s3795_s7] sm:$0x3]  ;;  %v2821_v30 = vld [vmem:[#allocation15 + $0x28] sm:$0xff]  ;;  %s2237_s20 = sshll.u32 %s3163_s1, 4  ;;  %s2239_s2 = sshll.u32 %s3798_s10, 4  ;;  %s2238_s20 = int_to_ptr.vmem [resolvable:$true] %s2237_s20  ;;  %s2240_s2 = int_to_ptr.hbm [resolvable:$true] %s2239_s2 }
 0x693   :  { %1972 = vmatpush.bf16.msra.mxu1 %v2641_v43  ;;  %v2831_v5 = vld [vmem:[#allocation15 + $0x78] sm:$0xff]  ;;  %2205 = vmatpush.bf16.msra.mxu2 %v2823_v47  ;;  %v2822_v15 = vld [vmem:[#allocation15 + $0x30] sm:$0xff]  ;;  %v1873_v19 = vperm.slane %v1871_v10, 0  ;;  %v1874_v26 = vperm.slane %v1871_v10, 1  ;;  %v2829_v62 = vld [vmem:[#allocation15 + $0x68] sm:$0xff] }
 0x694   :  { %2218 = vmatpush.bf16.msra.mxu3 %v2831_v5  ;;  %v2830_v52 = vld [vmem:[#allocation15 + $0x70] sm:$0xff]  ;;  %v2820_v45 = vld [vmem:[#allocation15 + $0x20] sm:$0xff]  ;;  %v2819_v59 = vld [vmem:[#allocation15 + $0x18] sm:$0xff] }
 0x695   :  { %v2828_v6 = vld [vmem:[#allocation15 + $0x60] sm:$0xff]  ;;  %v2827_v60 = vld [vmem:[#allocation15 + $0x58] sm:$0xff]  ;;  %v2818_v27 = vld [vmem:[#allocation15 + $0x10] sm:$0xff] }
 0x696   :  { %1960 = vmatpush.bf16.msra.mxu0 %v2629_v35  ;;  %v2826_v28 = vld [vmem:[#allocation15 + $0x50] sm:$0xff]  ;;  %v2817_v33 = vld [vmem:[#allocation15 + $0x8] sm:$0xff]  ;;  %v2816_v61 = vld [vmem:[#allocation15] sm:$0xff] }
 0x697   :  { %1973 = vmatpush.bf16.msra.mxu1 %v2633_v40  ;;  %2206 = vmatpush.bf16.msra.mxu2 %v2822_v15  ;;  %v2825_v4 = vld [vmem:[#allocation15 + $0x48] sm:$0xff]  ;;  %v2824_v16 = vld [vmem:[#allocation15 + $0x40] sm:$0xff] }
 0x698   :  { %2219 = vmatpush.bf16.msra.mxu3 %v2830_v52 }
 0x69a   :  { %1961 = vmatpush.bf16.msra.mxu0 %v2621_v18 }
 0x69b   :  { %1974 = vmatpush.bf16.msra.mxu1 %v2625_v20  ;;  %2207 = vmatpush.bf16.msra.mxu2 %v2821_v30 }
 0x69c   :  { %2220 = vmatpush.bf16.msra.mxu3 %v2829_v62 }
 0x69e   :  { %1962 = vmatpush.bf16.msra.mxu0 %v2613_v25 }
 0x69f   :  { %1975 = vmatpush.bf16.msra.mxu1 %v2617_v29  ;;  %2208 = vmatpush.bf16.msra.mxu2 %v2820_v45 }
 0x6a0   :  { %2221 = vmatpush.bf16.msra.mxu3 %v2828_v6 }
 0x6a2   :  { %1963 = vmatpush.bf16.msra.mxu0 %v2605_v2 }
 0x6a3   :  { %1976 = vmatpush.bf16.msra.mxu1 %v2609_v23  ;;  %2209 = vmatpush.bf16.msra.mxu2 %v2819_v59 }
 0x6a4   :  { %2222 = vmatpush.bf16.msra.mxu3 %v2827_v60 }
 0x6a6   :  { %1964 = vmatpush.bf16.msra.mxu0 %v2597_v17 }
 0x6a7   :  { %1977 = vmatpush.bf16.msra.mxu1 %v2601_v36  ;;  %2210 = vmatpush.bf16.msra.mxu2 %v2818_v27 }
 0x6a8   :  { %2223 = vmatpush.bf16.msra.mxu3 %v2826_v28 }
 0x6a9   :  { %1965 = vmatmul.bf16.vlgmr.msra.gmra.mxu0 %v1854_v12 }
 0x6aa   :  { %1978 = vmatmul.bf16.vlgmr.msra.gmra.mxu1 %v1854_v12 }
 0x6ab   :  { %2211 = vmatpush.bf16.msra.mxu2 %v2817_v33 }
 0x6ac   :  { %2224 = vmatpush.bf16.msra.mxu3 %v2825_v4 }
 0x6af   :  { %2212 = vmatpush.bf16.msra.mxu2 %v2816_v61 }
 0x6b0   :  { %2225 = vmatpush.bf16.msra.mxu3 %v2824_v16 }
 0x726   :  { %v1966_v63 = vpop.f32.mrf.mxu0 }
 0x727   :  { %v3764_v32 = vadd.f32 %v1966_v63, %v1873_v19  ;;  %v1979_v39 = vpop.f32.mrf.mxu1 }
 0x728   :  { %v3766_v42 = vadd.f32 %v1979_v39, %v1874_v26 }
 0x729   :  { %v3769_v14 = vmul.f32 0.70710677, %v3764_v32 }
 0x72a   :  { %v3772_v46 = vmul.f32 0.70710677, %v3766_v42  ;;  %v1984_v4 = vmul.f32 0.5, %v3766_v42 }
 0x72b   :  { %v1987_v55 = vmul.f32 %v3769_v14, %v3769_v14 }
 0x72c   :  { %v2027_v56 = vmul.f32 %v3772_v46, %v3772_v46 }
 0x72d   :  { %v1988_v48 = vmin.f32 %v1987_v55, 16.0 }
 0x72e   :  { %v2028_v31 = vmin.f32 %v2027_v56, 16.0  ;;  %v1968_v3 = vpop.f32.mrf.mxu0 }
 0x72f   :  { %v1989_v9 = vmul.f32 2.1237322e-06, %v1988_v48  ;;  %v1981_v11 = vpop.f32.mrf.mxu1  ;;  %v2000_v21 = vmul.f32 3.8918573e-05, %v1988_v48 }
 0x730   :  { %v2029_v22 = vmul.f32 2.1237322e-06, %v2028_v31  ;;  %v2040_v1 = vmul.f32 3.8918573e-05, %v2028_v31 }
 0x731   :  { %v1990_v43 = vadd.f32 0.00028619796, %v1989_v9  ;;  %v2001_v49 = vadd.f32 0.001143296, %v2000_v21 }
 0x732   :  { %v2030_v50 = vadd.f32 0.00028619796, %v2029_v22  ;;  %v2041_v51 = vadd.f32 0.001143296, %v2040_v1 }
 0x733   :  { %v1991_v58 = vmul.f32 %v1990_v43, %v1988_v48  ;;  %v2002_v35 = vmul.f32 %v2001_v49, %v1988_v48 }
 0x734   :  { %v2031_v40 = vmul.f32 %v2030_v50, %v2028_v31  ;;  %v2042_v41 = vmul.f32 %v2041_v51, %v2028_v31 }
 0x735   :  { %v1992_v7 = vadd.f32 0.0036580483, %v1991_v58  ;;  %v2003_v18 = vadd.f32 0.014752088, %v2002_v35 }
 0x736   :  { %v2043_v20 = vadd.f32 0.014752088, %v2042_v41  ;;  %v2032_v57 = vadd.f32 0.0036580483, %v2031_v40  ;;  %v1983_v40 = vmul.f32 0.5, %v3764_v32 }
 0x737   :  { %v2004_v54 = vmul.f32 %v2003_v18, %v1988_v48  ;;  %v1993_v29 = vmul.f32 %v1992_v7, %v1988_v48 }
 0x738   :  { %v2044_v25 = vmul.f32 %v2043_v20, %v2028_v31  ;;  %v2033_v53 = vmul.f32 %v2032_v57, %v2028_v31 }
 0x739   :  { %v2005_v8 = vadd.f32 0.112945676, %v2004_v54  ;;  %v1994_v23 = vadd.f32 0.05243302, %v1993_v29 }
 0x73a   :  { %v2045_v37 = vadd.f32 0.112945676, %v2044_v25  ;;  %v2034_v13 = vadd.f32 0.05243302, %v2033_v53 }
 0x73b   :  { %v2006_v0 = vmul.f32 %v2005_v8, %v1988_v48  ;;  %v1995_v38 = vmul.f32 %v1994_v23, %v1988_v48 }
 0x73c   :  { %v2046_v2 = vmul.f32 %v2045_v37, %v2028_v31  ;;  %v2035_v47 = vmul.f32 %v2034_v13, %v2028_v31 }
 0x73d   :  { %v2007_v44 = vadd.f32 0.4994258, %v2006_v0  ;;  %v1996_v5 = vadd.f32 0.18741608, %v1995_v38 }
 0x73e   :  { %v2047_v24 = vadd.f32 0.4994258, %v2046_v2  ;;  %v2036_v10 = vadd.f32 0.18741608, %v2035_v47 }
 0x73f   :  { %v2008_v34 = vmul.f32 %v2007_v44, %v1988_v48  ;;  %v1997_v52 = vmul.f32 %v1996_v5, %v1988_v48 }
 0x740   :  { %v2048_v17 = vmul.f32 %v2047_v24, %v2028_v31  ;;  %v2037_v30 = vmul.f32 %v2036_v10, %v2028_v31 }
 0x741   :  { %v2009_v36 = vadd.f32 1.0, %v2008_v34  ;;  %v1998_v39 = vadd.f32 1.1283791, %v1997_v52 }
 0x742   :  { %v2049_v12 = vadd.f32 1.0, %v2048_v17  ;;  %v2038_v60 = vadd.f32 1.1283791, %v2037_v30 }
 0x743   :  { %2986 = vrcp.f32 %v2009_v36  ;;  %v2021_v45 = vand.u32 2147483648, %v2009_v36  ;;  %v2019_v56 = vand.u32 2147483647, %v2009_v36  ;;  %vm2015_vm2 = vweird.f32 %v2009_v36 }
 0x744   :  { %2988 = vrcp.f32 %v2049_v12  ;;  %v2061_v59 = vand.u32 2147483648, %v2049_v12  ;;  %v2059_v9 = vand.u32 2147483647, %v2049_v12  ;;  %vm2055_vm4 = vweird.f32 %v2049_v12 }
 0x745   :  { %v2022_v48 = vor.u32 1.1754944e-38, %v2021_v45  ;;  %v1999_v31 = vmul.f32 %v1998_v39, %v3769_v14  ;;  %vm2020_vm5 = vcmp.eq.f32.partialorder %v2019_v56, 8.507059e+37  ;;  %v2039_v28 = vmul.f32 %v2038_v60, %v3772_v46  ;;  %v2985_v46 = vld [vmem:[%s3797_s9] ss:$0 sm:$0xff] }
 0x746   :  { %v2062_v27 = vor.u32 1.1754944e-38, %v2061_v59  ;;  %vm2060_vm7 = vcmp.eq.f32.partialorder %v2059_v9, 8.507059e+37 }
 0x749   :  { %v2987_v15 = vpop.eup %2986 }
 0x74a   :  { %v2989_v19 = vpop.eup %2988  ;;  %v2011_v26 = vmul.f32 %v2987_v15, %v2009_v36  ;;  %vm2016_vm0 = vweird.f32 %v2987_v15 }
 0x74b   :  { %v2051_v62 = vmul.f32 %v2989_v19, %v2049_v12  ;;  %vm2056_vm1 = vweird.f32 %v2989_v19  ;;  %vm2017_vm3 = vmor %vm2015_vm2, %vm2016_vm0 }
 0x74c   :  { %v2012_v63 = vsub.f32 1.0, %v2011_v26  ;;  %vm2057_vm6 = vmor %vm2055_vm4, %vm2056_vm1 }
 0x74d   :  { %v2052_v6 = vsub.f32 1.0, %v2051_v62 }
 0x74e   :  { %v2013_v55 = vmul.f32 %v2987_v15, %v2012_v63 }
 0x74f   :  { %v2053_v3 = vmul.f32 %v2989_v19, %v2052_v6 }
 0x750   :  { %v2014_v11 = vadd.f32 %v2987_v15, %v2013_v55 }
 0x751   :  { %v2054_v21 = vadd.f32 %v2989_v19, %v2053_v3 }
 0x752   :  { %v2018_v22 = vsel %vm2017_vm3, %v2987_v15, %v2014_v11 }
 0x753   :  { %v2023_v1 = vsel %vm2020_vm5, %v2022_v48, %v2018_v22  ;;  %v2058_v43 = vsel %vm2057_vm6, %v2989_v19, %v2054_v21 }
 0x754   :  { %v2024_v49 = vmul.f32 %v2023_v1, %v1999_v31  ;;  %v2063_v50 = vsel %vm2060_vm7, %v2062_v27, %v2058_v43 }
 0x755   :  { %v2064_v51 = vmul.f32 %v2063_v50, %v2039_v28 }
 0x756   :  { %v2658_v58 = vclamps-f32 %v2024_v49, 1.0 }
 0x757   :  { %v2659_v35 = vclamps-f32 %v2064_v51, 1.0 }
 0x758   :  { %v2067_v33 = vadd.f32 1.0, %v2658_v58 }
 0x759   :  { %v2068_v14 = vadd.f32 1.0, %v2659_v35 }
 0x75a   :  { %v2069_v41 = vmul.f32 %v2067_v33, %v1983_v40 }
 0x75b   :  { %v2070_v7 = vmul.f32 %v2068_v14, %v1984_v4 }
 0x75c   :  { %v2071_v18 = vpack.c.bf16 %v2069_v41, %v2069_v41 }
 0x75d   :  { %v2072_v20 = vpack.c.bf16 %v2070_v7, %v2070_v7 }
 0x75e   :  { %2213 = vmatmul.bf16.vlgmr.msra.gmra.mxu2 %v2071_v18 }
 0x75f   :  { %2226 = vmatmul.bf16.vlgmr.msra.gmra.mxu3 %v2072_v20 }
 0x7e1   :  { %v2214_v57 = vpop.f32.mrf.mxu2 }
 0x7e2   :  { %v2215_v32 = vadd.f32 %v2985_v46, %v2214_v57  ;;  %v2227_v42 = vpop.f32.mrf.mxu3 }
 0x7e4   :  { %v2228_v54 = vadd.f32 %v2227_v42, %v2215_v32 }
 0x7e6   :  { %2231 = vst [vmem:[#allocation16] sm:$0xff] %v2228_v54 }
 0x7e7   :  { %2242 = dma.vmem_to_hbm [thread:$0]  %s2238_s20, 128, %s2240_s2, [#allocation9]  }
 0x7e9   :  { %v2216_v61 = vpop.f32.mrf.mxu2 }
 0x7ea   :  { %v2229_v16 = vpop.f32.mrf.mxu3 }
 0x7eb   :  { %3144 = dma.done.wait [#allocation9], 128  }
 0x7ec   :  { %3145 = vsyncadd [#allocation9], 4294967168 }
 0x7ed   :  { %2247 = vsyncpa [#allocation8], 1 }
 0x7ee   :  { %2248 = vsyncpa [#allocation11], 1 }
 0x7ef   :  { %2249 = vsyncpa [#allocation14], 1 }
 0x7f0   :  { %2250 = vsyncpa [#allocation9], 1 }

</bundles_post_ra>
